<compile_context>
chip_gen: v7x
topology: tpu7x:2x2x1
jax: 0.10.0
libtpu: 0.0.40
codegen_flags: <defaults>
</compile_context>

<pallas_src>
import functools
import math

import jax
import jax.numpy as jnp
from jax.experimental import pallas as pl
from jax.experimental.pallas import tpu as pltpu

# ----------------------------- configuration ---------------------------------
D_IN = 16              # tabular feature count (d_in == d_out in TabDDPM)
DIM_T = 128            # time-embedding width
H1 = 64                # MLP hidden sizes (embedding_dim = [64, 64])
H2 = 64
NUM_CLASSES = 4
ROW_TILE_TARGET = 512  # target rows per grid step for production batches
N_BIAS_ROWS = 8        # bias rows padded to an (8,128) tile
_HALF = DIM_T // 2
_LOG_MAX_PERIOD = math.log(10000.0)


# ------------------------------ Pallas kernel ---------------------------------

def _mlp_diffusion_kernel(t_ref, y_ref, x_ref, w_ref, pw_ref, b_ref, out_ref, *,
                          fused_temb):
    """One [TB, *] row tile of the fused MLPDiffusion forward.

    t_ref  : fused_temb=True  -> [TB, 1]   f32  raw timesteps
             fused_temb=False -> [TB, 128] bf16 precomputed sinusoidal embedding
    y_ref  : [TB, 1]   int32  class labels
    x_ref  : [TB, 16]  bf16   tabular input
    w_ref  : [6, 128, 128] bf16 stacked weights:
             0: time_w1  1: time_w2  2: mlp_w1(pad)  3: mlp_w2(pad)
             4: head_w(pad)          5: silu(label_emb) table (rows >= 4 zero)
    pw_ref : [16, 128] bf16   proj weight
    b_ref  : [8, 128]  f32    stacked biases:
             0: time_b1 1: time_b2 2: proj_b 3: mlp_b1 4: mlp_b2 5: head_b
    out_ref: [TB, 16]  f32    head output (only the 16 valid columns are stored)
    """
    f32, bf16 = jnp.float32, jnp.bfloat16

    tb1 = b_ref[0:1, :]
    tb2 = b_ref[1:2, :]
    pb = b_ref[2:3, :]
    mb1 = b_ref[3:4, :]
    mb2 = b_ref[4:5, :]
    hb = b_ref[5:6, :]

    col = jax.lax.broadcasted_iota(jnp.int32, (1, DIM_T), 1)        # [1, 128]

    # ---- sinusoidal timestep embedding (EUP transcendentals; that slot is idle here)
    if fused_temb:
        fidx = jnp.where(col < _HALF, col, col - _HALF).astype(f32)
        freqs = jnp.exp(fidx * (-_LOG_MAX_PERIOD / _HALF))           # [1, 128]
        args = t_ref[...] * freqs                                    # [TB, 128] f32
        temb = jnp.where(col < _HALF, jnp.cos(args), jnp.sin(args)).astype(bf16)
    else:
        temb = t_ref[...]                                            # already bf16

    # ---- time_embed: Linear -> SiLU -> Linear (bf16 MXU feeds, f32 accumulate)
    h = jnp.dot(temb, w_ref[0], preferred_element_type=f32) + tb1
    h = h * jax.nn.sigmoid(h)                                        # SiLU in f32
    emb = jnp.dot(h.astype(bf16), w_ref[1], preferred_element_type=f32) + tb2

    # ---- label conditioning: emb += silu(label_emb(y)), fused as a one-hot matmul
    onehot = jnp.where(y_ref[...] == col, 1.0, 0.0).astype(bf16)     # [TB, 128]
    emb = emb + jnp.dot(onehot, w_ref[5], preferred_element_type=f32)

    # ---- x = proj(x) + emb
    h = jnp.dot(x_ref[...], pw_ref[...], preferred_element_type=f32) + pb + emb

    # ---- MLP blocks: Linear -> ReLU (dropout = 0.0 -> identity); hidden dims are
    #      zero-padded to 128 lanes so every dot runs on clean (8,128) tiles.
    h = jnp.maximum(
        jnp.dot(h.astype(bf16), w_ref[2], preferred_element_type=f32) + mb1, 0.0)
    h = jnp.maximum(
        jnp.dot(h.astype(bf16), w_ref[3], preferred_element_type=f32) + mb2, 0.0)

    # ---- head; only the 16 valid output columns are stored (8x less HBM writeback)
    head = jnp.dot(h.astype(bf16), w_ref[4], preferred_element_type=f32) + hb
    out_ref[...] = head[:, :D_IN]


# -------------------------------- wrapper --------------------------------------

def timestep_embedding(timesteps, dim, max_period=10000):
    """[N] -> [N, dim] sinusoidal embedding (matches the PyTorch reference)."""
    half = dim // 2
    freqs = jnp.exp(
        -math.log(max_period) * jnp.arange(0, half, dtype=jnp.float32) / half)
    args = timesteps.astype(jnp.float32)[:, None] * freqs[None, :]
    emb = jnp.concatenate([jnp.cos(args), jnp.sin(args)], axis=-1)
    if dim % 2:
        emb = jnp.concatenate([emb, jnp.zeros_like(emb[:, :1])], axis=-1)
    return emb


def make_params(key):
    """Synthetic parameters with PyTorch-like init, stored as [in, out] matrices."""
    ks = iter(jax.random.split(key, 20))

    def linear(kw, kb, fan_in, fan_out):
        bound = 1.0 / math.sqrt(fan_in)
        w = jax.random.uniform(kw, (fan_in, fan_out), jnp.float32, -bound, bound)
        b = jax.random.uniform(kb, (fan_out,), jnp.float32, -bound, bound)
        return w, b

    p = {}
    p["time_w1"], p["time_b1"] = linear(next(ks), next(ks), DIM_T, DIM_T)
    p["time_w2"], p["time_b2"] = linear(next(ks), next(ks), DIM_T, DIM_T)
    p["proj_w"], p["proj_b"] = linear(next(ks), next(ks), D_IN, DIM_T)
    p["mlp_w1"], p["mlp_b1"] = linear(next(ks), next(ks), DIM_T, H1)
    p["mlp_w2"], p["mlp_b2"] = linear(next(ks), next(ks), H1, H2)
    p["head_w"], p["head_b"] = linear(next(ks), next(ks), H2, D_IN)
    p["label_w"] = jax.random.normal(next(ks), (NUM_CLASSES, DIM_T), jnp.float32)
    return p


def pack_params(params):
    """Pad to 128 lanes, coalesce into 3 operands, cast matmul weights to bf16."""

    def pad2d(a):
        out = jnp.zeros((DIM_T, DIM_T), a.dtype)
        return out.at[: a.shape[0], : a.shape[1]].set(a)

    # silu commutes with the row gather, so pre-apply it to the embedding table (f32).
    silu_label = params["label_w"] * jax.nn.sigmoid(params["label_w"])

    w_stack = jnp.stack([
        params["time_w1"],
        params["time_w2"],
        pad2d(params["mlp_w1"]),
        pad2d(params["mlp_w2"]),
        pad2d(params["head_w"]),
        pad2d(silu_label),
    ]).astype(jnp.bfloat16)                                        # [6, 128, 128]

    biases = jnp.zeros((N_BIAS_ROWS, DIM_T), jnp.float32)
    for row, name in enumerate(
            ["time_b1", "time_b2", "proj_b", "mlp_b1", "mlp_b2", "head_b"]):
        vec = params[name]
        biases = biases.at[row, : vec.shape[0]].set(vec)

    return {
        "w_stack": w_stack,                                        # [6, 128, 128] bf16
        "proj_w": params["proj_w"].astype(jnp.bfloat16),           # [16, 128] bf16
        "biases": biases,                                          # [8, 128] f32
    }


def _round_up(n, m):
    return ((n + m - 1) // m) * m


def _choose_row_tile(batch, target=ROW_TILE_TARGET):
    """Rows per grid step: large enough to amortize the ~0.35 us per-step overhead,
    but clamped to ceil(B/2) so the 'parallel' axis has >= 2 balanced tiles and both
    v7x TensorCores get work.  Rounded to 16 sublanes (covers bf16 packing)."""
    if batch <= 16:
        return _round_up(max(batch, 1), 16)
    return max(16, min(target, _round_up(pl.cdiv(batch, 2), 16)))


def mlp_diffusion_forward(packed, x, timesteps, y, *, fuse_temb=True, row_tile=None):
    """Fused forward. x: [B, 16], timesteps: [B], y: [B] int."""
    B = x.shape[0]
    if row_tile is None:
        row_tile = _choose_row_tile(B)
    n_tiles = pl.cdiv(B, row_tile)

    x_bf = x.astype(jnp.bfloat16)                 # only ever feeds a bf16 MXU dot
    y2d = y.astype(jnp.int32).reshape(B, 1)

    if fuse_temb:
        t_in = timesteps.astype(jnp.float32).reshape(B, 1)
        t_spec = pl.BlockSpec((row_tile, 1), lambda i: (i, 0))
    else:
        # Fallback: precompute the sinusoidal embedding in the wrapper (bf16 stream).
        t_in = timestep_embedding(timesteps, DIM_T).astype(jnp.bfloat16)
        t_spec = pl.BlockSpec((row_tile, DIM_T), lambda i: (i, 0))

    row_block = lambda i: (i, 0)
    const2 = lambda i: (0, 0)
    const3 = lambda i: (0, 0, 0)

    # No wrapper-side padding: rows are independent and Pallas clips the last partial
    # block's DMAs, so garbage rows in VMEM are never written back to HBM.
    return pl.pallas_call(
        functools.partial(_mlp_diffusion_kernel, fused_temb=fuse_temb),
        out_shape=jax.ShapeDtypeStruct((B, D_IN), jnp.float32),
        grid=(n_tiles,),
        in_specs=[
            t_spec,                                               # timesteps / temb
            pl.BlockSpec((row_tile, 1), row_block),               # y   (row stream)
            pl.BlockSpec((row_tile, D_IN), row_block),            # x   (row stream)
            # Resident operands (constant index_map -> fetched once, reused per step).
            # TODO(synk): pipeline_mode=pl.Buffered(1) would drop their dead second
            # buffer (~200 KiB VMEM); negligible at current tile sizes.
            pl.BlockSpec((6, DIM_T, DIM_T), const3),              # weight stack
            pl.BlockSpec((D_IN, DIM_T), const2),                  # proj weight
            pl.BlockSpec((N_BIAS_ROWS, DIM_T), const2),           # biases
        ],
        out_specs=pl.BlockSpec((row_tile, D_IN), row_block),
        compiler_params=pltpu.CompilerParams(
            dimension_semantics=("parallel",)),   # v7x: row tiles split over 2 TCs
    )(t_in, y2d, x_bf, packed["w_stack"], packed["proj_w"], packed["biases"])


forward = jax.jit(mlp_diffusion_forward, static_argnames=("fuse_temb", "row_tile"))


# ------------------------------- reference -------------------------------------

def reference_forward(params, x, timesteps, y, *, bf16_matmul=True):
    """Pure-JAX reference mirroring the PyTorch module (eval / dropout=0).
    bf16_matmul=True mirrors the kernel's bf16 MXU feeds (f32 accumulation)."""
    f32 = jnp.float32
    feed = (lambda a: a.astype(jnp.bfloat16)) if bf16_matmul else (lambda a: a.astype(f32))
    dot = lambda a, b: jnp.dot(feed(a), feed(b), preferred_element_type=f32)
    silu = lambda v: v * jax.nn.sigmoid(v)

    temb = timestep_embedding(timesteps, DIM_T)
    emb = dot(temb, params["time_w1"]) + params["time_b1"]
    emb = dot(silu(emb), params["time_w2"]) + params["time_b2"]
    lab = silu(params["label_w"])
    if bf16_matmul:
        lab = lab.astype(jnp.bfloat16).astype(f32)
    emb = emb + jnp.take(lab, y, axis=0)
    h = dot(x.astype(f32), params["proj_w"]) + params["proj_b"] + emb
    h = jax.nn.relu(dot(h, params["mlp_w1"]) + params["mlp_b1"])
    h = jax.nn.relu(dot(h, params["mlp_w2"]) + params["mlp_b2"])
    return dot(h, params["head_w"]) + params["head_b"]


# ---------------------------------- main ----------------------------------------

if __name__ == "__main__":
    B = 200   # not a multiple of the row tile: exercises the clipped last block

    key = jax.random.PRNGKey(0)
    kp, kx, kt, ky = jax.random.split(key, 4)

    params = make_params(kp)
    packed = pack_params(params)

    x = jax.random.normal(kx, (B, D_IN), dtype=jnp.float32)
    timesteps = jax.random.randint(kt, (B,), 0, 1000).astype(jnp.float32)
    y = jax.random.randint(ky, (B,), 0, NUM_CLASSES)

    ref_matched = reference_forward(params, x, timesteps, y, bf16_matmul=True)
    ref_f32 = reference_forward(params, x, timesteps, y, bf16_matmul=False)

    def run_and_check(fuse_temb):
        out = jax.block_until_ready(
            forward(packed, x, timesteps, y, fuse_temb=fuse_temb))
        assert out.shape == (B, D_IN), out.shape
        err_matched = float(jnp.max(jnp.abs(out - ref_matched)))
        err_f32 = float(jnp.max(jnp.abs(out - ref_f32)))
        assert err_matched < 5e-2, f"mismatch vs bf16-matched reference: {err_matched}"
        assert err_f32 < 0.25, f"mismatch vs f32 reference: {err_f32}"
        return out

    try:
        run_and_check(True)
    except Exception:
        # TODO(synk): in-kernel sin/cos lowering unavailable on this generation;
        # fall back to the wrapper-side sinusoidal embedding (same math, bigger input stream).
        run_and_check(False)

    print("KERNEL_OK")
</pallas_src>

<mosaic_0001>
module attributes {stable_mosaic.version = 11 : i64} {
  func.func @_mlp_diffusion_kernel(%arg0: i32, %arg1: memref<112x1xf32, #tpu.memory_space<vmem>>, %arg2: memref<112x1xi32, #tpu.memory_space<vmem>>, %arg3: memref<112x16xbf16, #tpu.memory_space<vmem>>, %arg4: memref<6x128x128xbf16, #tpu.memory_space<vmem>>, %arg5: memref<16x128xbf16, #tpu.memory_space<vmem>>, %arg6: memref<8x128xf32, #tpu.memory_space<vmem>>, %arg7: memref<112x16xf32, #tpu.memory_space<vmem>>) attributes {dimension_semantics = [#tpu.dimension_semantics<parallel>], iteration_bounds = array<i64: 2>, scalar_prefetch = 0 : i64, scratch_operands = 0 : i64, tpu.core_type = #tpu.core_type<tc>, window_params = [{transform_indices = @transform_0, window_bounds = array<i64: 112, 1>}, {transform_indices = @transform_1, window_bounds = array<i64: 112, 1>}, {transform_indices = @transform_2, window_bounds = array<i64: 112, 16>}, {pipeline_mode = #tpu.pipeline_mode<synchronous>, transform_indices = @transform_3, window_bounds = array<i64: 6, 128, 128>}, {pipeline_mode = #tpu.pipeline_mode<synchronous>, transform_indices = @transform_4, window_bounds = array<i64: 16, 128>}, {pipeline_mode = #tpu.pipeline_mode<synchronous>, transform_indices = @transform_5, window_bounds = array<i64: 8, 128>}, {transform_indices = @transform_6, window_bounds = array<i64: 112, 16>}]} {
    %c0 = arith.constant 0 : index
    %c0_0 = arith.constant 0 : index
    %0 = vector.load %arg6[%c0, %c0_0] : memref<8x128xf32, #tpu.memory_space<vmem>>, vector<1x128xf32>
    %c1 = arith.constant 1 : index
    %c0_1 = arith.constant 0 : index
    %1 = vector.load %arg6[%c1, %c0_1] : memref<8x128xf32, #tpu.memory_space<vmem>>, vector<1x128xf32>
    %c2 = arith.constant 2 : index
    %c0_2 = arith.constant 0 : index
    %2 = vector.load %arg6[%c2, %c0_2] : memref<8x128xf32, #tpu.memory_space<vmem>>, vector<1x128xf32>
    %c3 = arith.constant 3 : index
    %c0_3 = arith.constant 0 : index
    %3 = vector.load %arg6[%c3, %c0_3] : memref<8x128xf32, #tpu.memory_space<vmem>>, vector<1x128xf32>
    %c4 = arith.constant 4 : index
    %c0_4 = arith.constant 0 : index
    %4 = vector.load %arg6[%c4, %c0_4] : memref<8x128xf32, #tpu.memory_space<vmem>>, vector<1x128xf32>
    %c5 = arith.constant 5 : index
    %c0_5 = arith.constant 0 : index
    %5 = vector.load %arg6[%c5, %c0_5] : memref<8x128xf32, #tpu.memory_space<vmem>>, vector<1x128xf32>
    %6 = tpu.iota {dimensions = array<i32: 1>} : vector<1x128xi32>
    %c64_i32 = arith.constant 64 : i32
    %7 = vector.broadcast %c64_i32 : i32 to vector<1x128xi32>
    %8 = arith.cmpi slt, %6, %7 : vector<1x128xi32>
    %c64_i32_6 = arith.constant 64 : i32
    %9 = vector.broadcast %c64_i32_6 : i32 to vector<1x128xi32>
    %10 = arith.subi %6, %9 : vector<1x128xi32>
    %11 = arith.select %8, %6, %10 : vector<1x128xi1>, vector<1x128xi32>
    %12 = arith.sitofp %11 : vector<1x128xi32> to vector<1x128xf32>
    %cst = arith.constant -0.14391157 : f32
    %13 = vector.broadcast %cst : f32 to vector<1x128xf32>
    %14 = arith.mulf %12, %13 : vector<1x128xf32>
    %15 = math.exp %14 : vector<1x128xf32>
    %c0_7 = arith.constant 0 : index
    %c0_8 = arith.constant 0 : index
    %16 = vector.load %arg1[%c0_7, %c0_8] : memref<112x1xf32, #tpu.memory_space<vmem>>, vector<112x1xf32>
    %17 = vector.broadcast %16 : vector<112x1xf32> to vector<112x128xf32>
    %18 = vector.broadcast %15 : vector<1x128xf32> to vector<112x128xf32>
    %19 = arith.mulf %17, %18 : vector<112x128xf32>
    %c64_i32_9 = arith.constant 64 : i32
    %20 = vector.broadcast %c64_i32_9 : i32 to vector<1x128xi32>
    %21 = arith.cmpi slt, %6, %20 : vector<1x128xi32>
    %22 = math.cos %19 : vector<112x128xf32>
    %23 = math.sin %19 : vector<112x128xf32>
    %24 = vector.shape_cast %21 : vector<1x128xi1> to vector<1x128xi1>
    %25 = vector.broadcast %24 : vector<1x128xi1> to vector<112x128xi1>
    %26 = arith.select %25, %22, %23 : vector<112x128xi1>, vector<112x128xf32>
    %27 = arith.truncf %26 : vector<112x128xf32> to vector<112x128xbf16>
    %c0_10 = arith.constant 0 : index
    %c0_11 = arith.constant 0 : index
    %c0_12 = arith.constant 0 : index
    %28 = vector.load %arg4[%c0_10, %c0_11, %c0_12] : memref<6x128x128xbf16, #tpu.memory_space<vmem>>, vector<1x128x128xbf16>
    %29 = vector.shape_cast %28 : vector<1x128x128xbf16> to vector<128x128xbf16>
    %cst_13 = arith.constant dense<0.000000e+00> : vector<112x128xf32>
    %30 = tpu.matmul %27, %29, %cst_13 {dimension_numbers = #tpu.dot_dimension_numbers<[1], [0], [0], [1], [0, 0, 1, 1], [], []>} : vector<112x128xbf16>, vector<128x128xbf16>, vector<112x128xf32> -> vector<112x128xf32>
    %31 = vector.broadcast %0 : vector<1x128xf32> to vector<112x128xf32>
    %32 = arith.addf %30, %31 : vector<112x128xf32>
    %33 = arith.negf %32 : vector<112x128xf32>
    %34 = math.exp %33 : vector<112x128xf32>
    %cst_14 = arith.constant 1.000000e+00 : f32
    %35 = vector.broadcast %cst_14 : f32 to vector<112x128xf32>
    %36 = arith.addf %35, %34 : vector<112x128xf32>
    %37 = arith.divf %35, %36 : vector<112x128xf32>
    %38 = arith.mulf %32, %37 : vector<112x128xf32>
    %39 = arith.truncf %38 : vector<112x128xf32> to vector<112x128xbf16>
    %c1_15 = arith.constant 1 : index
    %c0_16 = arith.constant 0 : index
    %c0_17 = arith.constant 0 : index
    %40 = vector.load %arg4[%c1_15, %c0_16, %c0_17] : memref<6x128x128xbf16, #tpu.memory_space<vmem>>, vector<1x128x128xbf16>
    %41 = vector.shape_cast %40 : vector<1x128x128xbf16> to vector<128x128xbf16>
    %cst_18 = arith.constant dense<0.000000e+00> : vector<112x128xf32>
    %42 = tpu.matmul %39, %41, %cst_18 {dimension_numbers = #tpu.dot_dimension_numbers<[1], [0], [0], [1], [0, 0, 1, 1], [], []>} : vector<112x128xbf16>, vector<128x128xbf16>, vector<112x128xf32> -> vector<112x128xf32>
    %43 = vector.broadcast %1 : vector<1x128xf32> to vector<112x128xf32>
    %44 = arith.addf %42, %43 : vector<112x128xf32>
    %c0_19 = arith.constant 0 : index
    %c0_20 = arith.constant 0 : index
    %45 = vector.load %arg2[%c0_19, %c0_20] : memref<112x1xi32, #tpu.memory_space<vmem>>, vector<112x1xi32>
    %46 = vector.broadcast %45 : vector<112x1xi32> to vector<112x128xi32>
    %47 = vector.broadcast %6 : vector<1x128xi32> to vector<112x128xi32>
    %48 = arith.cmpi eq, %46, %47 : vector<112x128xi32>
    %cst_21 = arith.constant 1.000000e+00 : f32
    %cst_22 = arith.constant 0.000000e+00 : f32
    %49 = vector.broadcast %cst_21 : f32 to vector<112x128xf32>
    %50 = vector.broadcast %cst_22 : f32 to vector<112x128xf32>
    %51 = arith.select %48, %49, %50 : vector<112x128xi1>, vector<112x128xf32>
    %52 = arith.truncf %51 : vector<112x128xf32> to vector<112x128xbf16>
    %c5_23 = arith.constant 5 : index
    %c0_24 = arith.constant 0 : index
    %c0_25 = arith.constant 0 : index
    %53 = vector.load %arg4[%c5_23, %c0_24, %c0_25] : memref<6x128x128xbf16, #tpu.memory_space<vmem>>, vector<1x128x128xbf16>
    %54 = vector.shape_cast %53 : vector<1x128x128xbf16> to vector<128x128xbf16>
    %cst_26 = arith.constant dense<0.000000e+00> : vector<112x128xf32>
    %55 = tpu.matmul %52, %54, %cst_26 {dimension_numbers = #tpu.dot_dimension_numbers<[1], [0], [0], [1], [0, 0, 1, 1], [], []>} : vector<112x128xbf16>, vector<128x128xbf16>, vector<112x128xf32> -> vector<112x128xf32>
    %56 = arith.addf %44, %55 : vector<112x128xf32>
    %c0_27 = arith.constant 0 : index
    %c0_28 = arith.constant 0 : index
    %57 = vector.load %arg3[%c0_27, %c0_28] : memref<112x16xbf16, #tpu.memory_space<vmem>>, vector<112x16xbf16>
    %c0_29 = arith.constant 0 : index
    %c0_30 = arith.constant 0 : index
    %58 = vector.load %arg5[%c0_29, %c0_30] : memref<16x128xbf16, #tpu.memory_space<vmem>>, vector<16x128xbf16>
    %cst_31 = arith.constant dense<0.000000e+00> : vector<112x128xf32>
    %59 = tpu.matmul %57, %58, %cst_31 {dimension_numbers = #tpu.dot_dimension_numbers<[1], [0], [0], [1], [0, 0, 1, 1], [], []>} : vector<112x16xbf16>, vector<16x128xbf16>, vector<112x128xf32> -> vector<112x128xf32>
    %60 = vector.broadcast %2 : vector<1x128xf32> to vector<112x128xf32>
    %61 = arith.addf %59, %60 : vector<112x128xf32>
    %62 = arith.addf %61, %56 : vector<112x128xf32>
    %63 = arith.truncf %62 : vector<112x128xf32> to vector<112x128xbf16>
    %c2_32 = arith.constant 2 : index
    %c0_33 = arith.constant 0 : index
    %c0_34 = arith.constant 0 : index
    %64 = vector.load %arg4[%c2_32, %c0_33, %c0_34] : memref<6x128x128xbf16, #tpu.memory_space<vmem>>, vector<1x128x128xbf16>
    %65 = vector.shape_cast %64 : vector<1x128x128xbf16> to vector<128x128xbf16>
    %cst_35 = arith.constant dense<0.000000e+00> : vector<112x128xf32>
    %66 = tpu.matmul %63, %65, %cst_35 {dimension_numbers = #tpu.dot_dimension_numbers<[1], [0], [0], [1], [0, 0, 1, 1], [], []>} : vector<112x128xbf16>, vector<128x128xbf16>, vector<112x128xf32> -> vector<112x128xf32>
    %67 = vector.broadcast %3 : vector<1x128xf32> to vector<112x128xf32>
    %68 = arith.addf %66, %67 : vector<112x128xf32>
    %cst_36 = arith.constant 0.000000e+00 : f32
    %69 = vector.broadcast %cst_36 : f32 to vector<112x128xf32>
    %70 = arith.maximumf %68, %69 : vector<112x128xf32>
    %71 = arith.truncf %70 : vector<112x128xf32> to vector<112x128xbf16>
    %c3_37 = arith.constant 3 : index
    %c0_38 = arith.constant 0 : index
    %c0_39 = arith.constant 0 : index
    %72 = vector.load %arg4[%c3_37, %c0_38, %c0_39] : memref<6x128x128xbf16, #tpu.memory_space<vmem>>, vector<1x128x128xbf16>
    %73 = vector.shape_cast %72 : vector<1x128x128xbf16> to vector<128x128xbf16>
    %cst_40 = arith.constant dense<0.000000e+00> : vector<112x128xf32>
    %74 = tpu.matmul %71, %73, %cst_40 {dimension_numbers = #tpu.dot_dimension_numbers<[1], [0], [0], [1], [0, 0, 1, 1], [], []>} : vector<112x128xbf16>, vector<128x128xbf16>, vector<112x128xf32> -> vector<112x128xf32>
    %75 = vector.broadcast %4 : vector<1x128xf32> to vector<112x128xf32>
    %76 = arith.addf %74, %75 : vector<112x128xf32>
    %cst_41 = arith.constant 0.000000e+00 : f32
    %77 = vector.broadcast %cst_41 : f32 to vector<112x128xf32>
    %78 = arith.maximumf %76, %77 : vector<112x128xf32>
    %79 = arith.truncf %78 : vector<112x128xf32> to vector<112x128xbf16>
    %c4_42 = arith.constant 4 : index
    %c0_43 = arith.constant 0 : index
    %c0_44 = arith.constant 0 : index
    %80 = vector.load %arg4[%c4_42, %c0_43, %c0_44] : memref<6x128x128xbf16, #tpu.memory_space<vmem>>, vector<1x128x128xbf16>
    %81 = vector.shape_cast %80 : vector<1x128x128xbf16> to vector<128x128xbf16>
    %cst_45 = arith.constant dense<0.000000e+00> : vector<112x128xf32>
    %82 = tpu.matmul %79, %81, %cst_45 {dimension_numbers = #tpu.dot_dimension_numbers<[1], [0], [0], [1], [0, 0, 1, 1], [], []>} : vector<112x128xbf16>, vector<128x128xbf16>, vector<112x128xf32> -> vector<112x128xf32>
    %83 = vector.broadcast %5 : vector<1x128xf32> to vector<112x128xf32>
    %84 = arith.addf %82, %83 : vector<112x128xf32>
    %85 = vector.extract_strided_slice %84 {offsets = [0, 0], sizes = [112, 16], strides = [1, 1]} : vector<112x128xf32> to vector<112x16xf32>
    %c0_46 = arith.constant 0 : index
    %c0_47 = arith.constant 0 : index
    %86 = vector.load %arg7[%c0_46, %c0_47] : memref<112x16xf32, #tpu.memory_space<vmem>>, vector<112x16xf32>
    tpu.vector_store %arg7[%c0_46, %c0_47], %85 {strides = array<i32>} : memref<112x16xf32, #tpu.memory_space<vmem>>, vector<112x16xf32>,
    return
  }
  func.func @transform_0(%arg0: i32) -> (i32, i32) {
    %c0_i32 = arith.constant 0 : i32
    %c0_i32_0 = arith.constant 0 : i32
    return %arg0, %c0_i32 : i32, i32
  }
  func.func @transform_1(%arg0: i32) -> (i32, i32) {
    %c0_i32 = arith.constant 0 : i32
    %c0_i32_0 = arith.constant 0 : i32
    return %arg0, %c0_i32 : i32, i32
  }
  func.func @transform_2(%arg0: i32) -> (i32, i32) {
    %c0_i32 = arith.constant 0 : i32
    %c0_i32_0 = arith.constant 0 : i32
    return %arg0, %c0_i32 : i32, i32
  }
  func.func @transform_3(%arg0: i32) -> (i32, i32, i32) {
    %c0_i32 = arith.constant 0 : i32
    %c0_i32_0 = arith.constant 0 : i32
    %c0_i32_1 = arith.constant 0 : i32
    %c0_i32_2 = arith.constant 0 : i32
    return %c0_i32, %c0_i32_0, %c0_i32_1 : i32, i32, i32
  }
  func.func @transform_4(%arg0: i32) -> (i32, i32) {
    %c0_i32 = arith.constant 0 : i32
    %c0_i32_0 = arith.constant 0 : i32
    %c0_i32_1 = arith.constant 0 : i32
    return %c0_i32, %c0_i32_0 : i32, i32
  }
  func.func @transform_5(%arg0: i32) -> (i32, i32) {
    %c0_i32 = arith.constant 0 : i32
    %c0_i32_0 = arith.constant 0 : i32
    %c0_i32_1 = arith.constant 0 : i32
    return %c0_i32, %c0_i32_0 : i32, i32
  }
  func.func @transform_6(%arg0: i32) -> (i32, i32) {
    %c0_i32 = arith.constant 0 : i32
    %c0_i32_0 = arith.constant 0 : i32
    return %arg0, %c0_i32 : i32, i32
  }
}

module attributes {stable_mosaic.version = 11 : i64} {
  func.func @_mlp_diffusion_kernel(%arg0: i32, %arg1: memref<112x128xbf16, #tpu.memory_space<vmem>>, %arg2: memref<112x1xi32, #tpu.memory_space<vmem>>, %arg3: memref<112x16xbf16, #tpu.memory_space<vmem>>, %arg4: memref<6x128x128xbf16, #tpu.memory_space<vmem>>, %arg5: memref<16x128xbf16, #tpu.memory_space<vmem>>, %arg6: memref<8x128xf32, #tpu.memory_space<vmem>>, %arg7: memref<112x16xf32, #tpu.memory_space<vmem>>) attributes {dimension_semantics = [#tpu.dimension_semantics<parallel>], iteration_bounds = array<i64: 2>, scalar_prefetch = 0 : i64, scratch_operands = 0 : i64, tpu.core_type = #tpu.core_type<tc>, window_params = [{transform_indices = @transform_0, window_bounds = array<i64: 112, 128>}, {transform_indices = @transform_1, window_bounds = array<i64: 112, 1>}, {transform_indices = @transform_2, window_bounds = array<i64: 112, 16>}, {pipeline_mode = #tpu.pipeline_mode<synchronous>, transform_indices = @transform_3, window_bounds = array<i64: 6, 128, 128>}, {pipeline_mode = #tpu.pipeline_mode<synchronous>, transform_indices = @transform_4, window_bounds = array<i64: 16, 128>}, {pipeline_mode = #tpu.pipeline_mode<synchronous>, transform_indices = @transform_5, window_bounds = array<i64: 8, 128>}, {transform_indices = @transform_6, window_bounds = array<i64: 112, 16>}]} {
    %c0 = arith.constant 0 : index
    %c0_0 = arith.constant 0 : index
    %0 = vector.load %arg6[%c0, %c0_0] : memref<8x128xf32, #tpu.memory_space<vmem>>, vector<1x128xf32>
    %c1 = arith.constant 1 : index
    %c0_1 = arith.constant 0 : index
    %1 = vector.load %arg6[%c1, %c0_1] : memref<8x128xf32, #tpu.memory_space<vmem>>, vector<1x128xf32>
    %c2 = arith.constant 2 : index
    %c0_2 = arith.constant 0 : index
    %2 = vector.load %arg6[%c2, %c0_2] : memref<8x128xf32, #tpu.memory_space<vmem>>, vector<1x128xf32>
    %c3 = arith.constant 3 : index
    %c0_3 = arith.constant 0 : index
    %3 = vector.load %arg6[%c3, %c0_3] : memref<8x128xf32, #tpu.memory_space<vmem>>, vector<1x128xf32>
    %c4 = arith.constant 4 : index
    %c0_4 = arith.constant 0 : index
    %4 = vector.load %arg6[%c4, %c0_4] : memref<8x128xf32, #tpu.memory_space<vmem>>, vector<1x128xf32>
    %c5 = arith.constant 5 : index
    %c0_5 = arith.constant 0 : index
    %5 = vector.load %arg6[%c5, %c0_5] : memref<8x128xf32, #tpu.memory_space<vmem>>, vector<1x128xf32>
    %6 = tpu.iota {dimensions = array<i32: 1>} : vector<1x128xi32>
    %c0_6 = arith.constant 0 : index
    %c0_7 = arith.constant 0 : index
    %7 = vector.load %arg1[%c0_6, %c0_7] : memref<112x128xbf16, #tpu.memory_space<vmem>>, vector<112x128xbf16>
    %c0_8 = arith.constant 0 : index
    %c0_9 = arith.constant 0 : index
    %c0_10 = arith.constant 0 : index
    %8 = vector.load %arg4[%c0_8, %c0_9, %c0_10] : memref<6x128x128xbf16, #tpu.memory_space<vmem>>, vector<1x128x128xbf16>
    %9 = vector.shape_cast %8 : vector<1x128x128xbf16> to vector<128x128xbf16>
    %cst = arith.constant dense<0.000000e+00> : vector<112x128xf32>
    %10 = tpu.matmul %7, %9, %cst {dimension_numbers = #tpu.dot_dimension_numbers<[1], [0], [0], [1], [0, 0, 1, 1], [], []>} : vector<112x128xbf16>, vector<128x128xbf16>, vector<112x128xf32> -> vector<112x128xf32>
    %11 = vector.broadcast %0 : vector<1x128xf32> to vector<112x128xf32>
    %12 = arith.addf %10, %11 : vector<112x128xf32>
    %13 = arith.negf %12 : vector<112x128xf32>
    %14 = math.exp %13 : vector<112x128xf32>
    %cst_11 = arith.constant 1.000000e+00 : f32
    %15 = vector.broadcast %cst_11 : f32 to vector<112x128xf32>
    %16 = arith.addf %15, %14 : vector<112x128xf32>
    %17 = arith.divf %15, %16 : vector<112x128xf32>
    %18 = arith.mulf %12, %17 : vector<112x128xf32>
    %19 = arith.truncf %18 : vector<112x128xf32> to vector<112x128xbf16>
    %c1_12 = arith.constant 1 : index
    %c0_13 = arith.constant 0 : index
    %c0_14 = arith.constant 0 : index
    %20 = vector.load %arg4[%c1_12, %c0_13, %c0_14] : memref<6x128x128xbf16, #tpu.memory_space<vmem>>, vector<1x128x128xbf16>
    %21 = vector.shape_cast %20 : vector<1x128x128xbf16> to vector<128x128xbf16>
    %cst_15 = arith.constant dense<0.000000e+00> : vector<112x128xf32>
    %22 = tpu.matmul %19, %21, %cst_15 {dimension_numbers = #tpu.dot_dimension_numbers<[1], [0], [0], [1], [0, 0, 1, 1], [], []>} : vector<112x128xbf16>, vector<128x128xbf16>, vector<112x128xf32> -> vector<112x128xf32>
    %23 = vector.broadcast %1 : vector<1x128xf32> to vector<112x128xf32>
    %24 = arith.addf %22, %23 : vector<112x128xf32>
    %c0_16 = arith.constant 0 : index
    %c0_17 = arith.constant 0 : index
    %25 = vector.load %arg2[%c0_16, %c0_17] : memref<112x1xi32, #tpu.memory_space<vmem>>, vector<112x1xi32>
    %26 = vector.broadcast %25 : vector<112x1xi32> to vector<112x128xi32>
    %27 = vector.broadcast %6 : vector<1x128xi32> to vector<112x128xi32>
    %28 = arith.cmpi eq, %26, %27 : vector<112x128xi32>
    %cst_18 = arith.constant 1.000000e+00 : f32
    %cst_19 = arith.constant 0.000000e+00 : f32
    %29 = vector.broadcast %cst_18 : f32 to vector<112x128xf32>
    %30 = vector.broadcast %cst_19 : f32 to vector<112x128xf32>
    %31 = arith.select %28, %29, %30 : vector<112x128xi1>, vector<112x128xf32>
    %32 = arith.truncf %31 : vector<112x128xf32> to vector<112x128xbf16>
    %c5_20 = arith.constant 5 : index
    %c0_21 = arith.constant 0 : index
    %c0_22 = arith.constant 0 : index
    %33 = vector.load %arg4[%c5_20, %c0_21, %c0_22] : memref<6x128x128xbf16, #tpu.memory_space<vmem>>, vector<1x128x128xbf16>
    %34 = vector.shape_cast %33 : vector<1x128x128xbf16> to vector<128x128xbf16>
    %cst_23 = arith.constant dense<0.000000e+00> : vector<112x128xf32>
    %35 = tpu.matmul %32, %34, %cst_23 {dimension_numbers = #tpu.dot_dimension_numbers<[1], [0], [0], [1], [0, 0, 1, 1], [], []>} : vector<112x128xbf16>, vector<128x128xbf16>, vector<112x128xf32> -> vector<112x128xf32>
    %36 = arith.addf %24, %35 : vector<112x128xf32>
    %c0_24 = arith.constant 0 : index
    %c0_25 = arith.constant 0 : index
    %37 = vector.load %arg3[%c0_24, %c0_25] : memref<112x16xbf16, #tpu.memory_space<vmem>>, vector<112x16xbf16>
    %c0_26 = arith.constant 0 : index
    %c0_27 = arith.constant 0 : index
    %38 = vector.load %arg5[%c0_26, %c0_27] : memref<16x128xbf16, #tpu.memory_space<vmem>>, vector<16x128xbf16>
    %cst_28 = arith.constant dense<0.000000e+00> : vector<112x128xf32>
    %39 = tpu.matmul %37, %38, %cst_28 {dimension_numbers = #tpu.dot_dimension_numbers<[1], [0], [0], [1], [0, 0, 1, 1], [], []>} : vector<112x16xbf16>, vector<16x128xbf16>, vector<112x128xf32> -> vector<112x128xf32>
    %40 = vector.broadcast %2 : vector<1x128xf32> to vector<112x128xf32>
    %41 = arith.addf %39, %40 : vector<112x128xf32>
    %42 = arith.addf %41, %36 : vector<112x128xf32>
    %43 = arith.truncf %42 : vector<112x128xf32> to vector<112x128xbf16>
    %c2_29 = arith.constant 2 : index
    %c0_30 = arith.constant 0 : index
    %c0_31 = arith.constant 0 : index
    %44 = vector.load %arg4[%c2_29, %c0_30, %c0_31] : memref<6x128x128xbf16, #tpu.memory_space<vmem>>, vector<1x128x128xbf16>
    %45 = vector.shape_cast %44 : vector<1x128x128xbf16> to vector<128x128xbf16>
    %cst_32 = arith.constant dense<0.000000e+00> : vector<112x128xf32>
    %46 = tpu.matmul %43, %45, %cst_32 {dimension_numbers = #tpu.dot_dimension_numbers<[1], [0], [0], [1], [0, 0, 1, 1], [], []>} : vector<112x128xbf16>, vector<128x128xbf16>, vector<112x128xf32> -> vector<112x128xf32>
    %47 = vector.broadcast %3 : vector<1x128xf32> to vector<112x128xf32>
    %48 = arith.addf %46, %47 : vector<112x128xf32>
    %cst_33 = arith.constant 0.000000e+00 : f32
    %49 = vector.broadcast %cst_33 : f32 to vector<112x128xf32>
    %50 = arith.maximumf %48, %49 : vector<112x128xf32>
    %51 = arith.truncf %50 : vector<112x128xf32> to vector<112x128xbf16>
    %c3_34 = arith.constant 3 : index
    %c0_35 = arith.constant 0 : index
    %c0_36 = arith.constant 0 : index
    %52 = vector.load %arg4[%c3_34, %c0_35, %c0_36] : memref<6x128x128xbf16, #tpu.memory_space<vmem>>, vector<1x128x128xbf16>
    %53 = vector.shape_cast %52 : vector<1x128x128xbf16> to vector<128x128xbf16>
    %cst_37 = arith.constant dense<0.000000e+00> : vector<112x128xf32>
    %54 = tpu.matmul %51, %53, %cst_37 {dimension_numbers = #tpu.dot_dimension_numbers<[1], [0], [0], [1], [0, 0, 1, 1], [], []>} : vector<112x128xbf16>, vector<128x128xbf16>, vector<112x128xf32> -> vector<112x128xf32>
    %55 = vector.broadcast %4 : vector<1x128xf32> to vector<112x128xf32>
    %56 = arith.addf %54, %55 : vector<112x128xf32>
    %cst_38 = arith.constant 0.000000e+00 : f32
    %57 = vector.broadcast %cst_38 : f32 to vector<112x128xf32>
    %58 = arith.maximumf %56, %57 : vector<112x128xf32>
    %59 = arith.truncf %58 : vector<112x128xf32> to vector<112x128xbf16>
    %c4_39 = arith.constant 4 : index
    %c0_40 = arith.constant 0 : index
    %c0_41 = arith.constant 0 : index
    %60 = vector.load %arg4[%c4_39, %c0_40, %c0_41] : memref<6x128x128xbf16, #tpu.memory_space<vmem>>, vector<1x128x128xbf16>
    %61 = vector.shape_cast %60 : vector<1x128x128xbf16> to vector<128x128xbf16>
    %cst_42 = arith.constant dense<0.000000e+00> : vector<112x128xf32>
    %62 = tpu.matmul %59, %61, %cst_42 {dimension_numbers = #tpu.dot_dimension_numbers<[1], [0], [0], [1], [0, 0, 1, 1], [], []>} : vector<112x128xbf16>, vector<128x128xbf16>, vector<112x128xf32> -> vector<112x128xf32>
    %63 = vector.broadcast %5 : vector<1x128xf32> to vector<112x128xf32>
    %64 = arith.addf %62, %63 : vector<112x128xf32>
    %65 = vector.extract_strided_slice %64 {offsets = [0, 0], sizes = [112, 16], strides = [1, 1]} : vector<112x128xf32> to vector<112x16xf32>
    %c0_43 = arith.constant 0 : index
    %c0_44 = arith.constant 0 : index
    %66 = vector.load %arg7[%c0_43, %c0_44] : memref<112x16xf32, #tpu.memory_space<vmem>>, vector<112x16xf32>
    tpu.vector_store %arg7[%c0_43, %c0_44], %65 {strides = array<i32>} : memref<112x16xf32, #tpu.memory_space<vmem>>, vector<112x16xf32>,
    return
  }
  func.func @transform_0(%arg0: i32) -> (i32, i32) {
    %c0_i32 = arith.constant 0 : i32
    %c0_i32_0 = arith.constant 0 : i32
    return %arg0, %c0_i32 : i32, i32
  }
  func.func @transform_1(%arg0: i32) -> (i32, i32) {
    %c0_i32 = arith.constant 0 : i32
    %c0_i32_0 = arith.constant 0 : i32
    return %arg0, %c0_i32 : i32, i32
  }
  func.func @transform_2(%arg0: i32) -> (i32, i32) {
    %c0_i32 = arith.constant 0 : i32
    %c0_i32_0 = arith.constant 0 : i32
    return %arg0, %c0_i32 : i32, i32
  }
  func.func @transform_3(%arg0: i32) -> (i32, i32, i32) {
    %c0_i32 = arith.constant 0 : i32
    %c0_i32_0 = arith.constant 0 : i32
    %c0_i32_1 = arith.constant 0 : i32
    %c0_i32_2 = arith.constant 0 : i32
    return %c0_i32, %c0_i32_0, %c0_i32_1 : i32, i32, i32
  }
  func.func @transform_4(%arg0: i32) -> (i32, i32) {
    %c0_i32 = arith.constant 0 : i32
    %c0_i32_0 = arith.constant 0 : i32
    %c0_i32_1 = arith.constant 0 : i32
    return %c0_i32, %c0_i32_0 : i32, i32
  }
  func.func @transform_5(%arg0: i32) -> (i32, i32) {
    %c0_i32 = arith.constant 0 : i32
    %c0_i32_0 = arith.constant 0 : i32
    %c0_i32_1 = arith.constant 0 : i32
    return %c0_i32, %c0_i32_0 : i32, i32
  }
  func.func @transform_6(%arg0: i32) -> (i32, i32) {
    %c0_i32 = arith.constant 0 : i32
    %c0_i32_0 = arith.constant 0 : i32
    return %arg0, %c0_i32 : i32, i32
  }
}

</mosaic_0001>

<bundles_post_ra>
// kernel: mlp_diffusion_forward.1
= control target key start
LH: loop header
LB: loop body
LE: loop exit
PB: predicated region body
PF: predicated region fallthrough
CT: control target
= control target key end

     0   :  { %s6354_s21 = smov 0   ;;  %s6356_s22 = smov 0   ;;  %s8403_s0 = inlined_call_operand.vmem [shape: f32[200,1], index: 0, kind: input, shape index: {}]   ;;  %s8404_s1 = inlined_call_operand.vmem [shape: s32[200,1], index: 1, kind: input, shape index: {}]   ;;  %s8405_s2 = inlined_call_operand.vmem [shape: bf16[200,16], index: 2, kind: input, shape index: {}]   ;;  %s8406_s3 = inlined_call_operand.vmem [shape: bf16[6,128,128], index: 3, kind: input, shape index: {}]   ;;  %s8407_s4 = inlined_call_operand.vmem [shape: bf16[16,128], index: 4, kind: input, shape index: {}]   ;;  %s8408_s5 = inlined_call_operand.vmem [shape: f32[8,128], index: 5, kind: input, shape index: {}]   ;;  %s8409_s6 = inlined_call_operand.vmem [shape: f32[200,16], index: 6, kind: output, shape index: {}]  }
   0x1   :  { %s6358_s23 = smov 0  }
   0x2 LB: > { %s6367_s24 = sadd.s32 4294967295, %s6275_s23   ;;  %s6369_s25 = sadd.s32 1, %s6275_s23   ;;  %s6275_s23 = sphi %s6358_s23, %s8610_s23   ;;  %s6271_s22 = sphi %s6356_s22, %s8609_s22   ;;  %s6267_s21 = sphi %s6354_s21, %s8608_s21  }
   0x3   : > { %s161_s26 = ssub.s32 %s6275_s23, %s6369_s25  ;;  %s164_s27 = sadd.s32 1, %s6271_s22 }
   0x4   : > { %p162_p0 = scmp.eq.s32.totalorder %s161_s26, 0  ;;  %p174_p1 = scmp.ne.s32.totalorder %s6271_s22, %s6267_s21 }
   0x5   : > { %p175_p2 = scmp.eq.s32.totalorder %s6367_s24, 1  ;;  %p5090_p3 = scmp.ge.s32.totalorder %s6275_s23, 1 }
   0x6   : > { %s6377_s28 = scalar_select %p162_p0, %s6271_s22, %s164_s27  }
   0x7   : > { %p6379_p4 = por %p175_p2, %p174_p1  ;;  %p259_p5 = scmp.lt.s32.totalorder %s6275_s23, 3 }
   0x9   : > { %p260_p6 = pnand %p5090_p3, %p259_p5 }
   0xb   : > { %263 = sbr.rel (%p260_p6) target bundleno = 1864 (0x748), region = 44 }
  0x12   : > { %s6384_s30 = smul.u32 14, %s6367_s24  ;;  %v6309_v0 = vmov 0   ;;  %v364_v29 = vlaneseq }
  0x13   : > { %6046 = vset.pattern.permute.xlu1 %v6309_v0  ;;  %6045 = vset.pattern.permute.xlu0 %v6309_v0  ;;  %s5396_s17 = smul.u32 (%p6379_p4), 112, %s6367_s24 }
  0x14   : > { %p315_p7 = scmp.lt.s32.totalorder %s6384_s30, 24  ;;  %v6407_v30 = vand.u32 127, %v364_v29 }
  0x15   : > { %s8319_s20 = scalar_lea.vmem (%p6379_p4), %s8409_s6, %s5396_s17  }
  0x16   : > { %s6388_s7 = scalar_select %p315_p7, %s6384_s30, 24  ;;  %v5094_v31 = vadd.s32 4294967232, %v6407_v30  ;;  %vm8459_vm0 = vcmp.lt.s32.totalorder %v6407_v30, 64 }
  0x18   : > { %s5091_s8 = sshll.u32 %s6388_s7, 3  ;;  %s5093_s12 = sshll.u32 %s6388_s7, 2  ;;  %v368_v32 = vsel %vm8459_vm0, %v6407_v30, %v5094_v31 }
  0x19   : > { %s318_s11 = scalar_lea.vmem %s8403_s0, %s5091_s8  ;;  %s6400_s15 = scalar_lea.vmem %s8405_s2, %s5093_s12  ;;  %v369_v33 = vcvt.s32.f32 %v368_v32 }
  0x1a   : > { %v375_v1 = vld [vmem:[%s318_s11 + $0x10] sm:$0xff]  ;;  %v373_v2 = vld [vmem:[%s318_s11] sm:$0xff]  ;;  %v376_v3 = vld [vmem:[%s318_s11 + $0x18] sm:$0xff]  ;;  %s332_s18 = scalar_lea.vmem %s8404_s1, %s5091_s8 }
  0x1b   : > { %399 = vperm.xlu1 %6046, %v375_v1   ;;  %389 = vperm.xlu0 %6045, %v373_v2   ;;  %v374_v4 = vld [vmem:[%s318_s11 + $0x8] sm:$0xff]  ;;  %v377_v6 = vld [vmem:[%s318_s11 + $0x20] sm:$0xff]  ;;  %v380_v7 = vld [vmem:[%s318_s11 + $0x38] sm:$0xff]  ;;  %v370_v34 = vmul.f32 -0.14391157, %v369_v33 }
  0x1c   : > { %v378_v5 = vld [vmem:[%s318_s11 + $0x28] sm:$0xff]  ;;  %v379_v8 = vld [vmem:[%s318_s11 + $0x30] sm:$0xff]  ;;  %v381_v10 = vld [vmem:[%s318_s11 + $0x40] sm:$0xff] }
  0x1d   : > { %v382_v9 = vld [vmem:[%s318_s11 + $0x48] sm:$0xff]  ;;  %v384_v11 = vld [vmem:[%s318_s11 + $0x58] sm:$0xff]  ;;  %v383_v12 = vld [vmem:[%s318_s11 + $0x50] sm:$0xff]  ;;  %v371_v35 = vmul.f32 1.442695, %v370_v34 }
  0x1e   : > { %v386_v13 = vld [vmem:[%s318_s11 + $0x68] sm:$0xff]  ;;  %v385_v14 = vld [vmem:[%s318_s11 + $0x60] sm:$0xff]  ;;  %v3815_v17 = vld [vmem:[%s332_s18 + $0x18] sm:$0xff]  ;;  %s307_s11 = sand.u32 1, %s6267_s21   ;;  %s4802_s21 = ssub.s32 (%p6379_p4), 25, %s6384_s30 }
  0x1f   : > { %404 = vperm.xlu1 %6046, %v376_v3   ;;  %394 = vperm.xlu0 %6045, %v374_v4   ;;  %v3813_v15 = vld [vmem:[%s332_s18 + $0x8] sm:$0xff]  ;;  %v3812_v16 = vld [vmem:[%s332_s18] sm:$0xff]  ;;  %v3814_v18 = vld [vmem:[%s332_s18 + $0x10] sm:$0xff]  ;;  %6103 = vpow2.f32 %v371_v35  ;;  %s5889_s12 = smul.u32 112, %s307_s11  ;;  %p4803_p8 = scmp.lt.s32.totalorder (%p6379_p4), %s4802_s21, 14 }
  0x20   : > { %v3817_v19 = vld [vmem:[%s332_s18 + $0x28] sm:$0xff]  ;;  %v3816_v20 = vld [vmem:[%s332_s18 + $0x20] sm:$0xff]  ;;  %v3819_v21 = vld [vmem:[%s332_s18 + $0x38] sm:$0xff] }
  0x21   : > { %v3818_v22 = vld [vmem:[%s332_s18 + $0x30] sm:$0xff]  ;;  %v3821_v23 = vld [vmem:[%s332_s18 + $0x48] sm:$0xff]  ;;  %v3820_v24 = vld [vmem:[%s332_s18 + $0x40] sm:$0xff]  ;;  %s8282_s16 = scalar_lea.vmem [#allocation2], %s5889_s12  }
  0x22   : > { %v3823_v25 = vld [vmem:[%s332_s18 + $0x58] sm:$0xff]  ;;  %v3822_v26 = vld [vmem:[%s332_s18 + $0x50] sm:$0xff]  ;;  %v3825_v27 = vld [vmem:[%s332_s18 + $0x68] sm:$0xff] }
  0x23   : > { %414 = vperm.xlu1 %6046, %v378_v5   ;;  %409 = vperm.xlu0 %6045, %v377_v6   ;;  %v3824_v28 = vld [vmem:[%s332_s18 + $0x60] sm:$0xff]  ;;  %v8427_v6 = vmov 683565275  }
  0x27   : > { %424 = vperm.xlu1 %6046, %v380_v7   ;;  %419 = vperm.xlu0 %6045, %v379_v8   ;;  %v8420_v8 = vmov 2475754826  }
  0x29   : > { %v6414_v36 = vpop.eup %6103 }
  0x2b   : > { %434 = vperm.xlu1 %6046, %v382_v9   ;;  %429 = vperm.xlu0 %6045, %v381_v10   ;;  %v8416_v10 = vmov 2131351028  }
  0x2f   : > { %444 = vperm.xlu1 %6046, %v384_v11   ;;  %439 = vperm.xlu0 %6045, %v383_v12   ;;  %v8418_v12 = vmov 2102212464  }
  0x33   : > { %454 = vperm.xlu1 %6046, %v386_v13   ;;  %449 = vperm.xlu0 %6045, %v385_v14   ;;  %v8425_v14 = vmov 920167782  }
  0x37   : > { %3830 = vperm.xlu1 %6046, %v3813_v15   ;;  %3827 = vperm.xlu0 %6045, %v3812_v16  }
  0x3b   : > { %3836 = vperm.xlu1 %6046, %v3815_v17   ;;  %3833 = vperm.xlu0 %6045, %v3814_v18  }
  0x3f   : > { %3842 = vperm.xlu1 %6046, %v3817_v19   ;;  %3839 = vperm.xlu0 %6045, %v3816_v20  }
  0x43   : > { %3848 = vperm.xlu1 %6046, %v3819_v21   ;;  %3845 = vperm.xlu0 %6045, %v3818_v22   ;;  %v8423_v22 = vmov 1326507024  }
  0x47   : > { %3854 = vperm.xlu1 %6046, %v3821_v23   ;;  %3851 = vperm.xlu0 %6045, %v3820_v24  }
  0x4b   : > { %3860 = vperm.xlu1 %6046, %v3823_v25   ;;  %3857 = vperm.xlu0 %6045, %v3822_v26  }
  0x4f   : > { %3866 = vperm.xlu1 %6046, %v3825_v27   ;;  %3863 = vperm.xlu0 %6045, %v3824_v28  }
  0x9a   : > { %v400_v37 = vpop.permute.xlu1 %399  ;;  %v390_v38 = vpop.permute.xlu0 %389 }
  0x9b   : > { %v6417_v39 = vmul.f32 %v6414_v36, %v400_v37  ;;  %v6420_v40 = vmul.f32 %v6414_v36, %v390_v38 }
  0x9d   : > { %8469 = vst [vmem:[#allocation3_spill] sm:$0xff] %v6417_v39  ;;  %v677_v41 = vand.u32 2147483647, %v6417_v39  ;;  %v680_v42 = vand.u32 2139095040, %v6417_v39  ;;  %v471_v43 = vand.u32 2147483647, %v6420_v40 }
  0x9e   : > { %v474_v44 = vand.u32 2139095040, %v6420_v40  ;;  %v405_v45 = vpop.permute.xlu1 %404  ;;  %v395_v59 = vpop.permute.xlu0 %394 }
  0x9f   : > { %v681_v46 = vshrl.u32 %v680_v42, 23  ;;  %v6427_v47 = vmul.f32 %v6414_v36, %v405_v45  ;;  %v684_v48 = vand.u32 8388607, %v677_v41  ;;  %v478_v50 = vand.u32 8388607, %v471_v43 }
  0xa0   : > { %v475_v49 = vshrl.u32 %v474_v44, 23  ;;  %v6435_v0 = vmul.f32 %v6414_v36, %v395_v59 }
  0xa1   : > { %8470 = vst [vmem:[#allocation4_spill] sm:$0xff] %v6427_v47  ;;  %v5103_v51 = vadd.s32 4294967169, %v681_v46  ;;  %v783_v53 = vand.u32 2139095040, %v6427_v47  ;;  %v685_v55 = vor.u32 8388608, %v684_v48  ;;  %v479_v56 = vor.u32 8388608, %v478_v50 }
  0xa2   : > { %v5095_v52 = vadd.s32 4294967169, %v475_v49 }
  0xa3   : > { %v687_v54 = vadd.s32 1, %v5103_v51  ;;  %v784_v58 = vshrl.u32 %v783_v53, 23  ;;  %v6437_v1 = vshll.u32 %v685_v55, 8  ;;  %v6441_v3 = vshll.u32 %v479_v56, 8 }
  0xa4   : > { %v481_v57 = vadd.s32 1, %v5095_v52 }
  0xa5   : > { %vm688_vm1 = vcmp.gt.s32.totalorder %v687_v54, 0  ;;  %v5107_v4 = vadd.s32 4294967169, %v784_v58 }
  0xa6   : > { %v689_v60 = vsel %vm688_vm1, %v687_v54, 0  ;;  %vm482_vm2 = vcmp.gt.s32.totalorder %v481_v57, 0 }
  0xa7   : > { %v690_v61 = vshrl.u32 %v689_v60, 5  ;;  %v691_v62 = vand.u32 31, %v689_v60  ;;  %v483_v63 = vsel %vm482_vm2, %v481_v57, 0  ;;  %v790_v31 = vadd.s32 1, %v5107_v4 }
  0xa8   : > { %v6439_v2 = vand.u32 31, %v483_v63  ;;  %v6448_v16 = vshrl.u32 %v483_v63, 5 }
  0xa9   : > { %v692_v5 = vsub.s32 32, %v691_v62  ;;  %v694_v7 = vshll.u32 %v8427_v6, %v691_v62  ;;  %v697_v9 = vshll.u32 %v8420_v8, %v691_v62  ;;  %v700_v11 = vshll.u32 %v8416_v10, %v691_v62 }
  0xaa   : > { %v703_v13 = vshll.u32 %v8418_v12, %v691_v62  ;;  %v706_v15 = vshll.u32 %v8425_v14, %v691_v62  ;;  %vm709_vm3 = vcmp.lt.s32.totalorder %v690_v61, 1  ;;  %vm711_vm4 = vcmp.lt.s32.totalorder %v690_v61, 3 }
  0xab   : > { %v693_v17 = vshrl.u32 %v8427_v6, %v692_v5  ;;  %v695_v18 = vshrl.u32 %v8420_v8, %v692_v5  ;;  %v698_v19 = vshrl.u32 %v8416_v10, %v692_v5  ;;  %v701_v20 = vshrl.u32 %v8418_v12, %v692_v5 }
  0xac   : > { %v704_v21 = vshrl.u32 %v8425_v14, %v692_v5  ;;  %v707_v23 = vshrl.u32 %v8423_v22, %v692_v5  ;;  %vm712_vm5 = vcmp.lt.s32.totalorder %v690_v61, 4  ;;  %v486_v27 = vsub.s32 32, %v6439_v2 }
  0xad   : > { %v696_v24 = vor.u32 %v695_v18, %v694_v7  ;;  %v699_v25 = vor.u32 %v698_v19, %v697_v9  ;;  %v702_v26 = vor.u32 %v701_v20, %v700_v11  ;;  %vm710_vm6 = vcmp.lt.s32.totalorder %v690_v61, 2 }
  0xae   : > { %v705_v28 = vor.u32 %v704_v21, %v703_v13  ;;  %v708_v29 = vor.u32 %v707_v23, %v706_v15  ;;  %v488_v44 = vshll.u32 %v8427_v6, %v6439_v2  ;;  %v489_v48 = vshrl.u32 %v8420_v8, %v486_v27 }
  0xaf   : > { %v713_v32 = vsel %vm709_vm3, %v693_v17, %v696_v24  ;;  %v714_v33 = vsel %vm712_vm5, %v702_v26, 2102212464  ;;  %v717_v34 = vsel %vm709_vm3, %v696_v24, %v699_v25  ;;  %v721_v35 = vsel %vm709_vm3, %v699_v25, %v702_v26 }
  0xb0   : > { %v715_v37 = vsel %vm711_vm4, %v699_v25, %v714_v33  ;;  %v718_v38 = vsel %vm712_vm5, %v705_v28, 920167782  ;;  %v722_v42 = vsel %vm712_vm5, %v708_v29, 1326507024  ;;  %v491_v49 = vshll.u32 %v8420_v8, %v6439_v2 }
  0xb1   : > { %v719_v45 = vsel %vm711_vm4, %v702_v26, %v718_v38  ;;  %v723_v46 = vsel %vm711_vm4, %v705_v28, %v722_v42  ;;  %v716_v50 = vsel %vm710_vm6, %v713_v32, %v715_v37  ;;  %v492_v53 = vshrl.u32 %v8416_v10, %v486_v27 }
  0xb2   : > { %v720_v51 = vsel %vm710_vm6, %v717_v34, %v719_v45  ;;  %v724_v52 = vsel %vm710_vm6, %v721_v35, %v723_v46  ;;  %v490_v58 = vor.u32 %v489_v48, %v488_v44  ;;  %v494_v60 = vshll.u32 %v8416_v10, %v6439_v2 }
  0xb3   : > { %v6473_v54 = vmul.u32.u64.low %v6437_v1, %v724_v52  ;;  %v6474_v55 = vmul.u32.u64.high %v6437_v1, %v724_v52, %v6473_v54  ;;  %v6477_v56 = vmul.u32.u64.low %v6437_v1, %v720_v51  ;;  %v6478_v57 = vmul.u32.u64.high %v6437_v1, %v720_v51, %v6477_v56 }
  0xb4   : > { %v493_v59 = vor.u32 %v492_v53, %v491_v49  ;;  %v495_v62 = vshrl.u32 %v8418_v12, %v486_v27  ;;  %v487_v61 = vshrl.u32 %v8427_v6, %v486_v27  ;;  %v497_v63 = vshll.u32 %v8418_v12, %v6439_v2 }
  0xb5   : > { %v498_v4 = vshrl.u32 %v8425_v14, %v486_v27  ;;  %v501_v5 = vshrl.u32 %v8423_v22, %v486_v27  ;;  %v732_v7 = vmul.u32 %v6437_v1, %v716_v50  ;;  %v500_v11 = vshll.u32 %v8425_v14, %v6439_v2 }
  0xb6   : > { %v496_v9 = vor.u32 %v495_v62, %v494_v60  ;;  %vm503_vm7 = vcmp.lt.s32.totalorder %v6448_v16, 1  ;;  %vm734_vm8 = vc.u32 %v6474_v55, %v6477_v56  ;;  %v735_v13 = vadd.s32 1, %v6478_v57 }
  0xb7   : > { %v499_v15 = vor.u32 %v498_v4, %v497_v63  ;;  %vm504_vm9 = vcmp.lt.s32.totalorder %v6448_v16, 2  ;;  %v502_v17 = vor.u32 %v501_v5, %v500_v11  ;;  %vm505_vm10 = vcmp.lt.s32.totalorder %v6448_v16, 3 }
  0xb8   : > { %vm506_vm11 = vcmp.lt.s32.totalorder %v6448_v16, 4  ;;  %v511_v1 = vsel %vm503_vm7, %v490_v58, %v493_v59  ;;  %v736_v18 = vsel %vm734_vm8, %v735_v13, %v6478_v57  ;;  %v515_v20 = vsel %vm503_vm7, %v493_v59, %v496_v9 }
  0xb9   : > { %v508_v19 = vsel %vm506_vm11, %v496_v9, 2102212464  ;;  %v512_v2 = vsel %vm506_vm11, %v499_v15, 920167782  ;;  %v737_v21 = vadd.s32 %v736_v18, %v732_v7  ;;  %v507_v23 = vsel %vm503_vm7, %v487_v61, %v490_v58 }
  0xba   : > { %v513_v24 = vsel %vm505_vm10, %v496_v9, %v512_v2  ;;  %v516_v25 = vsel %vm506_vm11, %v502_v17, 1326507024  ;;  %v509_v26 = vsel %vm505_vm10, %v493_v59, %v508_v19  ;;  %vm791_vm12 = vcmp.gt.s32.totalorder %v790_v31, 0 }
  0xbb   : > { %v514_v27 = vsel %vm504_vm9, %v511_v1, %v513_v24  ;;  %v517_v28 = vsel %vm505_vm10, %v499_v15, %v516_v25  ;;  %v738_v29 = vadd.s32 536870912, %v737_v21  ;;  %v8413_v38 = vand.u32 2147483647, %v6427_v47 }
  0xbc   : > { %v518_v32 = vsel %vm504_vm9, %v515_v20, %v517_v28  ;;  %v6505_v33 = vmul.u32.u64.low %v6441_v3, %v514_v27  ;;  %v6506_v34 = vmul.u32.u64.high %v6441_v3, %v514_v27, %v6505_v33  ;;  %v792_v42 = vsel %vm791_vm12, %v790_v31, 0 }
  0xbd   : > { %v6510_v35 = vmul.u32.u64.low %v6441_v3, %v518_v32  ;;  %v6511_v37 = vmul.u32.u64.high %v6441_v3, %v518_v32, %v6510_v35  ;;  %v6514_v44 = vshrl.u32 %v738_v29, 30  ;;  %v510_v45 = vsel %vm504_vm9, %v507_v23, %v509_v26 }
  0xbe   : > { %v794_v46 = vand.u32 31, %v792_v42  ;;  %v577_v48 = vand.u32 2139095040, %v6435_v0  ;;  %v529_v50 = vadd.s32 1, %v6506_v34  ;;  %v526_v52 = vmul.u32 %v6441_v3, %v510_v45 }
  0xbf   : > { %v740_v49 = vshll.u32 %v6514_v44, 30  ;;  %vm528_vm13 = vc.u32 %v6511_v37, %v6505_v33  ;;  %v787_v31 = vand.u32 8388607, %v8413_v38  ;;  %v793_v9 = vshrl.u32 %v792_v42, 5 }
  0xc0   : > { %v795_v51 = vsub.s32 32, %v794_v46  ;;  %v797_v53 = vshll.u32 %v8427_v6, %v794_v46  ;;  %v530_v54 = vsel %vm528_vm13, %v529_v50, %v6506_v34  ;;  %v800_v57 = vshll.u32 %v8420_v8, %v794_v46 }
  0xc1   : > { %v6527_v16 = vsub.s32 %v737_v21, %v740_v49  ;;  %v578_v58 = vshrl.u32 %v577_v48, 23  ;;  %v531_v59 = vadd.s32 %v530_v54, %v526_v52  ;;  %v803_v62 = vshll.u32 %v8416_v10, %v794_v46 }
  0xc2   : > { %v798_v60 = vshrl.u32 %v8420_v8, %v795_v51  ;;  %v801_v3 = vshrl.u32 %v8416_v10, %v795_v51  ;;  %v804_v63 = vshrl.u32 %v8418_v12, %v795_v51  ;;  %v806_v4 = vshll.u32 %v8418_v12, %v794_v46 }
  0xc3   : > { %v743_v61 = vsub.s32 0, %v6527_v16  ;;  %v807_v5 = vshrl.u32 %v8425_v14, %v795_v51  ;;  %v532_v7 = vadd.s32 536870912, %v531_v59  ;;  %v809_v13 = vshll.u32 %v8425_v14, %v794_v46 }
  0xc4   : > { %v799_v11 = vor.u32 %v798_v60, %v797_v53  ;;  %v802_v17 = vor.u32 %v801_v3, %v800_v57  ;;  %v810_v18 = vshrl.u32 %v8423_v22, %v795_v51  ;;  %v788_v2 = vor.u32 8388608, %v787_v31 }
  0xc5   : > { %v5104_v15 = vmin.u32 %v743_v61, %v6527_v16  ;;  %v808_v1 = vor.u32 %v807_v5, %v806_v4  ;;  %v6541_v19 = vshrl.u32 %v532_v7, 30  ;;  %v805_v20 = vor.u32 %v804_v63, %v803_v62 }
  0xc6   : > { %v811_v23 = vor.u32 %v810_v18, %v809_v13  ;;  %v5099_v24 = vadd.s32 4294967169, %v578_v58  ;;  %v796_v26 = vshrl.u32 %v8427_v6, %v795_v51  ;;  %vm812_vm14 = vcmp.lt.s32.totalorder %v793_v9, 1 }
  0xc7   : > { %v745_v21 = vclz %v5104_v15  ;;  %v534_v25 = vshll.u32 %v6541_v19, 30  ;;  %vm815_vm15 = vcmp.lt.s32.totalorder %v793_v9, 4  ;;  %vm814_vm1 = vcmp.lt.s32.totalorder %v793_v9, 3 }
  0xc8   : > { %v820_v28 = vsel %vm812_vm14, %v799_v11, %v802_v17  ;;  %v821_v29 = vsel %vm815_vm15, %v808_v1, 920167782  ;;  %v824_v35 = vsel %vm812_vm14, %v802_v17, %v805_v20  ;;  %v828_v42 = vshll.u32 %v788_v2, 8 }
  0xc9   : > { %v5105_v27 = vadd.s32 4294967294, %v745_v21  ;;  %v6546_v32 = vsub.s32 %v531_v59, %v534_v25  ;;  %v822_v34 = vsel %vm814_vm1, %v805_v20, %v821_v29  ;;  %vm813_vm3 = vcmp.lt.s32.totalorder %v793_v9, 2 }
  0xca   : > { %v817_v45 = vsel %vm815_vm15, %v805_v20, 2102212464  ;;  %v825_v46 = vsel %vm815_vm15, %v811_v23, 1326507024  ;;  %v823_v49 = vsel %vm813_vm3, %v820_v28, %v822_v34  ;;  %v584_v51 = vadd.s32 1, %v5099_v24 }
  0xcb   : > { %vm5106_vm2 = vcmp.lt.s32.totalorder %v5105_v27, 0  ;;  %v826_v50 = vsel %vm814_vm1, %v808_v1, %v825_v46  ;;  %v537_v31 = vsub.s32 0, %v6546_v32  ;;  %v816_v53 = vsel %vm812_vm14, %v796_v26, %v799_v11 }
  0xcc   : > { %v748_v48 = vsel %vm5106_vm2, 0, %v5105_v27  ;;  %v827_v54 = vsel %vm813_vm3, %v824_v35, %v826_v50  ;;  %v818_v57 = vsel %vm814_vm1, %v802_v17, %v817_v45  ;;  %vm585_vm4 = vcmp.gt.s32.totalorder %v584_v51, 0 }
  0xcd   : > { %v753_v52 = vsub.s32 4294967266, %v748_v48  ;;  %v6556_v58 = vmul.u32.u64.low %v828_v42, %v827_v54  ;;  %v6557_v59 = vmul.u32.u64.high %v828_v42, %v827_v54, %v6556_v58  ;;  %v8412_v62 = vand.u32 2147483647, %v6435_v0 }
  0xce   : > { %v6559_v60 = vmul.u32.u64.low %v828_v42, %v823_v49  ;;  %v6560_v3 = vmul.u32.u64.high %v828_v42, %v823_v49, %v6559_v60  ;;  %v749_v61 = vsub.s32 32, %v748_v48  ;;  %v586_v63 = vsel %vm585_vm4, %v584_v51, 0 }
  0xcf   : > { %v754_v4 = vadd.s32 127, %v753_v52  ;;  %v5096_v5 = vmin.u32 %v537_v31, %v6546_v32  ;;  %v819_v7 = vsel %vm813_vm3, %v816_v53, %v818_v57  ;;  %v588_v11 = vand.u32 31, %v586_v63  ;;  %v415_v52 = vpop.permute.xlu1 %414 }
  0xd0   : > { %v733_v13 = vadd.s32 %v6477_v56, %v6474_v55  ;;  %vm837_vm5 = vc.u32 %v6557_v59, %v6559_v60  ;;  %v838_v15 = vadd.s32 1, %v6560_v3  ;;  %v581_v17 = vand.u32 8388607, %v8412_v62 }
  0xd1   : > { %v835_v18 = vmul.u32 %v828_v42, %v819_v7  ;;  %v589_v2 = vsub.s32 32, %v588_v11  ;;  %v755_v20 = vshll.u32 %v754_v4, 23  ;;  %v539_v21 = vclz %v5096_v5 }
  0xd2   : > { %v751_v1 = vshrl.u32 %v733_v13, %v749_v61  ;;  %v839_v9 = vsel %vm837_vm5, %v838_v15, %v6560_v3  ;;  %v750_v23 = vshll.u32 %v6527_v16, %v748_v48  ;;  %v582_v25 = vor.u32 8388608, %v581_v17 }
  0xd3   : > { %v840_v24 = vadd.s32 %v839_v9, %v835_v18  ;;  %v592_v26 = vshrl.u32 %v8420_v8, %v589_v2  ;;  %v595_v27 = vshrl.u32 %v8416_v10, %v589_v2  ;;  %v756_v28 = vor.u32 4788187, %v755_v20 }
  0xd4   : > { %v752_v55 = vor.u32 %v751_v1, %v750_v23  ;;  %v5097_v29 = vadd.s32 4294967294, %v539_v21  ;;  %v587_v34 = vshrl.u32 %v586_v63, 5  ;;  %v598_v35 = vshrl.u32 %v8418_v12, %v589_v2 }
  0xd5   : > { %v841_v56 = vadd.s32 536870912, %v840_v24  ;;  %v591_v45 = vshll.u32 %v8427_v6, %v588_v11  ;;  %v594_v46 = vshll.u32 %v8420_v8, %v588_v11  ;;  %v601_v16 = vshrl.u32 %v8425_v14, %v589_v2 }
  0xd6   : > { %v597_v48 = vshll.u32 %v8416_v10, %v588_v11  ;;  %v600_v49 = vshll.u32 %v8418_v12, %v588_v11  ;;  %v603_v50 = vshll.u32 %v8425_v14, %v588_v11  ;;  %v604_v51 = vshrl.u32 %v8423_v22, %v589_v2 }
  0xd7   : > { %v6578_v42 = vshrl.u32 %v841_v56, 30  ;;  %v593_v53 = vor.u32 %v592_v26, %v591_v45  ;;  %v596_v54 = vor.u32 %v595_v27, %v594_v46  ;;  %vm5098_vm6 = vcmp.lt.s32.totalorder %v5097_v29, 0  ;;  %v410_v56 = vpop.permute.xlu0 %409 }
  0xd8   : > { %v599_v57 = vor.u32 %v598_v35, %v597_v48  ;;  %v602_v58 = vor.u32 %v601_v16, %v600_v49  ;;  %v605_v3 = vor.u32 %v604_v51, %v603_v50  ;;  %v6591_v63 = vmul.f32 %v6414_v36, %v415_v52 }
  0xd9   : > { %v843_v31 = vshll.u32 %v6578_v42, 30  ;;  %v757_v4 = vand.u32 2147483647, %v756_v28  ;;  %v759_v5 = vcvt.s32.f32 %v752_v55  ;;  %vm606_vm7 = vcmp.lt.s32.totalorder %v587_v34, 1 }
  0xda   : > { %8471 = vst [vmem:[#allocation5_spill] sm:$0xff] %v6591_v63  ;;  %v622_v7 = vshll.u32 %v582_v25, 8  ;;  %v6593_v11 = vsel %vm5098_vm6, 0, %v5097_v29  ;;  %vm609_vm8 = vcmp.lt.s32.totalorder %v587_v34, 4  ;;  %v614_v15 = vsel %vm606_vm7, %v593_v53, %v596_v54 }
  0xdb   : > { %v6588_v61 = vsub.s32 %v840_v24, %v843_v31  ;;  %vm608_vm9 = vcmp.lt.s32.totalorder %v587_v34, 3  ;;  %v615_v17 = vsel %vm609_vm8, %v602_v58, 920167782  ;;  %v618_v1 = vsel %vm606_vm7, %v596_v54, %v599_v57 }
  0xdc   : > { %v619_v18 = vsel %vm609_vm8, %v605_v3, 1326507024  ;;  %vm607_vm10 = vcmp.lt.s32.totalorder %v587_v34, 2  ;;  %v611_v21 = vsel %vm609_vm8, %v599_v57, 2102212464  ;;  %v616_v9 = vsel %vm608_vm9, %v599_v57, %v615_v17 }
  0xdd   : > { %v846_v13 = vsub.s32 0, %v6588_v61  ;;  %v547_v23 = vsub.s32 4294967266, %v6593_v11  ;;  %v590_v24 = vshrl.u32 %v8427_v6, %v589_v2  ;;  %v617_v25 = vsel %vm607_vm10, %v614_v15, %v616_v9 }
  0xde   : > { %v620_v55 = vsel %vm608_vm9, %v602_v58, %v619_v18  ;;  %v760_v26 = vmul.f32 %v759_v5, %v757_v4  ;;  %v989_v29 = vand.u32 2139095040, %v6591_v63  ;;  %v612_v45 = vsel %vm608_vm9, %v596_v54, %v611_v21  ;;  %v425_v4 = vpop.permute.xlu1 %424 }
  0xdf   : > { %v5108_v20 = vmin.u32 %v846_v13, %v6588_v61  ;;  %v621_v28 = vsel %vm607_vm10, %v618_v1, %v620_v55  ;;  %v610_v35 = vsel %vm606_vm7, %v590_v24, %v593_v53  ;;  %v6616_v50 = vmul.f32 %v6414_v36, %v410_v56 }
  0xe0   : > { %v6608_v46 = vmul.u32.u64.low %v622_v7, %v621_v28  ;;  %v6609_v16 = vmul.u32.u64.high %v622_v7, %v621_v28, %v6608_v46  ;;  %v6611_v2 = vmul.u32.u64.low %v622_v7, %v617_v25  ;;  %v6612_v49 = vmul.u32.u64.high %v622_v7, %v617_v25, %v6611_v2 }
  0xe1   : > { %v848_v27 = vclz %v5108_v20  ;;  %8472 = vst [vmem:[#allocation6_spill] sm:$0xff] %v6616_v50  ;;  %v8411_v51 = vand.u32 2147483647, %v6591_v63  ;;  %v990_v52 = vshrl.u32 %v989_v29, 23  ;;  %v543_v31 = vsub.s32 32, %v6593_v11 }
  0xe2   : > { %v548_v57 = vadd.s32 127, %v547_v23  ;;  %v613_v53 = vsel %vm607_vm10, %v610_v35, %v612_v45  ;;  %v761_v54 = vxor.u32 2147483648, %v760_v26  ;;  %vm631_vm12 = vc.u32 %v6609_v16, %v6611_v2 }
  0xe3   : > { %v5109_v48 = vadd.s32 4294967294, %v848_v27  ;;  %v5115_v3 = vadd.s32 4294967169, %v990_v52  ;;  %v527_v5 = vadd.s32 %v6505_v33, %v6511_v37  ;;  %v632_v15 = vadd.s32 1, %v6612_v49 }
  0xe4   : > { %v886_v17 = vand.u32 2139095040, %v6616_v50  ;;  %vm6632_vm13 = vcmp.le.f32.partialorder %v677_v41, 0.7853982  ;;  %vm679_vm14 = vcmp.lt.s32.totalorder %v6417_v39, 0  ;;  %v629_v1 = vmul.u32 %v622_v7, %v613_v53 }
  0xe5   : > { %vm5110_vm11 = vcmp.lt.s32.totalorder %v5109_v48, 0  ;;  %v996_v18 = vadd.s32 1, %v5115_v3  ;;  %v545_v20 = vshrl.u32 %v527_v5, %v543_v31  ;;  %v549_v21 = vshll.u32 %v548_v57, 23 }
  0xe6   : > { %v6621_v58 = vsel %vm5110_vm11, 0, %v5109_v48  ;;  %v633_v33 = vsel %vm631_vm12, %v632_v15, %v6612_v49  ;;  %v6639_v37 = vmul.f32 %v6414_v36, %v425_v4  ;;  %v762_v9 = vsel %vm679_vm14, %v761_v54, %v760_v26 }
  0xe7   : > { %v856_v13 = vsub.s32 4294967266, %v6621_v58  ;;  %v634_v23 = vadd.s32 %v633_v33, %v629_v1  ;;  %v993_v41 = vand.u32 8388607, %v8411_v51  ;;  %vm997_vm15 = vcmp.gt.s32.totalorder %v996_v18, 0 }
  0xe8   : > { %8475 = vst [vmem:[#allocation7_spill] sm:$0xff] %v6639_v37  ;;  %v544_v24 = vshll.u32 %v6546_v32, %v6593_v11  ;;  %v998_v25 = vsel %vm997_vm15, %v996_v18, 0  ;;  %v887_v55 = vshrl.u32 %v886_v17, 23  ;;  %v763_v56 = vsub.s32 4, %v6514_v44 }
  0xe9   : > { %v857_v7 = vadd.s32 127, %v856_v13  ;;  %v557_v27 = vsub.s32 4, %v6541_v19  ;;  %v635_v28 = vadd.s32 536870912, %v634_v23  ;;  %v1000_v29 = vand.u32 31, %v998_v25 }
  0xea   : > { %v6652_v26 = vsel %vm6632_vm13, %v6417_v39, %v762_v9  ;;  %v6654_v35 = vor.u32 %v545_v20, %v544_v24  ;;  %v6656_v45 = vor.u32 4788187, %v549_v21  ;;  %v836_v32 = vadd.s32 %v6559_v60, %v6557_v59 }
  0xeb   : > { %v852_v11 = vsub.s32 32, %v6621_v58  ;;  %v6661_v46 = vshrl.u32 %v635_v28, 30  ;;  %v994_v48 = vor.u32 8388608, %v993_v41  ;;  %v1001_v49 = vsub.s32 32, %v1000_v29 }
  0xec   : > { %v858_v52 = vshll.u32 %v857_v7, 23  ;;  %v999_v31 = vshrl.u32 %v998_v25, 5  ;;  %v1003_v57 = vshll.u32 %v8427_v6, %v1000_v29  ;;  %v5111_v53 = vadd.s32 4294967169, %v887_v55 }
  0xed   : > { %v637_v54 = vshll.u32 %v6661_v46, 30  ;;  %v1004_v3 = vshrl.u32 %v8420_v8, %v1001_v49  ;;  %v1006_v4 = vshll.u32 %v8420_v8, %v1000_v29  ;;  %v1009_v5 = vshll.u32 %v8416_v10, %v1000_v29 }
  0xee   : > { %v1007_v59 = vshrl.u32 %v8416_v10, %v1001_v49  ;;  %v1010_v60 = vshrl.u32 %v8418_v12, %v1001_v49  ;;  %v1012_v13 = vshll.u32 %v8418_v12, %v1000_v29  ;;  %v1013_v15 = vshrl.u32 %v8425_v14, %v1001_v49 }
  0xef   : > { %v854_v17 = vshrl.u32 %v836_v32, %v852_v11  ;;  %v6672_v1 = vsub.s32 %v634_v23, %v637_v54  ;;  %v1005_v18 = vor.u32 %v1004_v3, %v1003_v57  ;;  %v1016_v20 = vshrl.u32 %v8423_v22, %v1001_v49 }
  0xf0   : > { %v1008_v21 = vor.u32 %v1007_v59, %v1006_v4  ;;  %v1011_v33 = vor.u32 %v1010_v60, %v1009_v5  ;;  %v1014_v9 = vor.u32 %v1013_v15, %v1012_v13  ;;  %v1015_v41 = vshll.u32 %v8425_v14, %v1000_v29 }
  0xf1   : > { %v853_v24 = vshll.u32 %v6588_v61, %v6621_v58  ;;  %v640_v7 = vsub.s32 0, %v6672_v1  ;;  %v1034_v25 = vshll.u32 %v994_v48, 8  ;;  %v8410_v55 = vand.u32 2147483647, %v6616_v50 }
  0xf2   : > { %vm473_vm1 = vcmp.lt.s32.totalorder %v6420_v40, 0  ;;  %v859_v23 = vor.u32 4788187, %v858_v52  ;;  %v1017_v28 = vor.u32 %v1016_v20, %v1015_v41  ;;  %vm1018_vm2 = vcmp.lt.s32.totalorder %v999_v31, 1 }
  0xf3   : > { %v893_v32 = vadd.s32 1, %v5111_v53  ;;  %v5100_v11 = vmin.u32 %v640_v7, %v6672_v1  ;;  %v1002_v57 = vshrl.u32 %v8427_v6, %v1001_v49  ;;  %vm1021_vm3 = vcmp.lt.s32.totalorder %v999_v31, 4 }
  0xf4   : > { %v1026_v29 = vsel %vm1018_vm2, %v1005_v18, %v1008_v21  ;;  %v855_v54 = vor.u32 %v854_v17, %v853_v24  ;;  %vm1020_vm4 = vcmp.lt.s32.totalorder %v999_v31, 3  ;;  %v1023_v61 = vsel %vm1021_vm3, %v1011_v33, 2102212464 }
  0xf5   : > { %v1027_v58 = vsel %vm1021_vm3, %v1014_v9, 920167782  ;;  %vm1019_vm5 = vcmp.lt.s32.totalorder %v999_v31, 2  ;;  %v1022_v48 = vsel %vm1018_vm2, %v1002_v57, %v1005_v18  ;;  %v1030_v4 = vsel %vm1018_vm2, %v1008_v21, %v1011_v33 }
  0xf6   : > { %v1028_v3 = vsel %vm1020_vm4, %v1011_v33, %v1027_v58  ;;  %v642_v5 = vclz %v5100_v11  ;;  %v1031_v59 = vsel %vm1021_vm3, %v1017_v28, 1326507024  ;;  %vm894_vm6 = vcmp.gt.s32.totalorder %v893_v32, 0 }
  0xf7   : > { %v1029_v52 = vsel %vm1019_vm5, %v1026_v29, %v1028_v3  ;;  %v1024_v53 = vsel %vm1020_vm4, %v1008_v21, %v1023_v61  ;;  %v1032_v60 = vsel %vm1020_vm4, %v1014_v9, %v1031_v59  ;;  %v551_v49 = vand.u32 2147483647, %v6656_v45 }
  0xf8   : > { %v6684_v13 = vmul.u32.u64.low %v1034_v25, %v1029_v52  ;;  %v6685_v15 = vmul.u32.u64.high %v1034_v25, %v1029_v52, %v6684_v13  ;;  %v1033_v17 = vsel %vm1019_vm5, %v1030_v4, %v1032_v60  ;;  %v890_v18 = vand.u32 8388607, %v8410_v55 }
  0xf9   : > { %v895_v20 = vsel %vm894_vm6, %v893_v32, 0  ;;  %v6697_v33 = vsel %vm679_vm14, %v763_v56, %v6514_v44  ;;  %v860_v21 = vand.u32 2147483647, %v859_v23  ;;  %v553_v24 = vcvt.s32.f32 %v6654_v35 }
  0xfa   : > { %v6699_v9 = vmul.u32.u64.low %v1034_v25, %v1033_v17  ;;  %v6700_v41 = vmul.u32.u64.high %v1034_v25, %v1033_v17, %v6699_v9  ;;  %v5101_v45 = vadd.s32 4294967294, %v642_v5  ;;  %v1025_v7 = vsel %vm1019_vm5, %v1022_v48, %v1024_v53 }
  0xfb   : > { %v897_v28 = vand.u32 31, %v895_v20  ;;  %6105 = vcosq.f32 %v6652_v26  ;;  %v6710_v32 = vsel %vm473_vm1, %v557_v27, %v6541_v19  ;;  %v862_v44 = vcvt.s32.f32 %v855_v54 }
  0xfc   : > { %v1044_v56 = vadd.s32 1, %v6685_v15  ;;  %v6713_v23 = vmul.f32 %v553_v24, %v551_v49  ;;  %v866_v35 = vsub.s32 4, %v6578_v42  ;;  %v891_v11 = vor.u32 8388608, %v890_v18 }
  0xfd   : > { %v898_v31 = vsub.s32 32, %v897_v28  ;;  %v6716_v57 = vmul.f32 %v862_v44, %v860_v21  ;;  %v1041_v29 = vmul.u32 %v1034_v25, %v1025_v7  ;;  %vm1043_vm7 = vc.u32 %v6700_v41, %v6684_v13 }
  0xfe   : > { %v1195_v61 = vand.u32 2139095040, %v6639_v37  ;;  %vm5102_vm8 = vcmp.lt.s32.totalorder %v5101_v45, 0  ;;  %v1045_v19 = vsel %vm1043_vm7, %v1044_v56, %v6685_v15  ;;  %v900_v48 = vshll.u32 %v8427_v6, %v897_v28 }
  0xff   : > { %v901_v27 = vshrl.u32 %v8420_v8, %v898_v31  ;;  %v904_v54 = vshrl.u32 %v8416_v10, %v898_v31  ;;  %v1046_v58 = vadd.s32 %v1045_v19, %v1041_v29  ;;  %v903_v3 = vshll.u32 %v8420_v8, %v897_v28 }
 0x100   : > { %v907_v4 = vshrl.u32 %v8418_v12, %v898_v31  ;;  %v896_v25 = vshrl.u32 %v895_v20, 5  ;;  %v906_v5 = vshll.u32 %v8416_v10, %v897_v28  ;;  %v909_v52 = vshll.u32 %v8418_v12, %v897_v28 }
 0x101   : > { %v910_v59 = vshrl.u32 %v8425_v14, %v898_v31  ;;  %v6730_v53 = vsel %vm5102_vm8, 0, %v5101_v45  ;;  %v1047_v60 = vadd.s32 536870912, %v1046_v58  ;;  %v902_v15 = vor.u32 %v901_v27, %v900_v48 }
 0x102   : > { %v905_v49 = vor.u32 %v904_v54, %v903_v3  ;;  %v908_v17 = vor.u32 %v907_v4, %v906_v5  ;;  %v912_v21 = vshll.u32 %v8425_v14, %v897_v28  ;;  %v913_v9 = vshrl.u32 %v8423_v22, %v898_v31 }
 0x103   : > { %v911_v18 = vor.u32 %v910_v59, %v909_v52  ;;  %6107 = vsinq.f32 %v6652_v26  ;;  %v555_v20 = vxor.u32 2147483648, %v6713_v23  ;;  %vm782_vm9 = vcmp.lt.s32.totalorder %v6427_v47, 0 }
 0x104   : > { %v6737_v24 = vshrl.u32 %v1047_v60, 30  ;;  %v8414_v45 = vand.u32 2147483647, %v6639_v37  ;;  %v864_v7 = vxor.u32 2147483648, %v6716_v57  ;;  %v914_v44 = vor.u32 %v913_v9, %v912_v21 }
 0x105   : > { %v931_v56 = vshll.u32 %v891_v11, 8  ;;  %v1196_v29 = vshrl.u32 %v1195_v61, 23  ;;  %v6741_v19 = vpop.eup %6105  ;;  %v650_v28 = vsub.s32 4294967266, %v6730_v53  ;;  %vm915_vm10 = vcmp.lt.s32.totalorder %v896_v25, 1 }
 0x106   : > { %8476 = vst [vmem:[#allocation8_spill] sm:$0xff] %v6741_v19  ;;  %v1049_v27 = vshll.u32 %v6737_v24, 30  ;;  %vm918_vm11 = vcmp.lt.s32.totalorder %v896_v25, 4  ;;  %v923_v26 = vsel %vm915_vm10, %v902_v15, %v905_v49  ;;  %v927_v48 = vsel %vm915_vm10, %v905_v49, %v908_v17 }
 0x107   : > { %v924_v54 = vsel %vm918_vm11, %v911_v18, 920167782  ;;  %v928_v3 = vsel %vm918_vm11, %v914_v44, 1326507024  ;;  %v899_v5 = vshrl.u32 %v8427_v6, %v898_v31  ;;  %vm917_vm12 = vcmp.lt.s32.totalorder %v896_v25, 3 }
 0x108   : > { %v6745_v4 = vsub.s32 %v1046_v58, %v1049_v27  ;;  %v920_v52 = vsel %vm918_vm11, %v908_v17, 2102212464  ;;  %vm916_vm14 = vcmp.lt.s32.totalorder %v896_v25, 2  ;;  %v925_v11 = vsel %vm917_vm12, %v908_v17, %v924_v54 }
 0x109   : > { %v929_v61 = vsel %vm917_vm12, %v911_v18, %v928_v3  ;;  %v5123_v59 = vadd.s32 4294967169, %v1196_v29  ;;  %v919_v21 = vsel %vm915_vm10, %v899_v5, %v902_v15  ;;  %v926_v9 = vsel %vm916_vm14, %v923_v26, %v925_v11 }
 0x10a   : > { %v1052_v60 = vsub.s32 0, %v6745_v4  ;;  %v930_v55 = vsel %vm916_vm14, %v927_v48, %v929_v61  ;;  %v921_v51 = vsel %vm917_vm12, %v905_v49, %v920_v52  ;;  %v1199_v17 = vand.u32 8388607, %v8414_v45 }
 0x10b   : > { %v6751_v62 = vmul.u32.u64.low %v931_v56, %v930_v55  ;;  %v6752_v44 = vmul.u32.u64.high %v931_v56, %v930_v55, %v6751_v62  ;;  %v1202_v58 = vadd.s32 1, %v5123_v59  ;;  %v6764_v15 = vsel %vm473_vm1, %v555_v20, %v6713_v23 }
 0x10c   : > { %v5116_v31 = vmin.u32 %v1052_v60, %v6745_v4  ;;  %v6755_v27 = vmul.u32.u64.low %v931_v56, %v926_v9  ;;  %v6756_v38 = vmul.u32.u64.high %v931_v56, %v926_v9, %v6755_v27  ;;  %v6771_v62 = vsel %vm782_vm9, %v866_v35, %v6578_v42 }
 0x10d   : > { %8477 = vst [vmem:[#allocation9_spill] sm:$0xff] %v6771_v62  ;;  %v646_v55 = vsub.s32 32, %v6730_v53  ;;  %vm1203_vm15 = vcmp.gt.s32.totalorder %v1202_v58, 0  ;;  %v6774_v49 = vpop.eup %6107  ;;  %v651_v18 = vadd.s32 127, %v650_v28  ;;  %v922_v26 = vsel %vm916_vm14, %v919_v21, %v921_v51 }
 0x10e   : > { %8478 = vst [vmem:[#allocation10_spill] sm:$0xff] %v6774_v49  ;;  %v1054_v29 = vclz %v5116_v31  ;;  %v1204_v54 = vsel %vm1203_vm15, %v1202_v58, 0  ;;  %v6780_v23 = vsel %vm782_vm9, %v864_v7, %v6716_v57  ;;  %v630_v20 = vadd.s32 %v6611_v2, %v6609_v16 }
 0x10f   : > { %vm940_vm1 = vc.u32 %v6752_v44, %v6755_v27  ;;  %v1206_v42 = vand.u32 31, %v1204_v54  ;;  %v647_v35 = vshll.u32 %v6672_v1, %v6730_v53  ;;  %v941_v25 = vadd.s32 1, %v6756_v38 }
 0x110   : > { %v5117_v28 = vadd.s32 4294967294, %v1054_v29  ;;  %v1200_v51 = vor.u32 8388608, %v1199_v17  ;;  %v648_v48 = vshrl.u32 %v630_v20, %v646_v55  ;;  %v1042_v3 = vadd.s32 %v6684_v13, %v6700_v41  ;;  %v420_v55 = vpop.permute.xlu0 %419 }
 0x111   : > { %v938_v57 = vmul.u32 %v931_v56, %v922_v26  ;;  %v1207_v7 = vsub.s32 32, %v1206_v42  ;;  %v652_v5 = vshll.u32 %v651_v18, 23  ;;  %v942_v16 = vsel %vm940_vm1, %v941_v25, %v6756_v38 }
 0x112   : > { %vm5118_vm2 = vcmp.lt.s32.totalorder %v5117_v28, 0  ;;  %v6792_v2 = vshrl.u32 %v1204_v54, 5  ;;  %v1209_v1 = vshll.u32 %v8427_v6, %v1206_v42  ;;  %v1212_v59 = vshll.u32 %v8420_v8, %v1206_v42 }
 0x113   : > { %v1057_v52 = vsel %vm5118_vm2, 0, %v5117_v28  ;;  %v943_v11 = vadd.s32 %v942_v16, %v938_v57  ;;  %v1210_v53 = vshrl.u32 %v8420_v8, %v1207_v7  ;;  %v1213_v60 = vshrl.u32 %v8416_v10, %v1207_v7 }
 0x114   : > { %v1062_v61 = vsub.s32 4294967266, %v1057_v52  ;;  %v1215_v13 = vshll.u32 %v8416_v10, %v1206_v42  ;;  %v1216_v56 = vshrl.u32 %v8418_v12, %v1207_v7  ;;  %v1218_v38 = vshll.u32 %v8418_v12, %v1206_v42 }
 0x115   : > { %v944_v41 = vadd.s32 536870912, %v943_v11  ;;  %v1219_v21 = vshrl.u32 %v8425_v14, %v1207_v7  ;;  %v1058_v9 = vsub.s32 32, %v1057_v52  ;;  %v1221_v31 = vshll.u32 %v8425_v14, %v1206_v42 }
 0x116   : > { %v1063_v58 = vadd.s32 127, %v1062_v61  ;;  %v1222_v17 = vshrl.u32 %v8423_v22, %v1207_v7  ;;  %vm6806_vm3 = vcmp.le.f32.partialorder %v471_v43, 0.7853982  ;;  %v1211_v26 = vor.u32 %v1210_v53, %v1209_v1 }
 0x117   : > { %v6810_v29 = vshrl.u32 %v944_v41, 30  ;;  %v1214_v54 = vor.u32 %v1213_v60, %v1212_v59  ;;  %v1217_v20 = vor.u32 %v1216_v56, %v1215_v13  ;;  %v6812_v28 = vor.u32 %v648_v48, %v647_v35 }
 0x118   : > { %v6814_v25 = vor.u32 4788187, %v652_v5  ;;  %v1220_v57 = vor.u32 %v1219_v21, %v1218_v38  ;;  %v1240_v42 = vshll.u32 %v1200_v51, 8  ;;  %v8481_v16 = vand.u32 2147483647, %v6427_v47 }
 0x119   : > { %v8482_v61 = vmov 0  ;;  %v1064_v43 = vshll.u32 %v1063_v58, 23  ;;  %v946_v45 = vshll.u32 %v6810_v29, 30  ;;  %v1223_v41 = vor.u32 %v1222_v17, %v1221_v31 }
 0x11a   : > { %vm6818_vm4 = vcmp.le.f32.partialorder %v8481_v16, 0.7853982  ;;  %v6824_v1 = vmul.f32 %v6414_v36, %v420_v55  ;;  %v1059_v35 = vshll.u32 %v6745_v4, %v1057_v52  ;;  %v1208_v48 = vshrl.u32 %v8427_v6, %v1207_v7 }
 0x11b   : > { %v8483_v61 = vsel %vm6818_vm4, 4294967295, %v8482_v61  ;;  %vm1224_vm5 = vcmp.lt.s32.totalorder %v6792_v2, 1  ;;  %vm1227_vm6 = vcmp.lt.s32.totalorder %v6792_v2, 4  ;;  %v1060_v51 = vshrl.u32 %v1042_v3, %v1058_v9 }
 0x11c   : > { %8484 = vst [vmem:[#allocation11_spill] sm:$0xff] %v8483_v61  ;;  %8485 = vst [vmem:[#allocation12_spill] sm:$0xff] %v6824_v1  ;;  %v6830_v5 = vsub.s32 %v943_v11, %v946_v45  ;;  %v1229_v53 = vsel %vm1227_vm6, %v1217_v20, 2102212464  ;;  %v1232_v59 = vsel %vm1224_vm5, %v1211_v26, %v1214_v54  ;;  %vm1225_vm7 = vcmp.lt.s32.totalorder %v6792_v2, 2  ;;  %v435_v11 = vpop.permute.xlu1 %434 }
 0x11d   : > { %vm1226_vm8 = vcmp.lt.s32.totalorder %v6792_v2, 3  ;;  %v1233_v60 = vsel %vm1227_vm6, %v1220_v57, 920167782  ;;  %v1236_v13 = vsel %vm1224_vm5, %v1214_v54, %v1217_v20  ;;  %v1065_v56 = vor.u32 4788187, %v1064_v43 }
 0x11e   : > { %v949_v4 = vsub.s32 0, %v6830_v5  ;;  %v1234_v52 = vsel %vm1226_vm8, %v1217_v20, %v1233_v60  ;;  %v1237_v7 = vsel %vm1227_vm6, %v1223_v41, 1326507024  ;;  %vm576_vm9 = vcmp.lt.s32.totalorder %v6435_v0, 0 }
 0x11f   : > { %v1228_v38 = vsel %vm1224_vm5, %v1208_v48, %v1211_v26  ;;  %v1230_v21 = vsel %vm1226_vm8, %v1214_v54, %v1229_v53  ;;  %v1235_v45 = vsel %vm1225_vm7, %v1232_v59, %v1234_v52  ;;  %v1238_v3 = vsel %vm1226_vm8, %v1220_v57, %v1237_v7 }
 0x120   : > { %v5112_v9 = vmin.u32 %v949_v4, %v6830_v5  ;;  %v1239_v58 = vsel %vm1225_vm7, %v1236_v13, %v1238_v3  ;;  %v6841_v31 = vmul.u32.u64.low %v1240_v42, %v1235_v45  ;;  %v6842_v17 = vmul.u32.u64.high %v1240_v42, %v1235_v45, %v6841_v31 }
 0x121   : > { %v559_v55 = vsel %vm6806_vm3, %v6420_v40, %v6764_v15  ;;  %v6849_v26 = vmul.u32.u64.low %v1240_v42, %v1239_v58  ;;  %v6850_v54 = vmul.u32.u64.high %v1240_v42, %v1239_v58, %v6849_v26  ;;  %v1092_v20 = vand.u32 2139095040, %v6824_v1 }
 0x122   : > { %v1061_v57 = vor.u32 %v1060_v51, %v1059_v35  ;;  %v951_v16 = vclz %v5112_v9  ;;  %v1231_v43 = vsel %vm1225_vm7, %v1228_v38, %v1230_v21  ;;  %v6856_v41 = vmul.f32 %v6414_v36, %v435_v11  ;;  %v430_v9 = vpop.permute.xlu0 %429 }
 0x123   : > { %v868_v48 = vsel %vm6818_vm4, %v6427_v47, %v6780_v23  ;;  %v656_v15 = vcvt.s32.f32 %v6812_v28  ;;  %v660_v53 = vsub.s32 4, %v6661_v46  ;;  %v1093_v59 = vshrl.u32 %v1092_v20, 23 }
 0x124   : > { %v654_v60 = vand.u32 2147483647, %v6814_v25  ;;  %v1066_v35 = vand.u32 2147483647, %v1065_v56  ;;  %v5113_v51 = vadd.s32 4294967294, %v951_v16  ;;  %v1250_v2 = vadd.s32 1, %v6842_v17 }
 0x125   : > { %v1247_v13 = vmul.u32 %v1240_v42, %v1231_v43  ;;  %vm1249_vm10 = vc.u32 %v6850_v54, %v6841_v31  ;;  %v8415_v4 = vand.u32 2147483647, %v6824_v1  ;;  %v5119_v52 = vadd.s32 4294967169, %v1093_v59 }
 0x126   : > { %v1068_v7 = vcvt.s32.f32 %v1061_v57  ;;  %vm5114_vm11 = vcmp.lt.s32.totalorder %v5113_v51, 0  ;;  %v1251_v23 = vsel %vm1249_vm10, %v1250_v2, %v6842_v17  ;;  %v1401_v28 = vand.u32 2139095040, %v6856_v41 }
 0x127   : > { %6109 = vcosq.f32 %v559_v55  ;;  %v954_v38 = vsel %vm5114_vm11, 0, %v5113_v51  ;;  %v1252_v25 = vadd.s32 %v1251_v23, %v1247_v13  ;;  %v1099_v56 = vadd.s32 1, %v5119_v52 }
 0x128   : > { %6111 = vsinq.f32 %v559_v55  ;;  %v6871_v21 = vmul.f32 %v656_v15, %v654_v60  ;;  %v6876_v42 = vsel %vm576_vm9, %v660_v53, %v6661_v46  ;;  %v6878_v45 = vmul.f32 %v1068_v7, %v1066_v35 }
 0x129   : > { %6113 = vcosq.f32 %v868_v48  ;;  %v1253_v3 = vadd.s32 536870912, %v1252_v25  ;;  %v1096_v11 = vand.u32 8388607, %v8415_v4  ;;  %vm1100_vm12 = vcmp.gt.s32.totalorder %v1099_v56, 0 }
 0x12a   : > { %v955_v58 = vsub.s32 32, %v954_v38  ;;  %v959_v17 = vsub.s32 4294967266, %v954_v38  ;;  %v1101_v26 = vsel %vm1100_vm12, %v1099_v56, 0  ;;  %v1402_v55 = vshrl.u32 %v1401_v28, 23 }
 0x12b   : > { %6115 = vsinq.f32 %v868_v48  ;;  %v6883_v57 = vshrl.u32 %v1253_v3, 30  ;;  %v1103_v46 = vand.u32 31, %v1101_v26  ;;  %v658_v16 = vxor.u32 2147483648, %v6871_v21 }
 0x12c   : > { %v939_v15 = vadd.s32 %v6755_v27, %v6752_v44  ;;  %v6890_v53 = vmul.f32 %v6414_v36, %v430_v9  ;;  %v1097_v60 = vor.u32 8388608, %v1096_v11  ;;  %v8422_v48 = vand.u32 2147483647, %v6856_v41 }
 0x12d   : > { %v1255_v59 = vshll.u32 %v6883_v57, 30  ;;  %v1104_v35 = vsub.s32 32, %v1103_v46  ;;  %v956_v51 = vshll.u32 %v6830_v5, %v954_v38  ;;  %v960_v13 = vadd.s32 127, %v959_v17 }
 0x12e   : > { %v957_v2 = vshrl.u32 %v939_v15, %v955_v58  ;;  %v5131_v52 = vadd.s32 4294967169, %v1402_v55  ;;  %v1102_v23 = vshrl.u32 %v1101_v26, 5  ;;  %v1106_v28 = vshll.u32 %v8427_v6, %v1103_v46 }
 0x12f   : > { %v6895_v7 = vsub.s32 %v1252_v25, %v1255_v59  ;;  %v1107_v44 = vshrl.u32 %v8420_v8, %v1104_v35  ;;  %v1109_v27 = vshll.u32 %v8420_v8, %v1103_v46  ;;  %v1110_v56 = vshrl.u32 %v8416_v10, %v1104_v35 }
 0x130   : > { %v1112_v3 = vshll.u32 %v8416_v10, %v1103_v46  ;;  %v1113_v11 = vshrl.u32 %v8418_v12, %v1104_v35  ;;  %v1115_v25 = vshll.u32 %v8418_v12, %v1103_v46  ;;  %v1116_v58 = vshrl.u32 %v8425_v14, %v1104_v35 }
 0x131   : > { %v6903_v9 = vpop.eup %6109  ;;  %v1258_v5 = vsub.s32 0, %v6895_v7  ;;  %v1108_v38 = vor.u32 %v1107_v44, %v1106_v28  ;;  %vm988_vm14 = vcmp.lt.s32.totalorder %v6591_v63, 0  ;;  %v1111_v26 = vor.u32 %v1110_v56, %v1109_v27 }
 0x132   : > { %v6908_v17 = vpop.eup %6111  ;;  %v1114_v55 = vor.u32 %v1113_v11, %v1112_v3  ;;  %v1118_v15 = vshll.u32 %v8425_v14, %v1103_v46  ;;  %v1119_v59 = vshrl.u32 %v8423_v22, %v1104_v35  ;;  %v1117_v10 = vor.u32 %v1116_v58, %v1115_v25 }
 0x133   : > { %v6913_v4 = vpop.eup %6113  ;;  %v5124_v20 = vmin.u32 %v1258_v5, %v6895_v7  ;;  %v1137_v28 = vshll.u32 %v1097_v60, 8  ;;  %v6918_v44 = vand.u32 8388607, %v8422_v48  ;;  %v6920_v12 = vor.u32 %v957_v2, %v956_v51 }
 0x134   : > { %8486 = vst [vmem:[#allocation13_spill] sm:$0xff] %v6913_v4  ;;  %v961_v8 = vshll.u32 %v960_v13, 23  ;;  %v1120_v43 = vor.u32 %v1119_v59, %v1118_v15  ;;  %vm1121_vm15 = vcmp.lt.s32.totalorder %v1102_v23, 1  ;;  %vm1124_vm1 = vcmp.lt.s32.totalorder %v1102_v23, 4 }
 0x135   : > { %v6922_v27 = vpop.eup %6115  ;;  %v1260_v46 = vclz %v5124_v20  ;;  %v1129_v56 = vsel %vm1121_vm15, %v1108_v38, %v1111_v26  ;;  %v1408_v3 = vadd.s32 1, %v5131_v52  ;;  %v1105_v11 = vshrl.u32 %v8427_v6, %v1104_v35 }
 0x136   : > { %8487 = vst [vmem:[#allocation14_spill] sm:$0xff] %v6922_v27  ;;  %vm1123_vm2 = vcmp.lt.s32.totalorder %v1102_v23, 3  ;;  %v1126_v5 = vsel %vm1124_vm1, %v1114_v55, 2102212464  ;;  %v1130_v60 = vsel %vm1124_vm1, %v1117_v10, 920167782  ;;  %v1133_v48 = vsel %vm1121_vm15, %v1111_v26, %v1114_v55 }
 0x137   : > { %v5125_v25 = vadd.s32 4294967294, %v1260_v46  ;;  %vm1122_vm5 = vcmp.lt.s32.totalorder %v1102_v23, 2  ;;  %v1131_v58 = vsel %vm1123_vm2, %v1114_v55, %v1130_v60  ;;  %v962_v51 = vor.u32 4788187, %v961_v8 }
 0x138   : > { %v1125_v2 = vsel %vm1121_vm15, %v1105_v11, %v1108_v38  ;;  %v1132_v13 = vsel %vm1122_vm5, %v1129_v56, %v1131_v58  ;;  %v1134_v15 = vsel %vm1124_vm1, %v1120_v43, 1326507024  ;;  %v1127_v59 = vsel %vm1123_vm2, %v1111_v26, %v1126_v5 }
 0x139   : > { %vm5126_vm6 = vcmp.lt.s32.totalorder %v5125_v25, 0  ;;  %v1135_v20 = vsel %vm1123_vm2, %v1117_v10, %v1134_v15  ;;  %vm1409_vm7 = vcmp.gt.s32.totalorder %v1408_v3, 0  ;;  %v6938_v8 = vsel %vm576_vm9, %v658_v16, %v6871_v21 }
 0x13a   : > { %v6926_v22 = vsel %vm5126_vm6, 0, %v5125_v25  ;;  %v1136_v35 = vsel %vm1122_vm5, %v1133_v48, %v1135_v20  ;;  %v6929_v52 = vmul.u32.u64.low %v1137_v28, %v1132_v13  ;;  %v6930_v14 = vmul.u32.u64.high %v1137_v28, %v1132_v13, %v6929_v52 }
 0x13b   : > { %v8488_v43 = vxor.u32 2147483648, %v6878_v45  ;;  %v1268_v48 = vsub.s32 4294967266, %v6926_v22  ;;  %v1410_v38 = vsel %vm1409_vm7, %v1408_v3, 0  ;;  %v1128_v26 = vsel %vm1122_vm5, %v1125_v2, %v1127_v59 }
 0x13c   : > { %v6949_v55 = vmul.u32.u64.low %v1137_v28, %v1136_v35  ;;  %v6950_v46 = vmul.u32.u64.high %v1137_v28, %v1136_v35, %v6949_v55  ;;  %v1412_v56 = vand.u32 31, %v1410_v38  ;;  %v1248_v21 = vadd.s32 %v6841_v31, %v6850_v54 }
 0x13d   : > { %v6945_v10 = vsel %vm988_vm14, %v8488_v43, %v6878_v45  ;;  %v1269_v16 = vadd.s32 127, %v1268_v48  ;;  %v1406_v11 = vor.u32 8388608, %v6918_v44  ;;  %v963_v60 = vand.u32 2147483647, %v962_v51 }
 0x13e   : > { %v965_v45 = vcvt.s32.f32 %v6920_v12  ;;  %v1147_v25 = vadd.s32 1, %v6930_v14  ;;  %v1413_v3 = vsub.s32 32, %v1412_v56  ;;  %v1264_v23 = vsub.s32 32, %v6926_v22 }
 0x13f   : > { %v1144_v58 = vmul.u32 %v1137_v28, %v1128_v26  ;;  %v1411_v2 = vshrl.u32 %v1410_v38, 5  ;;  %v1415_v13 = vshll.u32 %v8427_v6, %v1412_v56  ;;  %v1270_v15 = vshll.u32 %v1269_v16, 23 }
 0x140   : > { %vm1146_vm8 = vc.u32 %v6950_v46, %v6929_v52  ;;  %v8489_v31 = vmov 2475754826   ;;  %v8490_v12 = vmov 2131351028   ;;  %v8491_v35 = vmov 2102212464  }
 0x141   : > { %v1416_v54 = vshrl.u32 %v8489_v31, %v1413_v3  ;;  %v1418_v44 = vshll.u32 %v8489_v31, %v1412_v56  ;;  %v1148_v51 = vsel %vm1146_vm8, %v1147_v25, %v6930_v14  ;;  %v1419_v59 = vshrl.u32 %v8490_v12, %v1413_v3 }
 0x142   : > { %v1421_v20 = vshll.u32 %v8490_v12, %v1412_v56  ;;  %v1424_v43 = vshll.u32 %v8491_v35, %v1412_v56  ;;  %v1149_v28 = vadd.s32 %v1148_v51, %v1144_v58  ;;  %v1422_v38 = vshrl.u32 %v8491_v35, %v1413_v3 }
 0x143   : > { %v1417_v48 = vor.u32 %v1416_v54, %v1415_v13  ;;  %v8492_v26 = vmov 920167782   ;;  %v8493_v16 = vand.u32 2147483647, %v6435_v0  ;;  %v6976_v6 = vmul.f32 %v965_v45, %v963_v60 }
 0x144   : > { %v1425_v55 = vshrl.u32 %v8492_v26, %v1413_v3  ;;  %v1420_v14 = vor.u32 %v1419_v59, %v1418_v44  ;;  %v1427_v25 = vshll.u32 %v8492_v26, %v1412_v56  ;;  %v8496_v47 = vmov 1326507024  }
 0x145   : > { %vm6972_vm9 = vcmp.le.f32.partialorder %v8493_v16, 0.7853982  ;;  %v1428_v4 = vshrl.u32 %v8496_v47, %v1413_v3  ;;  %v1265_v58 = vshll.u32 %v6895_v7, %v6926_v22  ;;  %v1150_v13 = vadd.s32 536870912, %v1149_v28 }
 0x146   : > { %v1423_v54 = vor.u32 %v1422_v38, %v1421_v20  ;;  %v1426_v51 = vor.u32 %v1425_v55, %v1424_v43  ;;  %v8497_v27 = vand.u32 2147483647, %v6591_v63  ;;  %v8498_v16 = vmov 0 }
 0x147   : > { %v1266_v61 = vshrl.u32 %v1248_v21, %v1264_v23  ;;  %v1429_v60 = vor.u32 %v1428_v4, %v1427_v25  ;;  %vm1430_vm11 = vcmp.lt.s32.totalorder %v1411_v2, 1  ;;  %v1446_v45 = vshll.u32 %v1406_v11, 8 }
 0x148   : > { %vm6984_vm10 = vcmp.le.f32.partialorder %v8497_v27, 0.7853982  ;;  %v1271_v44 = vor.u32 4788187, %v1270_v15  ;;  %v6988_v56 = vshrl.u32 %v1150_v13, 30  ;;  %vm1433_vm12 = vcmp.lt.s32.totalorder %v1411_v2, 4 }
 0x149   : > { %v8499_v16 = vsel %vm6984_vm10, 4294967295, %v8498_v16  ;;  %v1438_v59 = vsel %vm1430_vm11, %v1417_v48, %v1420_v14  ;;  %v8501_v22 = vmov 683565275   ;;  %vm1432_vm15 = vcmp.lt.s32.totalorder %v1411_v2, 3 }
 0x14a   : > { %8500 = vst [vmem:[#allocation15_spill] sm:$0xff] %v8499_v16  ;;  %v1414_v7 = vshrl.u32 %v8501_v22, %v1413_v3  ;;  %v1435_v20 = vsel %vm1433_vm12, %v1423_v54, 2102212464  ;;  %v1439_v43 = vsel %vm1433_vm12, %v1426_v51, 920167782  ;;  %vm885_vm1 = vcmp.lt.s32.totalorder %v6616_v50, 0 }
 0x14b   : > { %v1152_v27 = vshll.u32 %v6988_v56, 30  ;;  %vm1431_vm2 = vcmp.lt.s32.totalorder %v1411_v2, 2  ;;  %v1440_v21 = vsel %vm1432_vm15, %v1423_v54, %v1439_v43  ;;  %v1442_v4 = vsel %vm1430_vm11, %v1420_v14, %v1423_v54 }
 0x14c   : > { %v1267_v11 = vor.u32 %v1266_v61, %v1265_v58  ;;  %v1441_v23 = vsel %vm1431_vm2, %v1438_v59, %v1440_v21  ;;  %v1443_v15 = vsel %vm1433_vm12, %v1429_v60, 1326507024  ;;  %v1298_v38 = vand.u32 2139095040, %v6890_v53 }
 0x14d   : > { %v6997_v55 = vsub.s32 %v1149_v28, %v1152_v27  ;;  %v1434_v3 = vsel %vm1430_vm11, %v1414_v7, %v1417_v48  ;;  %v1436_v25 = vsel %vm1432_vm15, %v1420_v14, %v1435_v20  ;;  %v1444_v13 = vsel %vm1432_vm15, %v1426_v51, %v1443_v15 }
 0x14e   : > { %v1272_v62 = vand.u32 2147483647, %v1271_v44  ;;  %v1445_v19 = vsel %vm1431_vm2, %v1442_v4, %v1444_v13  ;;  %v7001_v49 = vmul.u32.u64.low %v1446_v45, %v1441_v23  ;;  %v7002_v39 = vmul.u32.u64.high %v1446_v45, %v1441_v23, %v7001_v49 }
 0x14f   : > { %v662_v61 = vsel %vm6972_vm9, %v6435_v0, %v6938_v8  ;;  %v8502_v58 = vand.u32 2147483647, %v6616_v50  ;;  %v8503_v28 = vmov 0  ;;  %v1155_v48 = vsub.s32 0, %v6997_v55 }
 0x150   : > { %v7016_v14 = vmul.u32.u64.low %v1446_v45, %v1445_v19  ;;  %v7017_v54 = vmul.u32.u64.high %v1446_v45, %v1445_v19, %v7016_v14  ;;  %v969_v51 = vsub.s32 4, %v6810_v29  ;;  %v1274_v60 = vcvt.s32.f32 %v1267_v11 }
 0x151   : > { %vm7011_vm5 = vcmp.le.f32.partialorder %v8502_v58, 0.7853982  ;;  %v1437_v44 = vsel %vm1431_vm2, %v1434_v3, %v1436_v25  ;;  %v1299_v59 = vshrl.u32 %v1298_v38, 23  ;;  %v8506_v8 = vsub.s32 4, %v6737_v24  ;;  %v445_v38 = vpop.permute.xlu1 %444 }
 0x152   : > { %v8504_v28 = vsel %vm7011_vm5, 4294967295, %v8503_v28  ;;  %v1074_v20 = vsel %vm6984_vm10, %v6591_v63, %v6945_v10  ;;  %v967_v19 = vxor.u32 2147483648, %v6976_v6  ;;  %vm1194_vm6 = vcmp.lt.s32.totalorder %v6639_v37, 0 }
 0x153   : > { %8505 = vst [vmem:[#allocation16_spill] sm:$0xff] %v8504_v28  ;;  %v7026_v7 = vsel %vm988_vm14, %v8506_v8, %v6737_v24  ;;  %v5120_v2 = vmin.u32 %v1155_v48, %v6997_v55  ;;  %v1275_v43 = vmul.f32 %v1274_v60, %v1272_v62  ;;  %v1456_v27 = vadd.s32 1, %v7002_v39 }
 0x154   : > { %8507 = vst [vmem:[#allocation17_spill] sm:$0xff] %v7026_v7  ;;  %v5127_v21 = vadd.s32 4294967169, %v1299_v59  ;;  %v8508_v4 = vand.u32 2147483647, %v6890_v53  ;;  %6117 = vcosq.f32 %v662_v61  ;;  %v1453_v23 = vmul.u32 %v1446_v45, %v1437_v44 }
 0x155   : > { %v1157_v24 = vclz %v5120_v2  ;;  %vm1455_vm14 = vc.u32 %v7017_v54, %v7001_v49  ;;  %6119 = vsinq.f32 %v662_v61  ;;  %v7043_v10 = vsel %vm885_vm1, %v969_v51, %v6810_v29 }
 0x156   : > { %v1302_v11 = vand.u32 8388607, %v8508_v4  ;;  %8509 = vst [vmem:[#allocation18_spill] sm:$0xff] %v7043_v10  ;;  %v1457_v62 = vsel %vm1455_vm14, %v1456_v27, %v7002_v39  ;;  %v1305_v15 = vadd.s32 1, %v5127_v21  ;;  %6121 = vcosq.f32 %v1074_v20 }
 0x157   : > { %v968_v3 = vsel %vm885_vm1, %v967_v19, %v6976_v6  ;;  %v5121_v25 = vadd.s32 4294967294, %v1157_v24  ;;  %v1458_v45 = vadd.s32 %v1457_v62, %v1453_v23  ;;  %6123 = vsinq.f32 %v1074_v20 }
 0x158   : > { %v1276_v13 = vxor.u32 2147483648, %v1275_v43  ;;  %v1303_v58 = vor.u32 8388608, %v1302_v11  ;;  %vm1306_vm7 = vcmp.gt.s32.totalorder %v1305_v15, 0  ;;  %v7050_v29 = vmul.f32 %v6414_v36, %v445_v38 }
 0x159   : > { %vm5122_vm8 = vcmp.lt.s32.totalorder %v5121_v25, 0  ;;  %v1459_v61 = vadd.s32 536870912, %v1458_v45  ;;  %v1307_v48 = vsel %vm1306_vm7, %v1305_v15, 0  ;;  %v7055_v39 = vsel %vm7011_vm5, %v6616_v50, %v968_v3 }
 0x15a   : > { %v1160_v6 = vsel %vm5122_vm8, 0, %v5121_v25  ;;  %v1309_v51 = vand.u32 31, %v1307_v48  ;;  %v1145_v60 = vadd.s32 %v6929_v52, %v6950_v46  ;;  %v7064_v20 = vsel %vm1194_vm6, %v1276_v13, %v1275_v43 }
 0x15b   : > { %v1161_v44 = vsub.s32 32, %v1160_v6  ;;  %v1165_v59 = vsub.s32 4294967266, %v1160_v6  ;;  %v7060_v8 = vshrl.u32 %v1459_v61, 30  ;;  %v7067_v27 = vshll.u32 %v1303_v58, 8 }
 0x15c   : > { %v1310_v2 = vsub.s32 32, %v1309_v51  ;;  %v1312_v11 = vshll.u32 %v8501_v22, %v1309_v51  ;;  %v1607_v52 = vand.u32 2139095040, %v7050_v29  ;;  %v1315_v24 = vshll.u32 %v8489_v31, %v1309_v51 }
 0x15d   : > { %v1166_v21 = vadd.s32 127, %v1165_v59  ;;  %v1461_v4 = vshll.u32 %v7060_v8, 30  ;;  %v1163_v15 = vshrl.u32 %v1145_v60, %v1161_v44  ;;  %v1308_v3 = vshrl.u32 %v1307_v48, 5 }
 0x15e   : > { %v1313_v46 = vshrl.u32 %v8489_v31, %v1310_v2  ;;  %v1316_v23 = vshrl.u32 %v8490_v12, %v1310_v2  ;;  %v1319_v43 = vshrl.u32 %v8491_v35, %v1310_v2  ;;  %v7076_v62 = vpop.eup %6117  ;;  %v1318_v25 = vshll.u32 %v8490_v12, %v1309_v51 }
 0x15f   : > { %v7078_v38 = vsub.s32 %v1458_v45, %v1461_v4  ;;  %v7081_v13 = vpop.eup %6119  ;;  %v1162_v58 = vshll.u32 %v6997_v55, %v1160_v6  ;;  %v1167_v61 = vshll.u32 %v1166_v21, 23  ;;  %v1321_v16 = vshll.u32 %v8491_v35, %v1309_v51 }
 0x160   : > { %v1314_v59 = vor.u32 %v1313_v46, %v1312_v11  ;;  %v1317_v19 = vor.u32 %v1316_v23, %v1315_v24  ;;  %v7084_v14 = vpop.eup %6121  ;;  %v1320_v50 = vor.u32 %v1319_v43, %v1318_v25  ;;  %v1322_v45 = vshrl.u32 %v8492_v26, %v1310_v2 }
 0x161   : > { %8510 = vst [vmem:[#allocation19_spill] sm:$0xff] %v7084_v14  ;;  %v1464_v63 = vsub.s32 0, %v7078_v38  ;;  %v7089_v60 = vpop.eup %6123  ;;  %v1311_v48 = vshrl.u32 %v8501_v22, %v1310_v2  ;;  %v1324_v44 = vshll.u32 %v8492_v26, %v1309_v51  ;;  %v1325_v55 = vshrl.u32 %v8496_v47, %v1310_v2 }
 0x162   : > { %8511 = vst [vmem:[#allocation20_spill] sm:$0xff] %v7089_v60  ;;  %v1608_v6 = vshrl.u32 %v1607_v52, 23  ;;  %v8512_v21 = vand.u32 2147483647, %v6639_v37  ;;  %v8513_v4 = vmov 0  ;;  %v1164_v11 = vor.u32 %v1163_v15, %v1162_v58 }
 0x163   : > { %v5132_v46 = vmin.u32 %v1464_v63, %v7078_v38  ;;  %v1323_v24 = vor.u32 %v1322_v45, %v1321_v16  ;;  %vm1327_vm12 = vcmp.lt.s32.totalorder %v1308_v3, 1  ;;  %vm1091_vm15 = vcmp.lt.s32.totalorder %v6824_v1, 0 }
 0x164   : > { %vm7096_vm11 = vcmp.le.f32.partialorder %v8512_v21, 0.7853982  ;;  %v1168_v23 = vor.u32 4788187, %v1167_v61  ;;  %v1326_v43 = vor.u32 %v1325_v55, %v1324_v44  ;;  %vm1330_vm1 = vcmp.lt.s32.totalorder %v1308_v3, 4  ;;  %v440_v55 = vpop.permute.xlu0 %439 }
 0x165   : > { %v8514_v4 = vsel %vm7096_vm11, 4294967295, %v8513_v4  ;;  %v1335_v51 = vsel %vm1327_vm12, %v1314_v59, %v1317_v19  ;;  %v1466_v25 = vclz %v5132_v46  ;;  %vm1329_vm2 = vcmp.lt.s32.totalorder %v1308_v3, 3 }
 0x166   : > { %8515 = vst [vmem:[#allocation21_spill] sm:$0xff] %v8514_v4  ;;  %v1332_v2 = vsel %vm1330_vm1, %v1320_v50, 2102212464  ;;  %v1336_v52 = vsel %vm1330_vm1, %v1323_v24, 920167782  ;;  %vm1328_vm14 = vcmp.lt.s32.totalorder %v1308_v3, 2  ;;  %v1339_v14 = vsel %vm1327_vm12, %v1317_v19, %v1320_v50 }
 0x167   : > { %v1337_v21 = vsel %vm1329_vm2, %v1320_v50, %v1336_v52  ;;  %v1340_v60 = vsel %vm1330_vm1, %v1326_v43, 1326507024  ;;  %v5133_v7 = vadd.s32 4294967294, %v1466_v25  ;;  %v1331_v15 = vsel %vm1327_vm12, %v1311_v48, %v1314_v59 }
 0x168   : > { %v1333_v58 = vsel %vm1329_vm2, %v1317_v19, %v1332_v2  ;;  %v1338_v63 = vsel %vm1328_vm14, %v1335_v51, %v1337_v21  ;;  %v1341_v16 = vsel %vm1329_vm2, %v1323_v24, %v1340_v60  ;;  %v8445_v44 = vand.u32 2147483647, %v7050_v29 }
 0x169   : > { %v7104_v45 = vmul.u32.u64.low %v7067_v27, %v1338_v63  ;;  %v7105_v61 = vmul.u32.u64.high %v7067_v27, %v1338_v63, %v7104_v45  ;;  %v1169_v46 = vand.u32 2147483647, %v1168_v23  ;;  %vm5134_vm7 = vcmp.lt.s32.totalorder %v5133_v7, 0 }
 0x16a   : > { %v1342_v52 = vsel %vm1328_vm14, %v1339_v14, %v1341_v16  ;;  %v5139_v50 = vadd.s32 4294967169, %v1608_v6  ;;  %v8516_v59 = vsub.s32 4, %v6883_v57  ;;  %v1334_v60 = vsel %vm1328_vm14, %v1331_v15, %v1333_v58 }
 0x16b   : > { %v7119_v48 = vmul.u32.u64.low %v7067_v27, %v1342_v52  ;;  %v7120_v24 = vmul.u32.u64.high %v7067_v27, %v1342_v52, %v7119_v48  ;;  %6125 = vcosq.f32 %v7055_v39  ;;  %v1171_v23 = vcvt.s32.f32 %v1164_v11 }
 0x16c   : > { %v7115_v19 = vsel %vm1194_vm6, %v8516_v59, %v6883_v57  ;;  %v1469_v43 = vsel %vm5134_vm7, 0, %v5133_v7  ;;  %v7124_v14 = vmul.f32 %v6414_v36, %v440_v55  ;;  %6127 = vsinq.f32 %v7055_v39 }
 0x16d   : > { %8517 = vst [vmem:[#allocation22_spill] sm:$0xff] %v7115_v19  ;;  %v1280_v57 = vsel %vm7096_vm11, %v6639_v37, %v7064_v20  ;;  %v1353_v3 = vadd.s32 1, %v7105_v61  ;;  %v1614_v6 = vadd.s32 1, %v5139_v50  ;;  %v7132_v51 = vmul.f32 %v1171_v23, %v1169_v46  ;;  %v455_v20 = vpop.permute.xlu1 %454 }
 0x16e   : > { %v8518_v25 = vsub.s32 4, %v6988_v56  ;;  %v1350_v11 = vmul.u32 %v7067_v27, %v1334_v60  ;;  %v1611_v39 = vand.u32 8388607, %v8445_v44  ;;  %v1470_v2 = vsub.s32 32, %v1469_v43 }
 0x16f   : > { %v1474_v21 = vsub.s32 4294967266, %v1469_v43  ;;  %vm1352_vm6 = vc.u32 %v7120_v24, %v7104_v45  ;;  %vm1615_vm8 = vcmp.gt.s32.totalorder %v1614_v6, 0  ;;  %6129 = vcosq.f32 %v1280_v57 }
 0x170   : > { %v7139_v7 = vsel %vm1091_vm15, %v8518_v25, %v6988_v56  ;;  %v1354_v15 = vsel %vm1352_vm6, %v1353_v3, %v7105_v61  ;;  %v1616_v58 = vsel %vm1615_vm8, %v1614_v6, 0  ;;  %v1504_v63 = vand.u32 2139095040, %v7124_v14 }
 0x171   : > { %8519 = vst [vmem:[#allocation23_spill] sm:$0xff] %v7139_v7  ;;  %6131 = vsinq.f32 %v1280_v57  ;;  %v1454_v56 = vadd.s32 %v7001_v49, %v7017_v54  ;;  %v1355_v27 = vadd.s32 %v1354_v15, %v1350_v11  ;;  %v1618_v16 = vand.u32 31, %v1616_v58 }
 0x172   : > { %v1612_v46 = vor.u32 8388608, %v1611_v39  ;;  %v7153_v50 = vmul.f32 %v6414_v36, %v455_v20  ;;  %v1475_v60 = vadd.s32 127, %v1474_v21  ;;  %v7155_v23 = vshrl.u32 %v1616_v58, 5 }
 0x173   : > { %v1472_v59 = vshrl.u32 %v1454_v56, %v1470_v2  ;;  %v1356_v61 = vadd.s32 536870912, %v1355_v27  ;;  %v1619_v48 = vsub.s32 32, %v1618_v16  ;;  %v1621_v57 = vshll.u32 %v8501_v22, %v1618_v16 }
 0x174   : > { %v1624_v49 = vshll.u32 %v8489_v31, %v1618_v16  ;;  %v1505_v54 = vshrl.u32 %v1504_v63, 23  ;;  %v1627_v11 = vshll.u32 %v8490_v12, %v1618_v16  ;;  %v1630_v21 = vshll.u32 %v8491_v35, %v1618_v16 }
 0x175   : > { %v7159_v3 = vshrl.u32 %v1356_v61, 30  ;;  %v1622_v6 = vshrl.u32 %v8489_v31, %v1619_v48  ;;  %v1625_v25 = vshrl.u32 %v8490_v12, %v1619_v48  ;;  %v7164_v39 = vpop.eup %6125  ;;  %v1628_v2 = vshrl.u32 %v8491_v35, %v1619_v48 }
 0x176   : > { %8520 = vst [vmem:[#allocation24_spill] sm:$0xff] %v7164_v39  ;;  %v1631_v20 = vshrl.u32 %v8492_v26, %v1619_v48  ;;  %v1634_v15 = vshrl.u32 %v8496_v47, %v1619_v48  ;;  %v7170_v58 = vpop.eup %6127  ;;  %v1471_v63 = vshll.u32 %v7078_v38, %v1469_v43  ;;  %v1476_v55 = vshll.u32 %v1475_v60, 23 }
 0x177   : > { %8521 = vst [vmem:[#allocation25_spill] sm:$0xff] %v7170_v58  ;;  %v1358_v56 = vshll.u32 %v7159_v3, 30  ;;  %v1623_v61 = vor.u32 %v1622_v6, %v1621_v57  ;;  %v1626_v44 = vor.u32 %v1625_v25, %v1624_v49  ;;  %v1629_v52 = vor.u32 %v1628_v2, %v1627_v11 }
 0x178   : > { %v1632_v37 = vor.u32 %v1631_v20, %v1630_v21  ;;  %v1633_v4 = vshll.u32 %v8492_v26, %v1618_v16  ;;  %v1473_v19 = vor.u32 %v1472_v59, %v1471_v63  ;;  %v1652_v39 = vshll.u32 %v1612_v46, 8 }
 0x179   : > { %v7175_v7 = vsub.s32 %v1355_v27, %v1358_v56  ;;  %v8522_v28 = vand.u32 2147483647, %v7124_v14  ;;  %v7181_v58 = vpop.eup %6129  ;;  %vm1636_vm12 = vcmp.lt.s32.totalorder %v7155_v23, 1  ;;  %vm1639_vm1 = vcmp.lt.s32.totalorder %v7155_v23, 4 }
 0x17a   : > { %8523 = vst [vmem:[#allocation26_spill] sm:$0xff] %v7181_v58  ;;  %v1635_v38 = vor.u32 %v1634_v15, %v1633_v4  ;;  %v5135_v43 = vadd.s32 4294967169, %v1505_v54  ;;  %v1620_v27 = vshrl.u32 %v8501_v22, %v1619_v48  ;;  %v1641_v46 = vsel %vm1639_vm1, %v1629_v52, 2102212464 }
 0x17b   : > { %v7179_v10 = vand.u32 8388607, %v8522_v28  ;;  %v7185_v60 = vpop.eup %6131  ;;  %v1361_v16 = vsub.s32 0, %v7175_v7  ;;  %v1644_v59 = vsel %vm1636_vm12, %v1623_v61, %v1626_v44  ;;  %v1477_v28 = vor.u32 4788187, %v1476_v55 }
 0x17c   : > { %8524 = vst [vmem:[#allocation27_spill] sm:$0xff] %v7185_v60  ;;  %vm1637_vm2 = vcmp.lt.s32.totalorder %v7155_v23, 2  ;;  %vm1638_vm14 = vcmp.lt.s32.totalorder %v7155_v23, 3  ;;  %v1645_v4 = vsel %vm1639_vm1, %v1632_v37, 920167782  ;;  %v1640_v49 = vsel %vm1636_vm12, %v1620_v27, %v1623_v61 }
 0x17d   : > { %v5128_v57 = vmin.u32 %v1361_v16, %v7175_v7  ;;  %v1646_v54 = vsel %vm1638_vm14, %v1629_v52, %v1645_v4  ;;  %v1648_v6 = vsel %vm1636_vm12, %v1626_v44, %v1629_v52  ;;  %v1642_v25 = vsel %vm1638_vm14, %v1626_v44, %v1641_v46 }
 0x17e   : > { %v1647_v48 = vsel %vm1637_vm2, %v1644_v59, %v1646_v54  ;;  %v1649_v11 = vsel %vm1639_vm1, %v1635_v38, 1326507024  ;;  %v1511_v55 = vadd.s32 1, %v5135_v43  ;;  %v1478_v63 = vand.u32 2147483647, %v1477_v28 }
 0x17f   : > { %v1363_v2 = vclz %v5128_v57  ;;  %v1650_v21 = vsel %vm1638_vm14, %v1632_v37, %v1649_v11  ;;  %v7200_v20 = vmul.u32.u64.low %v1652_v39, %v1647_v48  ;;  %v7201_v15 = vmul.u32.u64.high %v1652_v39, %v1647_v48, %v7200_v20 }
 0x180   : > { %v1651_v52 = vsel %vm1637_vm2, %v1648_v6, %v1650_v21  ;;  %vm1512_vm7 = vcmp.gt.s32.totalorder %v1511_v55, 0  ;;  %v8525_v38 = vxor.u32 2147483648, %v7132_v51  ;;  %v1480_v43 = vcvt.s32.f32 %v1473_v19 }
 0x181   : > { %v5129_v44 = vadd.s32 4294967294, %v1363_v2  ;;  %v7207_v61 = vmul.u32.u64.low %v1652_v39, %v1651_v52  ;;  %v7208_v16 = vmul.u32.u64.high %v1652_v39, %v1651_v52, %v7207_v61  ;;  %v1513_v27 = vsel %vm1512_vm7, %v1511_v55, 0 }
 0x182   : > { %v7215_v37 = vsel %vm1091_vm15, %v8525_v38, %v7132_v51  ;;  %v1643_v46 = vsel %vm1637_vm2, %v1640_v49, %v1642_v25  ;;  %v1515_v59 = vand.u32 31, %v1513_v27  ;;  %v1351_v28 = vadd.s32 %v7104_v45, %v7120_v24 }
 0x183   : > { %vm5130_vm6 = vcmp.lt.s32.totalorder %v5129_v44, 0  ;;  %v1662_v4 = vadd.s32 1, %v7201_v15  ;;  %v1509_v57 = vor.u32 8388608, %v7179_v10  ;;  %v7223_v54 = vmul.f32 %v1480_v43, %v1478_v63 }
 0x184   : > { %v1366_v6 = vsel %vm5130_vm6, 0, %v5129_v44  ;;  %v1516_v48 = vsub.s32 32, %v1515_v59  ;;  %v8452_v51 = vand.u32 2147483647, %v7153_v50  ;;  %v1659_v55 = vmul.u32 %v1652_v39, %v1643_v46 }
 0x185   : > { %v1367_v11 = vsub.s32 32, %v1366_v6  ;;  %v1371_v19 = vsub.s32 4294967266, %v1366_v6  ;;  %v7226_v23 = vshrl.u32 %v1513_v27, 5  ;;  %vm1661_vm15 = vc.u32 %v7208_v16, %v7200_v20 }
 0x186   : > { %v1518_v45 = vshll.u32 %v8501_v22, %v1515_v59  ;;  %v1519_v24 = vshrl.u32 %v8489_v31, %v1516_v48  ;;  %v1522_v10 = vshrl.u32 %v8490_v12, %v1516_v48  ;;  %v1663_v2 = vsel %vm1661_vm15, %v1662_v4, %v7201_v15 }
 0x187   : > { %v1369_v49 = vshrl.u32 %v1351_v28, %v1367_v11  ;;  %v1372_v25 = vadd.s32 127, %v1371_v19  ;;  %v1521_v21 = vshll.u32 %v8489_v31, %v1515_v59  ;;  %v1664_v63 = vadd.s32 %v1663_v2, %v1659_v55 }
 0x188   : > { %v1520_v52 = vor.u32 %v1519_v24, %v1518_v45  ;;  %v1524_v39 = vshll.u32 %v8490_v12, %v1515_v59  ;;  %v1525_v44 = vshrl.u32 %v8491_v35, %v1516_v48  ;;  %v1527_v38 = vshll.u32 %v8491_v35, %v1515_v59 }
 0x189   : > { %v1373_v61 = vshll.u32 %v1372_v25, 23  ;;  %v1523_v27 = vor.u32 %v1522_v10, %v1521_v21  ;;  %v1528_v43 = vshrl.u32 %v8492_v26, %v1516_v48  ;;  %v8526_v46 = vand.u32 2147483647, %v6824_v1 }
 0x18a   : > { %vm1400_vm12 = vcmp.lt.s32.totalorder %v6856_v41, 0  ;;  %v1482_v15 = vxor.u32 2147483648, %v7223_v54  ;;  %v1368_v4 = vshll.u32 %v7175_v7, %v1366_v6  ;;  %v1665_v11 = vadd.s32 536870912, %v1664_v63 }
 0x18b   : > { %vm7241_vm8 = vcmp.le.f32.partialorder %v8526_v46, 0.7853982  ;;  %v1531_v19 = vshrl.u32 %v8496_v47, %v1516_v48  ;;  %v1374_v55 = vor.u32 4788187, %v1373_v61  ;;  %v1526_v45 = vor.u32 %v1525_v44, %v1524_v39 }
 0x18c   : > { %v1529_v24 = vor.u32 %v1528_v43, %v1527_v38  ;;  %v1530_v10 = vshll.u32 %v8492_v26, %v1515_v59  ;;  %v1370_v25 = vor.u32 %v1369_v49, %v1368_v4  ;;  %v7250_v2 = vshrl.u32 %v1665_v11, 30 }
 0x18d   : > { %vm1533_vm1 = vcmp.lt.s32.totalorder %v7226_v23, 1  ;;  %v1549_v21 = vshll.u32 %v1509_v57, 8  ;;  %v8529_v46 = vand.u32 2147483647, %v6856_v41  ;;  %vm1536_vm14 = vcmp.lt.s32.totalorder %v7226_v23, 4 }
 0x18e   : > { %v1532_v7 = vor.u32 %v1531_v19, %v1530_v10  ;;  %v1541_v6 = vsel %vm1533_vm1, %v1520_v52, %v1523_v27  ;;  %v1813_v59 = vand.u32 2139095040, %v7153_v50  ;;  %v1667_v49 = vshll.u32 %v7250_v2, 30 }
 0x18f   : > { %vm7255_vm2 = vcmp.le.f32.partialorder %v8529_v46, 0.7853982  ;;  %v1517_v39 = vshrl.u32 %v8501_v22, %v1516_v48  ;;  %vm1535_vm7 = vcmp.lt.s32.totalorder %v7226_v23, 3  ;;  %v1542_v57 = vsel %vm1536_vm14, %v1529_v24, 920167782 }
 0x190   : > { %v1375_v44 = vand.u32 2147483647, %v1374_v55  ;;  %vm1534_vm6 = vcmp.lt.s32.totalorder %v7226_v23, 2  ;;  %v1538_v61 = vsel %vm1536_vm14, %v1526_v45, 2102212464  ;;  %v1543_v38 = vsel %vm1535_vm7, %v1526_v45, %v1542_v57 }
 0x191   : > { %v1377_v43 = vcvt.s32.f32 %v1370_v25  ;;  %v7273_v4 = vsub.s32 %v1664_v63, %v1667_v49  ;;  %v1544_v48 = vsel %vm1534_vm6, %v1541_v6, %v1543_v38  ;;  %v1545_v11 = vsel %vm1533_vm1, %v1523_v27, %v1526_v45  ;;  %v450_v49 = vpop.permute.xlu0 %449 }
 0x192   : > { %v1537_v19 = vsel %vm1533_vm1, %v1517_v39, %v1520_v52  ;;  %v1546_v55 = vsel %vm1536_vm14, %v1532_v7, 1326507024  ;;  %v7283_v10 = vmul.u32.u64.low %v1549_v21, %v1544_v48  ;;  %v7284_v46 = vmul.u32.u64.high %v1549_v21, %v1544_v48, %v7283_v10 }
 0x193   : > { %vm8461_vm15 = vcmp.lt.s32.totalorder %v6890_v53, 0  ;;  %v1670_v63 = vsub.s32 0, %v7273_v4  ;;  %v1539_v25 = vsel %vm1535_vm7, %v1523_v27, %v1538_v61  ;;  %v1547_v45 = vsel %vm1535_vm7, %v1529_v24, %v1546_v55 }
 0x194   : > { %v1814_v6 = vshrl.u32 %v1813_v59, 23  ;;  %v1177_v52 = vsel %vm7241_vm8, %v6824_v1, %v7215_v37  ;;  %v1483_v7 = vsel %vm1400_vm12, %v1482_v15, %v7223_v54  ;;  %v1378_v39 = vmul.f32 %v1377_v43, %v1375_v44 }
 0x195   : > { %v1548_v57 = vsel %vm1534_vm6, %v1545_v11, %v1547_v45  ;;  %v5140_v27 = vmin.u32 %v1670_v63, %v7273_v4  ;;  %v1817_v24 = vand.u32 8388607, %v8452_v51  ;;  %v1540_v59 = vsel %vm1534_vm6, %v1537_v19, %v1539_v25 }
 0x196   : > { %v7303_v61 = vmul.u32.u64.low %v1549_v21, %v1548_v57  ;;  %v7304_v38 = vmul.u32.u64.high %v1549_v21, %v1548_v57, %v7303_v61  ;;  %v1559_v37 = vadd.s32 1, %v7284_v46  ;;  %v5147_v48 = vadd.s32 4294967169, %v1814_v6 }
 0x197   : > { %v7312_v54 = vmul.f32 %v6414_v36, %v450_v49  ;;  %6133 = vcosq.f32 %v1177_v52  ;;  %v8532_v15 = vsub.s32 4, %v7060_v8  ;;  %v7324_v43 = vsel %vm7255_vm2, %v6856_v41, %v1483_v7 }
 0x198   : > { %v1672_v23 = vclz %v5140_v27  ;;  %6135 = vsinq.f32 %v1177_v52  ;;  %v1379_v11 = vxor.u32 2147483648, %v1378_v39  ;;  %v1820_v36 = vadd.s32 1, %v5147_v48 }
 0x199   : > { %v7319_v44 = vsel %vm1400_vm12, %v8532_v15, %v7060_v8  ;;  %v1556_v63 = vmul.u32 %v1549_v21, %v1540_v59  ;;  %vm1558_vm1 = vc.u32 %v7304_v38, %v7283_v10  ;;  %v1818_v25 = vor.u32 8388608, %v1817_v24 }
 0x19a   : > { %v5141_v55 = vadd.s32 4294967294, %v1672_v23  ;;  %6137 = vcosq.f32 %v7324_v43  ;;  %v1560_v8 = vsel %vm1558_vm1, %v1559_v37, %v7284_v46  ;;  %vm1821_vm12 = vcmp.gt.s32.totalorder %v1820_v36, 0 }
 0x19b   : > { %v1710_v45 = vand.u32 2139095040, %v7312_v54  ;;  %v1561_v6 = vadd.s32 %v1560_v8, %v1556_v63  ;;  %v1822_v49 = vsel %vm1821_vm12, %v1820_v36, 0  ;;  %v1380_v7 = vsel %vm8461_vm15, %v1379_v11, %v1378_v39 }
 0x19c   : > { %vm5142_vm14 = vcmp.lt.s32.totalorder %v5141_v55, 0  ;;  %v1660_v21 = vadd.s32 %v7200_v20, %v7208_v16  ;;  %v1824_v27 = vand.u32 31, %v1822_v49  ;;  %v7337_v46 = vshll.u32 %v1818_v25, 8 }
 0x19d   : > { %v1675_v57 = vsel %vm5142_vm14, 0, %v5141_v55  ;;  %v1562_v59 = vadd.s32 536870912, %v1561_v6  ;;  %v7340_v48 = vshrl.u32 %v1822_v49, 5  ;;  %v1711_v23 = vshrl.u32 %v1710_v45, 23 }
 0x19e   : > { %v1676_v61 = vsub.s32 32, %v1675_v57  ;;  %v1680_v24 = vsub.s32 4294967266, %v1675_v57  ;;  %v1677_v37 = vshll.u32 %v7273_v4, %v1675_v57  ;;  %v1825_v15 = vsub.s32 32, %v1824_v27 }
 0x19f   : > { %v7342_v8 = vshrl.u32 %v1562_v59, 30  ;;  %v1827_v39 = vshll.u32 %v8501_v22, %v1824_v27  ;;  %v8533_v20 = vand.u32 2147483647, %v6890_v53  ;;  %v1830_v4 = vshll.u32 %v8489_v31, %v1824_v27 }
 0x1a0   : > { %v1678_v36 = vshrl.u32 %v1660_v21, %v1676_v61  ;;  %v1681_v63 = vadd.s32 127, %v1680_v24  ;;  %v1828_v11 = vshrl.u32 %v8489_v31, %v1825_v15  ;;  %v1831_v55 = vshrl.u32 %v8490_v12, %v1825_v15 }
 0x1a1   : > { %vm7347_vm7 = vcmp.le.f32.partialorder %v8533_v20, 0.7853982  ;;  %v1834_v25 = vshrl.u32 %v8491_v35, %v1825_v15  ;;  %v7355_v45 = vpop.eup %6133  ;;  %v1564_v57 = vshll.u32 %v7342_v8, 30  ;;  %v1833_v61 = vshll.u32 %v8490_v12, %v1824_v27 }
 0x1a2   : > { %8536 = vst [vmem:[#allocation28_spill] sm:$0xff] %v7355_v45  ;;  %v1679_v49 = vor.u32 %v1678_v36, %v1677_v37  ;;  %v1682_v21 = vshll.u32 %v1681_v63, 23  ;;  %v7359_v24 = vpop.eup %6135  ;;  %v1829_v59 = vor.u32 %v1828_v11, %v1827_v39  ;;  %v1832_v20 = vor.u32 %v1831_v55, %v1830_v4 }
 0x1a3   : > { %8537 = vst [vmem:[#allocation29_spill] sm:$0xff] %v7359_v24  ;;  %v1836_v51 = vshll.u32 %v8491_v35, %v1824_v27  ;;  %v1837_v19 = vshrl.u32 %v8492_v26, %v1825_v15  ;;  %v7363_v1 = vsub.s32 %v1561_v6, %v1564_v57  ;;  %v1835_v58 = vor.u32 %v1834_v25, %v1833_v61 }
 0x1a4   : > { %v1683_v52 = vor.u32 4788187, %v1682_v21  ;;  %v5143_v60 = vadd.s32 4294967169, %v1711_v23  ;;  %v7365_v45 = vpop.eup %6137  ;;  %v1826_v37 = vshrl.u32 %v8501_v22, %v1825_v15  ;;  %v1839_v63 = vshll.u32 %v8492_v26, %v1824_v27 }
 0x1a5   : > { %v1838_v36 = vor.u32 %v1837_v19, %v1836_v51  ;;  %v1840_v24 = vshrl.u32 %v8496_v47, %v1825_v15  ;;  %v1686_v11 = vcvt.s32.f32 %v1679_v49  ;;  %v1567_v4 = vsub.s32 0, %v7363_v1 }
 0x1a6   : > { %v1684_v39 = vand.u32 2147483647, %v1683_v52  ;;  %vm1842_vm6 = vcmp.lt.s32.totalorder %v7340_v48, 1  ;;  %vm1843_vm1 = vcmp.lt.s32.totalorder %v7340_v48, 2  ;;  %vm1845_vm12 = vcmp.lt.s32.totalorder %v7340_v48, 4 }
 0x1a7   : > { %v1841_v55 = vor.u32 %v1840_v24, %v1839_v63  ;;  %v1850_v6 = vsel %vm1842_vm6, %v1829_v59, %v1832_v20  ;;  %vm8460_vm14 = vcmp.lt.s32.totalorder %v7050_v29, 0  ;;  %v5136_v51 = vmin.u32 %v1567_v4, %v7363_v1 }
 0x1a8   : > { %vm1844_vm0 = vcmp.lt.s32.totalorder %v7340_v48, 3  ;;  %v1847_v19 = vsel %vm1845_vm12, %v1835_v58, 2102212464  ;;  %v1851_v52 = vsel %vm1845_vm12, %v1838_v36, 920167782  ;;  %v1687_v27 = vmul.f32 %v1686_v11, %v1684_v39 }
 0x1a9   : > { %v1852_v15 = vsel %vm1844_vm0, %v1835_v58, %v1851_v52  ;;  %v1854_v23 = vsel %vm1842_vm6, %v1832_v20, %v1835_v58  ;;  %v1855_v25 = vsel %vm1845_vm12, %v1841_v55, 1326507024  ;;  %v7384_v49 = vsel %vm7347_vm7, %v6890_v53, %v1380_v7  ;;  %v8590_v28 = vld [vmem:[#allocation28_spill] sm:$0xff] }
 0x1aa   : > { %v1569_v21 = vclz %v5136_v51  ;;  %v1846_v57 = vsel %vm1842_vm6, %v1826_v37, %v1829_v59  ;;  %v1853_v61 = vsel %vm1843_vm1, %v1850_v6, %v1852_v15  ;;  %v1848_v24 = vsel %vm1844_vm0, %v1832_v20, %v1847_v19 }
 0x1ab   : > { %v1856_v63 = vsel %vm1844_vm0, %v1838_v36, %v1855_v25  ;;  %v7391_v39 = vmul.u32.u64.low %v7337_v46, %v1853_v61  ;;  %v7392_v11 = vmul.u32.u64.high %v7337_v46, %v1853_v61, %v7391_v39  ;;  %v8538_v7 = vand.u32 2147483647, %v7312_v54 }
 0x1ac   : > { %v5137_v58 = vadd.s32 4294967294, %v1569_v21  ;;  %v1857_v4 = vsel %vm1843_vm1, %v1854_v23, %v1856_v63  ;;  %v1717_v51 = vadd.s32 1, %v5143_v60  ;;  %6139 = vsinq.f32 %v7324_v43 }
 0x1ad   : > { %v1714_v55 = vand.u32 8388607, %v8538_v7  ;;  %v1688_v59 = vxor.u32 2147483648, %v1687_v27  ;;  %v7401_v37 = vmul.u32.u64.low %v7337_v46, %v1857_v4  ;;  %v7402_v20 = vmul.u32.u64.high %v7337_v46, %v1857_v4, %v7401_v37 }
 0x1ae   : > { %vm5138_vm0 = vcmp.lt.s32.totalorder %v5137_v58, 0  ;;  %v1849_v6 = vsel %vm1843_vm1, %v1846_v57, %v1848_v24  ;;  %vm1718_vm6 = vcmp.gt.s32.totalorder %v1717_v51, 0  ;;  %6141 = vcosq.f32 %v7384_v49 }
 0x1af   : > { %v1572_v19 = vsel %vm5138_vm0, 0, %v5137_v58  ;;  %v1868_v52 = vadd.s32 1, %v7392_v11  ;;  %v1719_v60 = vsel %vm1718_vm6, %v1717_v51, 0  ;;  %v8539_v43 = vand.u32 2147483647, %v7050_v29 }
 0x1b0   : > { %v1557_v23 = vadd.s32 %v7283_v10, %v7304_v38  ;;  %v1573_v25 = vsub.s32 32, %v1572_v19  ;;  %v1577_v21 = vsub.s32 4294967266, %v1572_v19  ;;  %v1715_v48 = vor.u32 8388608, %v1714_v55 }
 0x1b1   : > { %vm7411_vm12 = vcmp.le.f32.partialorder %v8539_v43, 0.7853982  ;;  %v1689_v57 = vsel %vm8460_vm14, %v1688_v59, %v1687_v27  ;;  %v1865_v61 = vmul.u32 %v7337_v46, %v1849_v6  ;;  %vm1867_vm1 = vc.u32 %v7402_v20, %v7391_v39 }
 0x1b2   : > { %v1721_v24 = vand.u32 31, %v1719_v60  ;;  %v1574_v63 = vshll.u32 %v7363_v1, %v1572_v19  ;;  %v1575_v58 = vshrl.u32 %v1557_v23, %v1573_v25  ;;  %v1578_v4 = vadd.s32 127, %v1577_v21 }
 0x1b3   : > { %v1869_v7 = vsel %vm1867_vm1, %v1868_v52, %v7392_v11  ;;  %v1720_v10 = vshrl.u32 %v1719_v60, 5  ;;  %6143 = vsinq.f32 %v7384_v49  ;;  %v570_v18 = vxor.u32 2147483648, %v6903_v9 }
 0x1b4   : > { %v1870_v51 = vadd.s32 %v1869_v7, %v1865_v61  ;;  %v1722_v38 = vsub.s32 32, %v1721_v24  ;;  %v1724_v55 = vshll.u32 %v8501_v22, %v1721_v24  ;;  %v1576_v37 = vor.u32 %v1575_v58, %v1574_v63 }
 0x1b5   : > { %v1579_v43 = vshll.u32 %v1578_v4, 23  ;;  %v1727_v27 = vshll.u32 %v8489_v31, %v1721_v24  ;;  %v1730_v46 = vshll.u32 %v8490_v12, %v1721_v24  ;;  %v1733_v19 = vshll.u32 %v8491_v35, %v1721_v24 }
 0x1b6   : > { %v1871_v59 = vadd.s32 536870912, %v1870_v51  ;;  %v1725_v6 = vshrl.u32 %v8489_v31, %v1722_v38  ;;  %v1728_v1 = vshrl.u32 %v8490_v12, %v1722_v38  ;;  %v1583_v11 = vcvt.s32.f32 %v1576_v37  ;;  %v7432_v25 = vpop.eup %6139 }
 0x1b7   : > { %v1580_v23 = vor.u32 4788187, %v1579_v43  ;;  %v1731_v52 = vshrl.u32 %v8491_v35, %v1722_v38  ;;  %v1734_v60 = vshrl.u32 %v8492_v26, %v1722_v38  ;;  %v1736_v58 = vshll.u32 %v8492_v26, %v1721_v24 }
 0x1b8   : > { %v7434_v21 = vshrl.u32 %v1871_v59, 30  ;;  %v1726_v61 = vor.u32 %v1725_v6, %v1724_v55  ;;  %v1729_v63 = vor.u32 %v1728_v1, %v1727_v27  ;;  %v1737_v12 = vshrl.u32 %v8496_v47, %v1722_v38  ;;  %v7438_v36 = vpop.eup %6141 }
 0x1b9   : > { %v1581_v4 = vand.u32 2147483647, %v1580_v23  ;;  %v1732_v31 = vor.u32 %v1731_v52, %v1730_v46  ;;  %v1735_v7 = vor.u32 %v1734_v60, %v1733_v19  ;;  %v1692_v35 = vsel %vm7411_vm12, %v7050_v29, %v1689_v57 }
 0x1ba   : > { %v1587_v37 = vsub.s32 4, %v7342_v8  ;;  %v1873_v55 = vshll.u32 %v7434_v21, 30  ;;  %v7446_v43 = vshll.u32 %v1715_v48, 8  ;;  %v1738_v24 = vor.u32 %v1737_v12, %v1736_v58 }
 0x1bb   : > { %v1584_v26 = vmul.f32 %v1583_v11, %v1581_v4  ;;  %vm1739_vm6 = vcmp.lt.s32.totalorder %v1720_v10, 1  ;;  %vm1742_vm1 = vcmp.lt.s32.totalorder %v1720_v10, 4  ;;  %v1723_v47 = vshrl.u32 %v8501_v22, %v1722_v38 }
 0x1bc   : > { %v7448_v27 = vsub.s32 %v1870_v51, %v1873_v55  ;;  %v1744_v46 = vsel %vm1742_vm1, %v1732_v31, 2102212464  ;;  %v1747_v59 = vsel %vm1739_vm6, %v1726_v61, %v1729_v63  ;;  %vm1740_vm14 = vcmp.lt.s32.totalorder %v1720_v10, 2 }
 0x1bd   : > { %vm1741_vm15 = vcmp.lt.s32.totalorder %v1720_v10, 3  ;;  %v1748_v57 = vsel %vm1742_vm1, %v1735_v7, 920167782  ;;  %v1751_v6 = vsel %vm1739_vm6, %v1729_v63, %v1732_v31  ;;  %v1743_v19 = vsel %vm1739_vm6, %v1723_v47, %v1726_v61  ;;  %v6047_v47 = vld [vmem:[%s8406_s3] sm:$0xff]  }
 0x1be   : > { %v1876_v1 = vsub.s32 0, %v7448_v27  ;;  %v1749_v23 = vsel %vm1741_vm15, %v1732_v31, %v1748_v57  ;;  %v1752_v48 = vsel %vm1742_vm1, %v1738_v24, 1326507024  ;;  %v1585_v52 = vxor.u32 2147483648, %v1584_v26 }
 0x1bf   : > { %v1745_v11 = vsel %vm1741_vm15, %v1729_v63, %v1744_v46  ;;  %v1750_v60 = vsel %vm1740_vm14, %v1747_v59, %v1749_v23  ;;  %v1753_v58 = vsel %vm1741_vm15, %v1735_v7, %v1752_v48  ;;  %v8542_v22 = vand.u32 2147483647, %v7124_v14 }
 0x1c0   : > { %v5148_v38 = vmin.u32 %v1876_v1, %v7448_v27  ;;  %v1754_v4 = vsel %vm1740_vm14, %v1751_v6, %v1753_v58  ;;  %v8545_v61 = vsub.s32 4, %v7159_v3  ;;  %vm8546_vm6 = vcmp.lt.s32.totalorder %v6890_v53, 0  ;;  %v6049_v58 = vld [vmem:[%s8406_s3 + $0x10] sm:$0xff]  }
 0x1c1   : > { %vm7456_vm0 = vcmp.le.f32.partialorder %v8542_v22, 0.7853982  ;;  %6145 = vcosq.f32 %v1692_v35  ;;  %v7470_v49 = vmul.u32.u64.low %v7446_v43, %v1754_v4  ;;  %v7471_v31 = vmul.u32.u64.high %v7446_v43, %v1754_v4, %v7470_v49 }
 0x1c2   : > { %v7467_v63 = vsel %vm8546_vm6, %v8545_v61, %v7159_v3  ;;  %v1878_v7 = vclz %v5148_v38  ;;  %v1746_v12 = vsel %vm1740_vm14, %v1743_v19, %v1745_v11  ;;  %v8547_v3 = vsub.s32 4, %v7250_v2 }
 0x1c3   : > { %v7475_v55 = vmul.u32.u64.low %v7446_v43, %v1750_v60  ;;  %v7476_v24 = vmul.u32.u64.high %v7446_v43, %v1750_v60, %v7475_v55  ;;  %vm8548_vm15 = vcmp.lt.s32.totalorder %v7050_v29, 0  ;;  %6147 = vsinq.f32 %v1692_v35  ;;  %v6048_v35 = vld [vmem:[%s8406_s3 + $0x8] sm:$0xff]  }
 0x1c4   : > { %v7487_v46 = vsel %vm8548_vm15, %v8547_v3, %v7250_v2  ;;  %vm8549_vm1 = vcmp.lt.s32.totalorder %v7124_v14, 0  ;;  %v1866_v57 = vadd.s32 %v7391_v39, %v7402_v20  ;;  %v5149_v6 = vadd.s32 4294967294, %v1878_v7 }
 0x1c5   : > { %v1586_v10 = vsel %vm8549_vm1, %v1585_v52, %v1584_v26  ;;  %vm8550_vm14 = vmmov %vm8549_vm1  ;;  %v1896_v1 = vsub.s32 4, %v7434_v21  ;;  %v1762_v19 = vmul.u32 %v7446_v43, %v1746_v12  ;;  %vm1764_vm6 = vc.u32 %v7471_v31, %v7475_v55 }
 0x1c6   : > { %v7494_v59 = vsel %vm8550_vm14, %v1587_v37, %v7342_v8  ;;  %v6316_v2 = vmov 0.0   ;;  %v7507_v8 = vsel %vm6806_vm3, 0, %v6710_v32  ;;  %v1589_v39 = vsel %vm7456_vm0, %v7124_v14, %v1586_v10 }
 0x1c7   : > { %5495 = vmatprep.subr.bf16.mxu0 %v6316_v2  ;;  %5789 = vmatprep.subr.bf16.mxu1 %v6316_v2  ;;  %vm5150_vm15 = vcmp.lt.s32.totalorder %v5149_v6, 0  ;;  %v1765_v20 = vadd.s32 1, %v7476_v24  ;;  %v564_v37 = vand.u32 3, %v7507_v8  ;;  %v567_v32 = vxor.u32 2147483648, %v6908_v17 }
 0x1c8   : > { %5496 = vmatpush3.bf16.msra.mxu0 %v6047_v47  ;;  %5797 = vmatpush3.bf16.msra.mxu1 %v6047_v47  ;;  %v1881_v43 = vsel %vm5150_vm15, 0, %v5149_v6  ;;  %v663_v26 = vsel %vm6972_vm9, 0, %v6876_v42  ;;  %vm8462_vm3 = vmmov 0   ;;  %v7533_v42 = vpop.eup %6143  ;;  %6149 = vcosq.f32 %v1589_v39 }
 0x1c9   : > { %5497 = vmatprep.subr.bf16.mxu0 %v6316_v2  ;;  %5790 = vmatprep.subr.bf16.mxu1 %v6316_v2  ;;  %v1882_v23 = vsub.s32 32, %v1881_v43  ;;  %v1883_v48 = vshll.u32 %v7448_v27, %v1881_v43  ;;  %v1886_v52 = vsub.s32 4294967266, %v1881_v43  ;;  %v1766_v11 = vsel %vm1764_vm6, %v1765_v20, %v7476_v24 }
 0x1ca   : > { %5511 = vmatprep.mubr.msk.bf16.mxu0 %vm8462_vm3, %v6316_v2  ;;  %5527 = vmatprep.mubr.msk.bf16.mxu1 %vm8462_vm3, %v6316_v2  ;;  %v1767_v60 = vadd.s32 %v1766_v11, %v1762_v19  ;;  %vm565_vm1 = vcmp.lt.s32.totalorder %v564_v37, 2  ;;  %vm566_vm14 = vcmp.eq.s32.totalorder %v564_v37, 0  ;;  %vm569_vm9 = vcmp.eq.s32.totalorder %v564_v37, 2 }
 0x1cb   : > { %v1884_v5 = vshrl.u32 %v1866_v57, %v1882_v23  ;;  %v1887_v27 = vadd.s32 127, %v1886_v52  ;;  %v568_v22 = vsel %vm566_vm14, %v6903_v9, %v567_v32  ;;  %v571_v38 = vsel %vm569_vm9, %v570_v18, %v6908_v17  ;;  %v7544_v4 = vpop.eup %6145 }
 0x1cc   : > { %5498 = vmatpush3.bf16.msra.mxu0 %v6048_v35  ;;  %5798 = vmatpush3.bf16.msra.mxu1 %v6048_v35  ;;  %v1768_v61 = vadd.s32 536870912, %v1767_v60  ;;  %v572_v49 = vsel %vm565_vm1, %v568_v22, %v571_v38  ;;  %v667_v7 = vand.u32 3, %v663_v26  ;;  %vm8464_vm6 = vweird.f32 %v6420_v40 }
 0x1cd   : > { %5499 = vmatprep.subr.bf16.mxu0 %v6316_v2  ;;  %5791 = vmatprep.subr.bf16.mxu1 %v6316_v2  ;;  %v1885_v12 = vor.u32 %v1884_v5, %v1883_v48  ;;  %v1888_v24 = vshll.u32 %v1887_v27, 23  ;;  %v670_v47 = vxor.u32 2147483648, %v7081_v13  ;;  %v7551_v3 = vpop.eup %6147  ;;  %6151 = vsinq.f32 %v1589_v39  ;;  %v6050_v39 = vld [vmem:[%s8406_s3 + $0x18] sm:$0xff]  }
 0x1ce   : > { %v7556_v10 = vadd.s32 %v7475_v55, %v7471_v31  ;;  %v7558_v57 = vshrl.u32 %v1768_v61, 30  ;;  %v7562_v6 = vsel %vm8464_vm6, nan, %v572_v49  ;;  %v8551_v19 = vand.u32 2147483647, %v7153_v50 }
 0x1cf   : > { %v8552_v20 = vmov 0  ;;  %v1889_v35 = vor.u32 4788187, %v1888_v24  ;;  %vm669_vm14 = vcmp.eq.s32.totalorder %v667_v7, 0  ;;  %vm672_vm9 = vcmp.eq.s32.totalorder %v667_v7, 2 }
 0x1d0   : > { %vm7566_vm1 = vcmp.le.f32.partialorder %v8551_v19, 0.7853982  ;;  %5500 = vmatpush3.bf16.msra.mxu0 %v6049_v58  ;;  %5799 = vmatpush3.bf16.msra.mxu1 %v6049_v58  ;;  %v673_v31 = vxor.u32 2147483648, %v7076_v62  ;;  %v1770_v55 = vshll.u32 %v7558_v57, 30  ;;  %v671_v37 = vsel %vm669_vm14, %v7076_v62, %v670_v47 }
 0x1d1   : > { %v8553_v20 = vsel %vm7566_vm1, 4294967295, %v8552_v20  ;;  %5501 = vmatprep.subr.bf16.mxu0 %v6316_v2  ;;  %5792 = vmatprep.subr.bf16.mxu1 %v6316_v2  ;;  %v2006_v43 = vadd.s32 3, %v7507_v8  ;;  %v2110_v23 = vadd.s32 3, %v663_v26  ;;  %v1890_v48 = vand.u32 2147483647, %v1889_v35  ;;  %v6051_v8 = vld [vmem:[%s8406_s3 + $0x20] sm:$0xff]  }
 0x1d2   : > { %v1892_v52 = vcvt.s32.f32 %v1885_v12  ;;  %v674_v11 = vsel %vm672_vm9, %v673_v31, %v7081_v13  ;;  %v7584_v5 = vsel %vm6632_vm13, 0, %v6697_v33  ;;  %v7586_v27 = vsub.s32 %v1767_v60, %v1770_v55  ;;  %v7604_v12 = vpop.eup %6149 }
 0x1d3   : > { %v1793_v58 = vsub.s32 4, %v7558_v57  ;;  %vm668_vm3 = vcmp.lt.s32.totalorder %v667_v7, 2  ;;  %v2007_v22 = vand.u32 3, %v2006_v43  ;;  %v2111_v61 = vand.u32 3, %v2110_v23  ;;  %v8558_v23 = vld [vmem:[#allocation3_spill] sm:$0xff] }
 0x1d4   : > { %v1893_v38 = vmul.f32 %v1892_v52, %v1890_v48  ;;  %5502 = vmatpush3.bf16.msra.mxu0 %v6050_v39  ;;  %5800 = vmatpush3.bf16.msra.mxu1 %v6050_v39  ;;  %v675_v26 = vsel %vm668_vm3, %v671_v37, %v674_v11  ;;  %v7593_v49 = vand.u32 3, %v7584_v5  ;;  %v1773_v34 = vsub.s32 0, %v7586_v27  ;;  %v8560_v52 = vld [vmem:[#allocation8_spill] sm:$0xff]  ;;  %v8561_v11 = vld [vmem:[#allocation9_spill] sm:$0xff] }
 0x1d5   : > { %5503 = vmatprep.subr.bf16.mxu0 %v6316_v2  ;;  %5793 = vmatprep.subr.bf16.mxu1 %v6316_v2  ;;  %vm2008_vm13 = vcmp.lt.s32.totalorder %v2007_v22, 2  ;;  %vm2009_vm14 = vcmp.eq.s32.totalorder %v2007_v22, 0  ;;  %vm2012_vm9 = vcmp.eq.s32.totalorder %v2007_v22, 2  ;;  %vm2112_vm3 = vcmp.lt.s32.totalorder %v2111_v61, 2 }
 0x1d6   : > { %v1894_v33 = vxor.u32 2147483648, %v1893_v38  ;;  %v2011_v60 = vsel %vm2009_vm14, %v6903_v9, %v567_v32  ;;  %v2014_v7 = vsel %vm2012_vm9, %v570_v18, %v6908_v17  ;;  %v5144_v24 = vmin.u32 %v1773_v34, %v7586_v27  ;;  %v6052_v32 = vld [vmem:[%s8406_s3 + $0x28] sm:$0xff]   ;;  %v8563_v34 = vld [vmem:[#allocation14_spill] sm:$0xff] }
 0x1d7   : > { %v2015_v19 = vsel %vm2008_vm13, %v2011_v60, %v2014_v7  ;;  %vm2113_vm6 = vcmp.eq.s32.totalorder %v2111_v61, 0  ;;  %vm2116_vm15 = vcmp.eq.s32.totalorder %v2111_v61, 2  ;;  %vm8554_vm11 = vcmp.lt.s32.totalorder %v7153_v50, 0  ;;  %v7616_v39 = vpop.eup %6151  ;;  %v8564_v60 = vld [vmem:[#allocation13_spill] sm:$0xff] }
 0x1d8   : > { %v1895_v35 = vsel %vm8554_vm11, %v1894_v33, %v1893_v38  ;;  %5504 = vmatpush3.bf16.msra.mxu0 %v6051_v8  ;;  %5801 = vmatpush3.bf16.msra.mxu1 %v6051_v8  ;;  %vm8555_vm14 = vweird.f32 %v6420_v40  ;;  %v2115_v17 = vsel %vm2113_vm6, %v7076_v62, %v670_v47  ;;  %v2118_v18 = vsel %vm2116_vm15, %v673_v31, %v7081_v13 }
 0x1d9   : > { %v2016_v9 = vsel %vm8555_vm14, nan, %v2015_v19  ;;  %v1898_v55 = vsel %vm7566_vm1, %v7153_v50, %v1895_v35  ;;  %v1775_v37 = vclz %v5144_v24  ;;  %5505 = vmatprep.subr.bf16.mxu0 %v6316_v2  ;;  %5794 = vmatprep.subr.bf16.mxu1 %v6316_v2  ;;  %vm666_vm11 = vweird.f32 %v6435_v0  ;;  %v8559_v0 = vld [vmem:[#allocation10_spill] sm:$0xff] }
 0x1da   : > { %v2119_v40 = vsel %vm2112_vm3, %v2115_v17, %v2118_v18  ;;  %6153 = vcosq.f32 %v1898_v55  ;;  %vm8556_vm6 = vcmp.lt.s32.totalorder %v7312_v54, 0  ;;  %v676_v13 = vsel %vm666_vm11, nan, %v675_v26 }
 0x1db   : > { %v7628_v62 = vsel %vm8556_vm6, %v1793_v58, %v7558_v57  ;;  %vm8557_vm15 = vcmp.lt.s32.totalorder %v6407_v30, 64  ;;  %v5145_v31 = vadd.s32 4294967294, %v1775_v37  ;;  %v2120_v43 = vsel %vm666_vm11, nan, %v2119_v40  ;;  %v6053_v57 = vld [vmem:[%s8406_s3 + $0x30] sm:$0xff]  }
 0x1dc   : > { %v7633_v47 = vsel %vm8557_vm15, %v7562_v6, %v2016_v9  ;;  %vm769_vm13 = vweird.f32 %v8558_v23  ;;  %vm771_vm9 = vcmp.lt.s32.totalorder %v7593_v49, 2  ;;  %v773_v48 = vxor.u32 2147483648, %v8559_v0  ;;  %5506 = vmatpush3.bf16.msra.mxu0 %v6052_v32  ;;  %5802 = vmatpush3.bf16.msra.mxu1 %v6052_v32  ;;  %v6054_v9 = vld [vmem:[%s8406_s3 + $0x38] sm:$0xff]  }
 0x1dd   : > { %6155 = vsinq.f32 %v1898_v55  ;;  %vm772_vm3 = vcmp.eq.s32.totalorder %v7593_v49, 0  ;;  %v776_v6 = vxor.u32 2147483648, %v8560_v52  ;;  %v869_v22 = vsel %vm6818_vm4, 0, %v8561_v11  ;;  %5507 = vmatprep.subr.bf16.mxu0 %v6316_v2  ;;  %5795 = vmatprep.subr.bf16.mxu1 %v6316_v2  ;;  %vm8565_vm4 = vmmov %vm8557_vm15  ;;  %v8566_v11 = vld [vmem:[#allocation4_spill] sm:$0xff] }
 0x1de   : > { %vm5146_vm14 = vcmp.lt.s32.totalorder %v5145_v31, 0  ;;  %v774_v38 = vsel %vm772_vm3, %v8560_v52, %v773_v48  ;;  %vm775_vm11 = vcmp.eq.s32.totalorder %v7593_v49, 2  ;;  %v873_v8 = vand.u32 3, %v869_v22 }
 0x1df   : > { %v1778_v26 = vsel %vm5146_vm14, 0, %v5145_v31  ;;  %v777_v61 = vsel %vm775_vm11, %v776_v6, %v8559_v0  ;;  %v876_v33 = vxor.u32 2147483648, %v8563_v34  ;;  %v879_v7 = vxor.u32 2147483648, %v8564_v60 }
 0x1e0   : > { %v1779_v24 = vsub.s32 32, %v1778_v26  ;;  %v1780_v19 = vshll.u32 %v7586_v27, %v1778_v26  ;;  %v1783_v35 = vsub.s32 4294967266, %v1778_v26  ;;  %v3372_v32 = vsel %vm8565_vm4, %v676_v13, %v2120_v43  ;;  %5508 = vmatpush3.bf16.msra.mxu0 %v6053_v57  ;;  %5803 = vmatpush3.bf16.msra.mxu1 %v6053_v57 }
 0x1e1   : > { %v778_v17 = vsel %vm771_vm9, %v774_v38, %v777_v61  ;;  %vm874_vm6 = vcmp.lt.s32.totalorder %v873_v8, 2  ;;  %vm875_vm15 = vcmp.eq.s32.totalorder %v873_v8, 0  ;;  %vm878_vm3 = vcmp.eq.s32.totalorder %v873_v8, 2  ;;  %5509 = vmatprep.subr.bf16.mxu0 %v6316_v2  ;;  %5796 = vmatprep.subr.bf16.mxu1 %v6316_v2 }
 0x1e2   : > { %v1781_v18 = vshrl.u32 %v7556_v10, %v1779_v24  ;;  %v1784_v55 = vadd.s32 127, %v1783_v35  ;;  %v877_v27 = vsel %vm875_vm15, %v8564_v60, %v876_v33  ;;  %v880_v37 = vsel %vm878_vm3, %v879_v7, %v8563_v34 }
 0x1e3   : > { %v881_v40 = vsel %vm874_vm6, %v877_v27, %v880_v37  ;;  %v2214_v13 = vadd.s32 3, %v7584_v5  ;;  %v2318_v31 = vadd.s32 3, %v869_v22  ;;  %v7672_v49 = vsel %vm7347_vm7, 0, %v7467_v63 }
 0x1e4   : > { %v1782_v43 = vor.u32 %v1781_v18, %v1780_v19  ;;  %v1785_v10 = vshll.u32 %v1784_v55, 23  ;;  %v3385_v57 = vpack.c.bf16 %v3372_v32, %v7633_v47  ;;  %vm8466_vm9 = vweird.f32 %v8566_v11  ;;  %v7676_v58 = vpop.eup %6153  ;;  %5510 = vmatpush3.bf16.msra.mxu0 %v6054_v9  ;;  %5804 = vmatpush3.bf16.msra.mxu1 %v6054_v9 }
 0x1e5   : > { %v779_v38 = vsel %vm769_vm13, nan, %v778_v17  ;;  %v882_v5 = vsel %vm8466_vm9, nan, %v881_v40  ;;  %v2215_v22 = vand.u32 3, %v2214_v13  ;;  %v2319_v8 = vand.u32 3, %v2318_v31  ;;  %5539 = vmatprep.subr.bf16.mxu1 %v6316_v2  ;;  %5657 = vmatprep.subr.bf16.mxu0 %v6316_v2 }
 0x1e6   : > { %v8567_v16 = vand.u32 2147483647, %v7312_v54  ;;  %v1786_v47 = vor.u32 4788187, %v1785_v10  ;;  %v1789_v26 = vcvt.s32.f32 %v1782_v43  ;;  %v1388_v61 = vand.u32 3, %v7672_v49 }
 0x1e7   : > { %v1391_v24 = vxor.u32 2147483648, %v7533_v42  ;;  %v7692_v19 = vpop.eup %6155  ;;  %vm2216_vm14 = vcmp.lt.s32.totalorder %v2215_v22, 2  ;;  %vm2217_vm11 = vcmp.eq.s32.totalorder %v2215_v22, 0  ;;  %vm2220_vm4 = vcmp.eq.s32.totalorder %v2215_v22, 2  ;;  %5512 = vmatmul.mubr.bf16.vlgmr.msra.gmra.mrb[0].mxu0 %v3385_v57 }
 0x1e8   : > { %vm7684_vm7 = vcmp.le.f32.partialorder %v8567_v16, 0.7853982  ;;  %v1394_v35 = vxor.u32 2147483648, %v7438_v36  ;;  %v1787_v32 = vand.u32 2147483647, %v1786_v47  ;;  %v2219_v9 = vsel %vm2217_vm11, %v8560_v52, %v773_v48  ;;  %v8586_v16 = vld [vmem:[#allocation5_spill] sm:$0xff] }
 0x1e9   : > { %v2222_v17 = vsel %vm2220_vm4, %v776_v6, %v8559_v0  ;;  %vm2321_vm6 = vcmp.eq.s32.totalorder %v2319_v8, 0  ;;  %vm8570_vm15 = vmmov 0   ;;  %vm2324_vm3 = vcmp.eq.s32.totalorder %v2319_v8, 2 }
 0x1ea   : > { %5515 = vmatprep.mubr.msk.bf16.mxu0 %vm8570_vm15, %v6316_v2  ;;  %v2223_v18 = vsel %vm2216_vm14, %v2219_v9, %v2222_v17  ;;  %v2323_v55 = vsel %vm2321_vm6, %v8564_v60, %v876_v33  ;;  %v1487_v27 = vsel %vm7255_vm2, 0, %v7319_v44  ;;  %v1790_v37 = vmul.f32 %v1789_v26, %v1787_v32  ;;  %v8577_v17 = vld [vmem:[#allocation25_spill] sm:$0xff] }
 0x1eb   : > { %v2224_v40 = vsel %vm769_vm13, nan, %v2223_v18  ;;  %vm2320_vm9 = vcmp.lt.s32.totalorder %v2319_v8, 2  ;;  %v2326_v48 = vsel %vm2324_vm3, %v879_v7, %v8563_v34  ;;  %vm1387_vm11 = vweird.f32 %v6890_v53  ;;  %v8575_v8 = vld [vmem:[#allocation18_spill] sm:$0xff]  ;;  %v8583_v53 = vld [vmem:[#allocation20_spill] sm:$0xff] }
 0x1ec   : > { %v2327_v0 = vsel %vm2320_vm9, %v2323_v55, %v2326_v48  ;;  %vm1390_vm4 = vcmp.eq.s32.totalorder %v1388_v61, 0  ;;  %vm1393_vm1 = vcmp.eq.s32.totalorder %v1388_v61, 2  ;;  %v1791_v52 = vxor.u32 2147483648, %v1790_v37  ;;  %v8578_v55 = vld [vmem:[#allocation24_spill] sm:$0xff] }
 0x1ed   : > { %vm8571_vm14 = vweird.f32 %v8566_v11  ;;  %v1392_v56 = vsel %vm1390_vm4, %v7438_v36, %v1391_v24  ;;  %v1395_v44 = vsel %vm1393_vm1, %v1394_v35, %v7533_v42  ;;  %vm8572_vm2 = vcmp.lt.s32.totalorder %v6407_v30, 64 }
 0x1ee   : > { %v2328_v6 = vsel %vm8571_vm14, nan, %v2327_v0  ;;  %v3373_v23 = vsel %vm8572_vm2, %v779_v38, %v2224_v40  ;;  %vm8573_vm13 = vmmov %vm8572_vm2  ;;  %v1491_v33 = vand.u32 3, %v1487_v27  ;;  %v1494_v60 = vxor.u32 2147483648, %v7432_v25 }
 0x1ef   : > { %v3374_v34 = vsel %vm8573_vm13, %v882_v5, %v2328_v6  ;;  %vm8574_vm9 = vcmp.lt.s32.totalorder %v7312_v54, 0  ;;  %vm1389_vm6 = vcmp.lt.s32.totalorder %v1388_v61, 2  ;;  %v1497_v31 = vxor.u32 2147483648, %v7365_v45 }
 0x1f0   : > { %v1792_v7 = vsel %vm8574_vm9, %v1791_v52, %v1790_v37  ;;  %v3386_v13 = vpack.c.bf16 %v3374_v34, %v3373_v23  ;;  %v1396_v10 = vsel %vm1389_vm6, %v1392_v56, %v1395_v44  ;;  %vm1493_vm1 = vcmp.eq.s32.totalorder %v1491_v33, 0  ;;  %v8579_v37 = vld [vmem:[#allocation17_spill] sm:$0xff] }
 0x1f1   : > { %v7726_v43 = vsel %vm7684_vm7, %v7312_v54, %v1792_v7  ;;  %vm1496_vm3 = vcmp.eq.s32.totalorder %v1491_v33, 2  ;;  %vm1492_vm4 = vcmp.lt.s32.totalorder %v1491_v33, 2  ;;  %v1495_v57 = vsel %vm1493_vm1, %v7365_v45, %v1494_v60 }
 0x1f2   : > { %5516 = vmatmul.mubr.bf16.gmra.mrb[4].mxu0 %v3386_v13  ;;  %v1498_v11 = vsel %vm1496_vm3, %v1497_v31, %v7432_v25  ;;  %v2838_v38 = vadd.s32 3, %v7672_v49  ;;  %vm1490_vm14 = vweird.f32 %v6856_v41  ;;  %v2942_v22 = vadd.s32 3, %v1487_v27  ;;  %v8585_v13 = vld [vmem:[#allocation19_spill] sm:$0xff] }
 0x1f3   : > { %v1499_v5 = vsel %vm1492_vm4, %v1495_v57, %v1498_v11  ;;  %5519 = vmatprep.mubr.msk.bf16.mxu0 %vm8570_vm15, %v6316_v2  ;;  %v972_v47 = vsel %vm7011_vm5, 0, %v8575_v8  ;;  %6157 = vcosq.f32 %v7726_v43  ;;  %v1397_v26 = vsel %vm1387_vm11, nan, %v1396_v10 }
 0x1f4   : > { %v2839_v61 = vand.u32 3, %v2838_v38  ;;  %v976_v32 = vand.u32 3, %v972_v47  ;;  %v1500_v49 = vsel %vm1490_vm14, nan, %v1499_v5  ;;  %v2943_v9 = vand.u32 3, %v2942_v22 }
 0x1f5   : > { %v979_v18 = vxor.u32 2147483648, %v8577_v17  ;;  %v982_v27 = vxor.u32 2147483648, %v8578_v55  ;;  %v1075_v48 = vsel %vm6984_vm10, 0, %v8579_v37  ;;  %vm8581_vm4 = vcmp.lt.s32.totalorder %v6407_v30, 64 }
 0x1f6   : > { %vm2840_vm2 = vcmp.lt.s32.totalorder %v2839_v61, 2  ;;  %vm2841_vm13 = vcmp.eq.s32.totalorder %v2839_v61, 0  ;;  %vm2844_vm9 = vcmp.eq.s32.totalorder %v2839_v61, 2  ;;  %vm2944_vm5 = vcmp.lt.s32.totalorder %v2943_v9, 2 }
 0x1f7   : > { %v2843_v0 = vsel %vm2841_vm13, %v7438_v36, %v1391_v24  ;;  %v2846_v52 = vsel %vm2844_vm9, %v1394_v35, %v7533_v42  ;;  %vm2945_vm6 = vcmp.eq.s32.totalorder %v2943_v9, 0  ;;  %vm2948_vm1 = vcmp.eq.s32.totalorder %v2943_v9, 2  ;;  %v8582_v42 = vld [vmem:[#allocation6_spill] sm:$0xff] }
 0x1f8   : > { %v2847_v6 = vsel %vm2840_vm2, %v2843_v0, %v2846_v52  ;;  %v2947_v56 = vsel %vm2945_vm6, %v7365_v45, %v1494_v60  ;;  %vm978_vm3 = vcmp.eq.s32.totalorder %v976_v32, 0  ;;  %v2950_v23 = vsel %vm2948_vm1, %v1497_v31, %v7432_v25 }
 0x1f9   : > { %v2848_v44 = vsel %vm1387_vm11, nan, %v2847_v6  ;;  %v980_v34 = vsel %vm978_vm3, %v8578_v55, %v979_v18  ;;  %vm981_vm10 = vcmp.eq.s32.totalorder %v976_v32, 2  ;;  %v2951_v33 = vsel %vm2944_vm5, %v2947_v56, %v2950_v23  ;;  %vm8584_vm11 = vmmov %vm8581_vm4 }
 0x1fa   : > { %v3379_v36 = vsel %vm8581_vm4, %v1397_v26, %v2848_v44  ;;  %vm975_vm13 = vweird.f32 %v8582_v42  ;;  %v983_v24 = vsel %vm981_vm10, %v982_v27, %v8577_v17  ;;  %v2952_v45 = vsel %vm1490_vm14, nan, %v2951_v33 }
 0x1fb   : > { %vm977_vm2 = vcmp.lt.s32.totalorder %v976_v32, 2  ;;  %v1079_v35 = vand.u32 3, %v1075_v48  ;;  %v1082_v60 = vxor.u32 2147483648, %v8583_v53  ;;  %v3380_v25 = vsel %vm8584_vm11, %v1500_v49, %v2952_v45  ;;  %v8588_v45 = vld [vmem:[#allocation23_spill] sm:$0xff] }
 0x1fc   : > { %v984_v7 = vsel %vm977_vm2, %v980_v34, %v983_v24  ;;  %v1085_v31 = vxor.u32 2147483648, %v8585_v13  ;;  %v2422_v10 = vadd.s32 3, %v972_v47  ;;  %v3389_v57 = vpack.c.bf16 %v3380_v25, %v3379_v36 }
 0x1fd   : > { %vm1080_vm9 = vcmp.lt.s32.totalorder %v1079_v35, 2  ;;  %vm1081_vm5 = vcmp.eq.s32.totalorder %v1079_v35, 0  ;;  %vm1084_vm6 = vcmp.eq.s32.totalorder %v1079_v35, 2  ;;  %v7766_v11 = vpop.eup %6157  ;;  %v2526_v22 = vadd.s32 3, %v1075_v48 }
 0x1fe   : > { %v1083_v41 = vsel %vm1081_vm5, %v8585_v13, %v1082_v60  ;;  %v1086_v38 = vsel %vm1084_vm6, %v1085_v31, %v8583_v53  ;;  %v2423_v5 = vand.u32 3, %v2422_v10  ;;  %5528 = vmatmul.mubr.bf16.vlgmr.msra.gmra.mrb[0].mxu1 %v3389_v57  ;;  %v985_v8 = vsel %vm975_vm13, nan, %v984_v7 }
 0x1ff   : > { %vm1078_vm14 = vweird.f32 %v8586_v16  ;;  %v1087_v26 = vsel %vm1080_vm9, %v1083_v41, %v1086_v38  ;;  %v1590_v47 = vsel %vm7456_vm0, 0, %v7494_v59  ;;  %5531 = vmatprep.mubr.msk.bf16.mxu1 %vm8570_vm15, %v6316_v2  ;;  %v1597_v61 = vxor.u32 2147483648, %v7616_v39  ;;  %v8591_v41 = vld [vmem:[#allocation22_spill] sm:$0xff]  ;;  %v8592_v38 = vld [vmem:[#allocation21_spill] sm:$0xff] }
 0x200   : > { %vm2424_vm1 = vcmp.lt.s32.totalorder %v2423_v5, 2  ;;  %vm2425_vm3 = vcmp.eq.s32.totalorder %v2423_v5, 0  ;;  %vm2428_vm10 = vcmp.eq.s32.totalorder %v2423_v5, 2  ;;  %v2527_v9 = vand.u32 3, %v2526_v22 }
 0x201   : > { %v2427_v32 = vsel %vm2425_vm3, %v8578_v55, %v979_v18  ;;  %v2430_v49 = vsel %vm2428_vm10, %v982_v27, %v8577_v17  ;;  %v1594_v37 = vand.u32 3, %v1590_v47  ;;  %v1088_v40 = vsel %vm1078_vm14, nan, %v1087_v26 }
 0x202   : > { %v2431_v48 = vsel %vm2424_vm1, %v2427_v32, %v2430_v49  ;;  %v1600_v51 = vxor.u32 2147483648, %v7604_v12  ;;  %v1693_v59 = vsel %vm7411_vm12, 0, %v7487_v46  ;;  %vm2528_vm0 = vcmp.lt.s32.totalorder %v2527_v9, 2  ;;  %vm8587_vm12 = vmmov %vm8584_vm11 }
 0x203   : > { %v2432_v0 = vsel %vm975_vm13, nan, %v2431_v48  ;;  %vm2529_vm4 = vcmp.eq.s32.totalorder %v2527_v9, 0  ;;  %vm2532_vm2 = vcmp.eq.s32.totalorder %v2527_v9, 2  ;;  %vm1595_vm9 = vcmp.lt.s32.totalorder %v1594_v37, 2 }
 0x204   : > { %v2531_v17 = vsel %vm2529_vm4, %v8585_v13, %v1082_v60  ;;  %v2534_v18 = vsel %vm2532_vm2, %v1085_v31, %v8583_v53  ;;  %v3375_v55 = vsel %vm8584_vm11, %v985_v8, %v2432_v0  ;;  %vm1596_vm5 = vcmp.eq.s32.totalorder %v1594_v37, 0  ;;  %v8589_v13 = vld [vmem:[#allocation29_spill] sm:$0xff] }
 0x205   : > { %v2535_v27 = vsel %vm2528_vm0, %v2531_v17, %v2534_v18  ;;  %vm1599_vm6 = vcmp.eq.s32.totalorder %v1594_v37, 2  ;;  %v1697_v52 = vand.u32 3, %v1693_v59  ;;  %v1598_v46 = vsel %vm1596_vm5, %v7604_v12, %v1597_v61 }
 0x206   : > { %v2536_v15 = vsel %vm1078_vm14, nan, %v2535_v27  ;;  %v1601_v6 = vsel %vm1599_vm6, %v1600_v51, %v7616_v39  ;;  %v1700_v56 = vxor.u32 2147483648, %v7551_v3  ;;  %6159 = vsinq.f32 %v7726_v43 }
 0x207   : > { %v3376_v44 = vsel %vm8587_vm12, %v1088_v40, %v2536_v15  ;;  %v1602_v23 = vsel %vm1595_vm9, %v1598_v46, %v1601_v6  ;;  %vm1699_vm13 = vcmp.eq.s32.totalorder %v1697_v52, 0  ;;  %vm1593_vm1 = vweird.f32 %v7124_v14  ;;  %v8599_v6 = vld [vmem:[#allocation12_spill] sm:$0xff] }
 0x208   : > { %v3387_v34 = vpack.c.bf16 %v3376_v44, %v3375_v55  ;;  %vm1696_vm3 = vweird.f32 %v7050_v29  ;;  %v1701_v33 = vsel %vm1699_vm13, %v7544_v4, %v1700_v56  ;;  %v1703_v36 = vxor.u32 2147483648, %v7544_v4 }
 0x209   : > { %v3046_v42 = vadd.s32 3, %v1590_v47  ;;  %v3150_v24 = vadd.s32 3, %v1693_v59  ;;  %v1178_v43 = vsel %vm7241_vm8, 0, %v8588_v45  ;;  %v1603_v35 = vsel %vm1593_vm1, nan, %v1602_v23  ;;  %v8596_v59 = vld [vmem:[#allocation26_spill] sm:$0xff] }
 0x20a   : > { %5520 = vmatmul.mubr.bf16.gmra.mrb[8].mxu0 %v3387_v34  ;;  %vm1698_vm14 = vcmp.lt.s32.totalorder %v1697_v52, 2  ;;  %vm1702_vm10 = vcmp.eq.s32.totalorder %v1697_v52, 2  ;;  %v1182_v53 = vand.u32 3, %v1178_v43  ;;  %v1185_v31 = vxor.u32 2147483648, %v8589_v13 }
 0x20b   : > { %v1704_v60 = vsel %vm1702_vm10, %v1703_v36, %v7551_v3  ;;  %v3047_v25 = vand.u32 3, %v3046_v42  ;;  %v3151_v7 = vand.u32 3, %v3150_v24  ;;  %5523 = vmatprep.mubr.msk.bf16.mxu0 %vm8570_vm15, %v6316_v2  ;;  %v1188_v57 = vxor.u32 2147483648, %v8590_v28 }
 0x20c   : > { %v1705_v10 = vsel %vm1698_vm14, %v1701_v33, %v1704_v60  ;;  %vm1184_vm0 = vcmp.eq.s32.totalorder %v1182_v53, 0  ;;  %vm8593_vm8 = vnez %v8592_v38  ;;  %vm1187_vm11 = vcmp.eq.s32.totalorder %v1182_v53, 2 }
 0x20d   : > { %v1281_v5 = vsel %vm8593_vm8, 0, %v8591_v41  ;;  %v1706_v22 = vsel %vm1696_vm3, nan, %v1705_v10  ;;  %vm3049_vm4 = vcmp.eq.s32.totalorder %v3047_v25, 0  ;;  %vm3052_vm2 = vcmp.eq.s32.totalorder %v3047_v25, 2 }
 0x20e   : > { %vm3048_vm9 = vcmp.lt.s32.totalorder %v3047_v25, 2  ;;  %v3051_v8 = vsel %vm3049_vm4, %v7604_v12, %v1597_v61  ;;  %v3054_v16 = vsel %vm3052_vm2, %v1600_v51, %v7616_v39  ;;  %vm3153_vm5 = vcmp.eq.s32.totalorder %v3151_v7, 0  ;;  %v8595_v51 = vld [vmem:[#allocation27_spill] sm:$0xff] }
 0x20f   : > { %v3055_v26 = vsel %vm3048_vm9, %v3051_v8, %v3054_v16  ;;  %v3155_v47 = vsel %vm3153_vm5, %v7544_v4, %v1700_v56  ;;  %vm3156_vm6 = vcmp.eq.s32.totalorder %v3151_v7, 2  ;;  %v1186_v32 = vsel %vm1184_vm0, %v8590_v28, %v1185_v31  ;;  %v8600_v56 = vld [vmem:[#allocation7_spill] sm:$0xff] }
 0x210   : > { %v3056_v49 = vsel %vm1593_vm1, nan, %v3055_v26  ;;  %vm3152_vm12 = vcmp.lt.s32.totalorder %v3151_v7, 2  ;;  %v3158_v9 = vsel %vm3156_vm6, %v1703_v36, %v7551_v3  ;;  %v1189_v37 = vsel %vm1187_vm11, %v1188_v57, %v8589_v13  ;;  %v7828_v40 = vpop.eup %6159 }
 0x211   : > { %v3159_v12 = vsel %vm3152_vm12, %v3155_v47, %v3158_v9  ;;  %vm8594_vm13 = vcmp.lt.s32.totalorder %v6407_v30, 64  ;;  %vm1183_vm14 = vcmp.lt.s32.totalorder %v1182_v53, 2  ;;  %v1285_v61 = vand.u32 3, %v1281_v5 }
 0x212   : > { %v3381_v39 = vsel %vm8594_vm13, %v1603_v35, %v3056_v49  ;;  %v3160_v4 = vsel %vm1696_vm3, nan, %v3159_v12  ;;  %v1190_v48 = vsel %vm1183_vm14, %v1186_v32, %v1189_v37  ;;  %v1288_v14 = vxor.u32 2147483648, %v8595_v51  ;;  %vm8597_vm1 = vmmov %vm8594_vm13 }
 0x213   : > { %v1291_v0 = vxor.u32 2147483648, %v8596_v59  ;;  %v3382_v3 = vsel %vm8597_vm1, %v1706_v22, %v3160_v4  ;;  %vm1286_vm10 = vcmp.lt.s32.totalorder %v1285_v61, 2  ;;  %vm1287_vm0 = vcmp.eq.s32.totalorder %v1285_v61, 0 }
 0x214   : > { %vm1290_vm8 = vcmp.eq.s32.totalorder %v1285_v61, 2  ;;  %v3390_v17 = vpack.c.bf16 %v3382_v3, %v3381_v39  ;;  %v1289_v18 = vsel %vm1287_vm0, %v8596_v59, %v1288_v14  ;;  %v2630_v27 = vadd.s32 3, %v1178_v43  ;;  %vm8602_vm0 = vmmov %vm8597_vm1  ;;  %v6061_v3 = vld [vmem:[%s8406_s3 + $0x70] sm:$0xff]  }
 0x215   : > { %v1292_v55 = vsel %vm1290_vm8, %v1291_v0, %v8595_v51  ;;  %vm8598_vm3 = vcmp.lt.s32.totalorder %v7153_v50, 0  ;;  %v2734_v15 = vadd.s32 3, %v1281_v5  ;;  %v1796_v46 = vsel %vm7684_vm7, 0, %v7628_v62 }
 0x216   : > { %v1897_v29 = vsel %vm8598_vm3, %v1896_v1, %v7434_v21  ;;  %v1293_v52 = vsel %vm1286_vm10, %v1289_v18, %v1292_v55  ;;  %5532 = vmatmul.mubr.bf16.gmra.mrb[4].mxu1 %v3390_v17  ;;  %vm1181_vm4 = vweird.f32 %v8599_v6  ;;  %vm1284_vm2 = vweird.f32 %v8600_v56  ;;  %v6062_v17 = vld [vmem:[%s8406_s3 + $0x78] sm:$0xff]   ;;  %v7931_v18 = vld [vmem:[%s8408_s5] ss:$0 sm:$0xff] }
 0x217   : > { %v2631_v44 = vand.u32 3, %v2630_v27  ;;  %v1800_v23 = vand.u32 3, %v1796_v46  ;;  %v1191_v34 = vsel %vm1181_vm4, nan, %v1190_v48  ;;  %v1294_v33 = vsel %vm1284_vm2, nan, %v1293_v52  ;;  %5535 = vmatprep.mubr.msk.bf16.mxu1 %vm8570_vm15, %v6316_v2 }
 0x218   : > { %v2735_v21 = vand.u32 3, %v2734_v15  ;;  %v1803_v1 = vxor.u32 2147483648, %v7828_v40  ;;  %v1806_v62 = vxor.u32 2147483648, %v7766_v11  ;;  %vm8601_vm9 = vnez %v8553_v20 }
 0x219   : > { %vm2633_vm7 = vcmp.eq.s32.totalorder %v2631_v44, 0  ;;  %vm2636_vm11 = vcmp.eq.s32.totalorder %v2631_v44, 2  ;;  %v1899_v63 = vsel %vm8601_vm9, 0, %v1897_v29  ;;  %vm2632_vm5 = vcmp.lt.s32.totalorder %v2631_v44, 2 }
 0x21a   : > { %v2635_v36 = vsel %vm2633_vm7, %v8590_v28, %v1185_v31  ;;  %v2638_v42 = vsel %vm2636_vm11, %v1188_v57, %v8589_v13  ;;  %vm2737_vm6 = vcmp.eq.s32.totalorder %v2735_v21, 0  ;;  %vm2740_vm12 = vcmp.eq.s32.totalorder %v2735_v21, 2 }
 0x21b   : > { %v2639_v24 = vsel %vm2632_vm5, %v2635_v36, %v2638_v42  ;;  %v2739_v45 = vsel %vm2737_vm6, %v8596_v59, %v1288_v14  ;;  %vm1802_vm13 = vcmp.eq.s32.totalorder %v1800_v23, 0  ;;  %vm2736_vm14 = vcmp.lt.s32.totalorder %v2735_v21, 2  ;;  %v6058_v14 = vld [vmem:[%s8406_s3 + $0x58] sm:$0xff]   ;;  %v6059_v59 = vld [vmem:[%s8406_s3 + $0x60] sm:$0xff]  }
 0x21c   : > { %v2640_v43 = vsel %vm1181_vm4, nan, %v2639_v24  ;;  %v2742_v35 = vsel %vm2740_vm12, %v1291_v0, %v8595_v51  ;;  %v1804_v20 = vsel %vm1802_vm13, %v7766_v11, %v1803_v1  ;;  %vm1805_vm10 = vcmp.eq.s32.totalorder %v1800_v23, 2  ;;  %v6060_v0 = vld [vmem:[%s8406_s3 + $0x68] sm:$0xff]  }
 0x21d   : > { %v2743_v53 = vsel %vm2736_vm14, %v2739_v45, %v2742_v35  ;;  %v3377_v60 = vsel %vm8597_vm1, %v1191_v34, %v2640_v43  ;;  %v1903_v25 = vand.u32 3, %v1899_v63  ;;  %v1807_v13 = vsel %vm1805_vm10, %v1806_v62, %v7828_v40  ;;  %vm8603_vm1 = vmmov %vm8602_vm0 }
 0x21e   : > { %v2744_v7 = vsel %vm1284_vm2, nan, %v2743_v53  ;;  %v1906_v31 = vxor.u32 2147483648, %v7692_v19  ;;  %v1909_v10 = vxor.u32 2147483648, %v7676_v58  ;;  %vm1801_vm8 = vcmp.lt.s32.totalorder %v1800_v23, 2  ;;  %vm8604_vm10 = vmmov %vm8602_vm0 }
 0x21f   : > { %v3378_v28 = vsel %vm8602_vm0, %v1294_v33, %v2744_v7  ;;  %vm1905_vm3 = vcmp.eq.s32.totalorder %v1903_v25, 0  ;;  %vm1908_vm4 = vcmp.eq.s32.totalorder %v1903_v25, 2  ;;  %v3254_v41 = vadd.s32 3, %v1796_v46 }
 0x220   : > { %v3388_v57 = vpack.c.bf16 %v3378_v28, %v3377_v60  ;;  %v1808_v38 = vsel %vm1801_vm8, %v1804_v20, %v1807_v13  ;;  %v1907_v5 = vsel %vm1905_vm3, %v7676_v58, %v1906_v31  ;;  %v1910_v22 = vsel %vm1908_vm4, %v1909_v10, %v7692_v19 }
 0x221   : > { %v3358_v8 = vadd.s32 3, %v1899_v63  ;;  %v3255_v16 = vand.u32 3, %v3254_v41  ;;  %vm1799_vm2 = vweird.f32 %v7312_v54  ;;  %vm1904_vm7 = vcmp.lt.s32.totalorder %v1903_v25, 2  ;;  %v6055_v54 = vld [vmem:[%s8406_s3 + $0x40] sm:$0xff]  }
 0x222   : > { %5524 = vmatmul.mubr.bf16.gmra.mrb[12].mxu0 %v3388_v57  ;;  %v1809_v47 = vsel %vm1799_vm2, nan, %v1808_v38  ;;  %v1911_v32 = vsel %vm1904_vm7, %v1907_v5, %v1910_v22  ;;  %vm1902_vm12 = vweird.f32 %v7153_v50  ;;  %5540 = vmatpush3.bf16.msra.mxu1 %v6055_v54 }
 0x223   : > { %v3359_v26 = vand.u32 3, %v3358_v8  ;;  %5673 = vmatprep.mubr.msk.bf16.mxu0 %vm8570_vm15, %v6316_v2  ;;  %vm3257_vm11 = vcmp.eq.s32.totalorder %v3255_v16, 0  ;;  %vm3260_vm9 = vcmp.eq.s32.totalorder %v3255_v16, 2  ;;  %vm3256_vm5 = vcmp.lt.s32.totalorder %v3255_v16, 2  ;;  %5541 = vmatprep.subr.bf16.mxu1 %v6316_v2  ;;  %v6063_v16 = vld [vmem:[%s8406_s3 + $0x140] sm:$0xff]  }
 0x224   : > { %v3259_v49 = vsel %vm3257_vm11, %v7766_v11, %v1803_v1  ;;  %v3262_v9 = vsel %vm3260_vm9, %v1806_v62, %v7828_v40  ;;  %v1912_v39 = vsel %vm1902_vm12, nan, %v1911_v32 }
 0x225   : > { %vm3361_vm6 = vcmp.eq.s32.totalorder %v3359_v26, 0  ;;  %v3263_v37 = vsel %vm3256_vm5, %v3259_v49, %v3262_v9  ;;  %vm3364_vm13 = vcmp.eq.s32.totalorder %v3359_v26, 2  ;;  %vm3360_vm14 = vcmp.lt.s32.totalorder %v3359_v26, 2 }
 0x226   : > { %v3363_v12 = vsel %vm3361_vm6, %v7676_v58, %v1906_v31  ;;  %v3264_v61 = vsel %vm1799_vm2, nan, %v3263_v37  ;;  %v3366_v4 = vsel %vm3364_vm13, %v1909_v10, %v7692_v19  ;;  %v6056_v58 = vld [vmem:[%s8406_s3 + $0x48] sm:$0xff]   ;;  %v6057_v19 = vld [vmem:[%s8406_s3 + $0x50] sm:$0xff]  }
 0x227   : > { %v3367_v48 = vsel %vm3360_vm14, %v3363_v12, %v3366_v4  ;;  %v3383_v11 = vsel %vm8603_vm1, %v1809_v47, %v3264_v61  ;;  %5542 = vmatpush3.bf16.msra.mxu1 %v6056_v58  ;;  %v6064_v61 = vld [vmem:[%s8406_s3 + $0x148] sm:$0xff]  }
 0x228   : > { %v3368_v51 = vsel %vm1902_vm12, nan, %v3367_v48  ;;  %5543 = vmatprep.subr.bf16.mxu1 %v6316_v2 }
 0x229   : > { %v3384_v40 = vsel %vm8604_vm10, %v1912_v39, %v3368_v51 }
 0x22a   : > { %v3391_v50 = vpack.c.bf16 %v3384_v40, %v3383_v11 }
 0x22b   : > { %5544 = vmatpush3.bf16.msra.mxu1 %v6057_v19  ;;  %v6065_v19 = vld [vmem:[%s8406_s3 + $0x150] sm:$0xff]  }
 0x22c   : > { %5536 = vmatmul.mubr.bf16.gmra.mrb[8].mxu1 %v3391_v50  ;;  %5545 = vmatprep.subr.bf16.mxu1 %v6316_v2 }
 0x22d   : > { %5555 = vmatprep.mubr.msk.bf16.mxu1 %vm8570_vm15, %v6316_v2 }
 0x22f   : > { %5546 = vmatpush3.bf16.msra.mxu1 %v6058_v14 }
 0x230   : > { %5547 = vmatprep.subr.bf16.mxu1 %v6316_v2 }
 0x233   : > { %5548 = vmatpush3.bf16.msra.mxu1 %v6059_v59 }
 0x234   : > { %5549 = vmatprep.subr.bf16.mxu1 %v6316_v2 }
 0x237   : > { %5550 = vmatpush3.bf16.msra.mxu1 %v6060_v0  ;;  %v6066_v0 = vld [vmem:[%s8406_s3 + $0x158] sm:$0xff]  }
 0x238   : > { %5551 = vmatprep.subr.bf16.mxu1 %v6316_v2 }
 0x23b   : > { %5552 = vmatpush3.bf16.msra.mxu1 %v6061_v3 }
 0x23c   : > { %5553 = vmatprep.subr.bf16.mxu1 %v6316_v2 }
 0x23f   : > { %5554 = vmatpush3.bf16.msra.mxu1 %v6062_v17 }
 0x240   : > { %5583 = vmatprep.subr.bf16.mxu1 %v6316_v2 }
 0x2ba   : > { %v3494_v55 = vpop.f32.mrb[0].mxu0 }
 0x2bb   : > { %v3495_v27 = vadd.f32 %v7931_v18, %v3494_v55  ;;  %v5513_v29 = vpop.f32.mrb[1].mxu0 }
 0x2bc   : > { %v3497_v52 = vpop.f32.mrb[2].mxu0 }
 0x2bd   : > { %v5216_v15 = vmul.f32 -1.442695, %v3495_v27  ;;  %v3498_v46 = vadd.f32 %v7931_v18, %v3497_v52  ;;  %v5514_v6 = vpop.f32.mrb[3].mxu0 }
 0x2be   : > { %v6067_v6 = vld [vmem:[%s8406_s3 + $0x160] sm:$0xff]  }
 0x2bf   : > { %6161 = vpow2.f32 %v5216_v15  ;;  %v5217_v56 = vmul.f32 -1.442695, %v3498_v46 }
 0x2c1   : > { %6163 = vpow2.f32 %v5217_v56 }
 0x2c5   : > { %v3502_v44 = vpop.f32.mrb[4].mxu0 }
 0x2c6   : > { %v3503_v23 = vadd.f32 %v7931_v18, %v3502_v44  ;;  %v5517_v34 = vpop.f32.mrb[5].mxu0 }
 0x2c7   : > { %v3505_v33 = vpop.f32.mrb[6].mxu0 }
 0x2c8   : > { %v5218_v21 = vmul.f32 -1.442695, %v3503_v23  ;;  %v3506_v1 = vadd.f32 %v7931_v18, %v3505_v33  ;;  %v5518_v62 = vpop.f32.mrb[7].mxu0 }
 0x2c9   : > { %v6162_v36 = vpop.eup %6161 }
 0x2ca   : > { %6165 = vpow2.f32 %v5218_v21  ;;  %v5219_v63 = vmul.f32 -1.442695, %v3506_v1  ;;  %v3591_v42 = vadd.f32 1.0, %v6162_v36  ;;  %v6068_v21 = vld [vmem:[%s8406_s3 + $0x168] sm:$0xff]  }
 0x2cb   : > { %v6164_v24 = vpop.eup %6163 }
 0x2cc   : > { %6167 = vpow2.f32 %v5219_v63  ;;  %v3592_v45 = vadd.f32 1.0, %v6164_v24 }
 0x2cd   : > { %6169 = vrcp.f32 %v3591_v42 }
 0x2ce   : > { %6171 = vrcp.f32 %v3592_v45  ;;  %v6069_v45 = vld [vmem:[%s8406_s3 + $0x170] sm:$0xff]  }
 0x2d1   : > { %v3526_v43 = vpop.f32.mrb[0].mxu1 }
 0x2d2   : > { %v7938_v35 = vadd.f32 %v7931_v18, %v3526_v43  ;;  %v5529_v20 = vpop.f32.mrb[1].mxu1 }
 0x2d3   : > { %v3529_v60 = vpop.f32.mrb[2].mxu1 }
 0x2d4   : > { %v6166_v53 = vpop.eup %6165  ;;  %v5224_v7 = vmul.f32 -1.442695, %v7938_v35  ;;  %v7942_v13 = vadd.f32 %v7931_v18, %v3529_v60  ;;  %v5530_v31 = vpop.f32.mrb[3].mxu1 }
 0x2d5   : > { %v3593_v25 = vadd.f32 1.0, %v6166_v53  ;;  %v6070_v31 = vld [vmem:[%s8406_s3 + $0x178] sm:$0xff]  }
 0x2d6   : > { %v6168_v10 = vpop.eup %6167  ;;  %v5225_v57 = vmul.f32 -1.442695, %v7942_v13 }
 0x2d7   : > { %6173 = vrcp.f32 %v3593_v25  ;;  %v3594_v28 = vadd.f32 1.0, %v6168_v10  ;;  %v6170_v41 = vpop.eup %6169 }
 0x2d8   : > { %6175 = vpow2.f32 %v5224_v7  ;;  %v6172_v38 = vpop.eup %6171  ;;  %v3633_v5 = vmul.f32 %v6170_v41, %v3495_v27 }
 0x2d9   : > { %6177 = vrcp.f32 %v3594_v28  ;;  %v3634_v22 = vmul.f32 %v6172_v38, %v3498_v46 }
 0x2da   : > { %6179 = vpow2.f32 %v5225_v57 }
 0x2db   : > { %v3647_v26 = vpack.c.bf16 %v3634_v22, %v3633_v5 }
 0x2dd   : > { %v3510_v8 = vpop.f32.mrb[8].mxu0  ;;  %5556 = vmatmul.mubr.bf16.vlgmr.msra.gmra.mrb[12].mxu1 %v3647_v26 }
 0x2de   : > { %v7949_v47 = vadd.f32 %v7931_v18, %v3510_v8  ;;  %v5521_v32 = vpop.f32.mrb[9].mxu0  ;;  %5584 = vmatpush3.bf16.msra.mxu1 %v6063_v16  ;;  %5559 = vmatprep.mubr.msk.bf16.mxu1 %vm8570_vm15, %v6316_v2 }
 0x2df   : > { %v3513_v49 = vpop.f32.mrb[10].mxu0  ;;  %5585 = vmatprep.subr.bf16.mxu1 %v6316_v2 }
 0x2e0   : > { %v5220_v9 = vmul.f32 -1.442695, %v7949_v47  ;;  %v7953_v37 = vadd.f32 %v7931_v18, %v3513_v49  ;;  %v5522_v12 = vpop.f32.mrb[11].mxu0 }
 0x2e1   : > { %v6174_v39 = vpop.eup %6173 }
 0x2e2   : > { %v6176_v4 = vpop.eup %6175  ;;  %6181 = vpow2.f32 %v5220_v9  ;;  %v5221_v48 = vmul.f32 -1.442695, %v7953_v37  ;;  %v3635_v50 = vmul.f32 %v6174_v39, %v3503_v23  ;;  %5586 = vmatpush3.bf16.msra.mxu1 %v6064_v61 }
 0x2e3   : > { %v6178_v11 = vpop.eup %6177  ;;  %v3599_v51 = vadd.f32 1.0, %v6176_v4  ;;  %5587 = vmatprep.subr.bf16.mxu1 %v6316_v2 }
 0x2e4   : > { %v6180_v40 = vpop.eup %6179  ;;  %v3636_v54 = vmul.f32 %v6178_v11, %v3506_v1  ;;  %6183 = vpow2.f32 %v5221_v48 }
 0x2e5   : > { %6185 = vrcp.f32 %v3599_v51  ;;  %v3600_v58 = vadd.f32 1.0, %v6180_v40 }
 0x2e6   : > { %v3648_v14 = vpack.c.bf16 %v3636_v54, %v3635_v50  ;;  %5588 = vmatpush3.bf16.msra.mxu1 %v6065_v19 }
 0x2e7   : > { %6187 = vrcp.f32 %v3600_v58  ;;  %5589 = vmatprep.subr.bf16.mxu1 %v6316_v2 }
 0x2e8   : > { %5560 = vmatmul.mubr.bf16.gmra.mrb[16].mxu1 %v3648_v14 }
 0x2e9   : > { %v3534_v59 = vpop.f32.mrb[4].mxu1  ;;  %5563 = vmatprep.mubr.msk.bf16.mxu1 %vm8570_vm15, %v6316_v2 }
 0x2ea   : > { %v7972_v3 = vadd.f32 %v7931_v18, %v3534_v59  ;;  %v5533_v17 = vpop.f32.mrb[5].mxu1  ;;  %5590 = vmatpush3.bf16.msra.mxu1 %v6066_v0 }
 0x2eb   : > { %v3537_v55 = vpop.f32.mrb[6].mxu1  ;;  %5591 = vmatprep.subr.bf16.mxu1 %v6316_v2 }
 0x2ec   : > { %v6182_v27 = vpop.eup %6181  ;;  %v5226_v29 = vmul.f32 -1.442695, %v7972_v3  ;;  %v7977_v52 = vadd.f32 %v7931_v18, %v3537_v55  ;;  %v5534_v15 = vpop.f32.mrb[7].mxu1 }
 0x2ed   : > { %v3595_v46 = vadd.f32 1.0, %v6182_v27 }
 0x2ee   : > { %v6184_v56 = vpop.eup %6183  ;;  %6189 = vpow2.f32 %v5226_v29  ;;  %v5227_v44 = vmul.f32 -1.442695, %v7977_v52  ;;  %5592 = vmatpush3.bf16.msra.mxu1 %v6067_v6  ;;  %v6081_v6 = vld [vmem:[%s8406_s3 + $0x90] sm:$0xff]  }
 0x2ef   : > { %v6186_v23 = vpop.eup %6185  ;;  %6191 = vrcp.f32 %v3595_v46  ;;  %v3596_v34 = vadd.f32 1.0, %v6184_v56  ;;  %5593 = vmatprep.subr.bf16.mxu1 %v6316_v2  ;;  %v6080_v46 = vld [vmem:[%s8406_s3 + $0x88] sm:$0xff]   ;;  %v6082_v56 = vld [vmem:[%s8406_s3 + $0x98] sm:$0xff]  }
 0x2f0   : > { %6193 = vpow2.f32 %v5227_v44  ;;  %v7988_v1 = vmul.f32 %v6186_v23, %v7938_v35  ;;  %v6083_v44 = vld [vmem:[%s8406_s3 + $0xa0] sm:$0xff]   ;;  %v3831_v23 = vpop.permute.xlu1 %3830 }
 0x2f1   : > { %v6188_v33 = vpop.eup %6187  ;;  %6195 = vrcp.f32 %v3596_v34  ;;  %v3828_v34 = vpop.permute.xlu0 %3827  ;;  %vm3869_vm0 = vcmp.eq.s32.totalorder %v3831_v23, %v6407_v30 }
 0x2f2   : > { %v7991_v62 = vmul.f32 %v6188_v33, %v7942_v13  ;;  %5594 = vmatpush3.bf16.msra.mxu1 %v6068_v21  ;;  %v6084_v33 = vld [vmem:[%s8406_s3 + $0xa8] sm:$0xff]   ;;  %vm3868_vm8 = vcmp.eq.s32.totalorder %v3828_v34, %v6407_v30  ;;  %v6071_v21 = vld [vmem:[%s8407_s4] sm:$0xff]  }
 0x2f3   : > { %5595 = vmatprep.subr.bf16.mxu1 %v6316_v2  ;;  %vm5279_vm3 = vmpackc.low %vm3869_vm0, %vm3868_vm8 }
 0x2f4   : > { %v3651_v36 = vpack.c.bf16 %v7991_v62, %v7988_v1  ;;  %v6085_v1 = vld [vmem:[%s8406_s3 + $0xb0] sm:$0xff]   ;;  %v6318_v62 = vmov 1.0|1.0  }
 0x2f5   : > { %v3518_v63 = vpop.f32.mrb[12].mxu0 }
 0x2f6   : > { %v3519_v42 = vadd.f32 %v7931_v18, %v3518_v63  ;;  %v5525_v24 = vpop.f32.mrb[13].mxu0  ;;  %5596 = vmatpush3.bf16.msra.mxu1 %v6069_v45  ;;  %v3837_v63 = vpop.permute.xlu1 %3836 }
 0x2f7   : > { %v3521_v43 = vpop.f32.mrb[14].mxu0  ;;  %5597 = vmatprep.subr.bf16.mxu1 %v6316_v2  ;;  %vm3871_vm4 = vcmp.eq.s32.totalorder %v3837_v63, %v6407_v30 }
 0x2f8   : > { %v5222_v35 = vmul.f32 -1.442695, %v3519_v42  ;;  %v3522_v20 = vadd.f32 %v7931_v18, %v3521_v43  ;;  %v5526_v53 = vpop.f32.mrb[15].mxu0  ;;  %v6190_v60 = vpop.eup %6189 }
 0x2f9   : > { %v6192_v25 = vpop.eup %6191  ;;  %v3601_v7 = vadd.f32 1.0, %v6190_v60 }
 0x2fa   : > { %6197 = vpow2.f32 %v5222_v35  ;;  %v5223_v13 = vmul.f32 -1.442695, %v3522_v20  ;;  %v6194_v10 = vpop.eup %6193  ;;  %v3637_v41 = vmul.f32 %v6192_v25, %v7949_v47  ;;  %5598 = vmatpush3.bf16.msra.mxu1 %v6070_v31  ;;  %v6073_v31 = vld [vmem:[%s6400_s15 + $0x8] sm:$0xff]  }
 0x2fb   : > { %v6196_v28 = vpop.eup %6195  ;;  %6199 = vrcp.f32 %v3601_v7  ;;  %v3602_v57 = vadd.f32 1.0, %v6194_v10  ;;  %5627 = vmatprep.subr.bf16.mxu1 %v6316_v2  ;;  %v6075_v10 = vld [vmem:[%s6400_s15 + $0x18] sm:$0xff]  }
 0x2fc   : > { %v3638_v38 = vmul.f32 %v6196_v28, %v7953_v37  ;;  %6201 = vpow2.f32 %v5223_v13  ;;  %v6072_v13 = vld [vmem:[%s6400_s15] sm:$0xff]  }
 0x2fd   : > { %6203 = vrcp.f32 %v3602_v57  ;;  %v6076_v28 = vld [vmem:[%s6400_s15 + $0x20] sm:$0xff]   ;;  %v6077_v57 = vld [vmem:[%s6400_s15 + $0x28] sm:$0xff]  }
 0x2fe   : > { %v3649_v5 = vpack.c.bf16 %v3638_v38, %v3637_v41  ;;  %v6078_v41 = vld [vmem:[%s6400_s15 + $0x30] sm:$0xff]   ;;  %v6086_v38 = vld [vmem:[%s8406_s3 + $0xb8] sm:$0xff]  }
 0x2ff   : > { %v3542_v22 = vpop.f32.mrb[8].mxu1 }
 0x300   : > { %v3543_v8 = vadd.f32 %v7931_v18, %v3542_v22  ;;  %v5537_v16 = vpop.f32.mrb[9].mxu1  ;;  %5564 = vmatmul.mubr.bf16.gmra.mrb[20].mxu1 %v3649_v5  ;;  %v5246_v5 = vld [vmem:[%s8408_s5 + $0x1] ss:$0 sm:$0xff]  ;;  %v5293_v22 = vld [vmem:[%s8408_s5 + $0x2] ss:$0 sm:$0xff] }
 0x301   : > { %v3545_v26 = vpop.f32.mrb[10].mxu1  ;;  %5567 = vmatprep.mubr.msk.bf16.mxu1 %vm8570_vm15, %v6316_v2 }
 0x302   : > { %v5228_v32 = vmul.f32 -1.442695, %v3543_v8  ;;  %v3546_v47 = vadd.f32 %v7931_v18, %v3545_v26  ;;  %v5538_v49 = vpop.f32.mrb[11].mxu1 }
 0x304   : > { %v6198_v9 = vpop.eup %6197  ;;  %6205 = vpow2.f32 %v5228_v32  ;;  %v5229_v12 = vmul.f32 -1.442695, %v3546_v47 }
 0x305   : > { %v3597_v37 = vadd.f32 1.0, %v6198_v9  ;;  %v6200_v39 = vpop.eup %6199 }
 0x306   : > { %v6202_v61 = vpop.eup %6201  ;;  %v3643_v11 = vmul.f32 %v6200_v39, %v7972_v3 }
 0x307   : > { %6207 = vrcp.f32 %v3597_v37  ;;  %v6204_v4 = vpop.eup %6203  ;;  %v3598_v48 = vadd.f32 1.0, %v6202_v61  ;;  %v6087_v37 = vld [vmem:[%s8406_s3 + $0xc0] sm:$0xff]   ;;  %v6088_v61 = vld [vmem:[%s8406_s3 + $0xc8] sm:$0xff]  }
 0x308   : > { %6209 = vpow2.f32 %v5229_v12  ;;  %v3644_v51 = vmul.f32 %v6204_v4, %v7977_v52  ;;  %v6079_v52 = vld [vmem:[%s8406_s3 + $0x80] sm:$0xff]  }
 0x309   : > { %6211 = vrcp.f32 %v3598_v48  ;;  %5658 = vmatpush3.bf16.msra.mxu0 %v6079_v52 }
 0x30a   : > { %v3652_v40 = vpack.c.bf16 %v3644_v51, %v3643_v11  ;;  %5659 = vmatprep.subr.bf16.mxu0 %v6316_v2 }
 0x30d   : > { %5660 = vmatpush3.bf16.msra.mxu0 %v6080_v46 }
 0x30e   : > { %v6206_v50 = vpop.eup %6205  ;;  %5661 = vmatprep.subr.bf16.mxu0 %v6316_v2 }
 0x30f   : > { %v3603_v54 = vadd.f32 1.0, %v6206_v50  ;;  %v6089_v50 = vld [vmem:[%s8406_s3 + $0xd0] sm:$0xff]  }
 0x311   : > { %v6208_v18 = vpop.eup %6207  ;;  %6213 = vrcp.f32 %v3603_v54  ;;  %5662 = vmatpush3.bf16.msra.mxu0 %v6081_v6 }
 0x312   : > { %v6210_v58 = vpop.eup %6209  ;;  %v3639_v59 = vmul.f32 %v6208_v18, %v3519_v42  ;;  %5663 = vmatprep.subr.bf16.mxu0 %v6316_v2  ;;  %v3843_v42 = vpop.permute.xlu1 %3842 }
 0x313   : > { %v3604_v19 = vadd.f32 1.0, %v6210_v58  ;;  %v6212_v14 = vpop.eup %6211  ;;  %vm3873_vm11 = vcmp.eq.s32.totalorder %v3843_v42, %v6407_v30  ;;  %v6090_v58 = vld [vmem:[%s8406_s3 + $0xd8] sm:$0xff]  }
 0x314   : > { %v3640_v0 = vmul.f32 %v6212_v14, %v3522_v20 }
 0x315   : > { %6215 = vrcp.f32 %v3604_v19  ;;  %5664 = vmatpush3.bf16.msra.mxu0 %v6082_v56 }
 0x316   : > { %v3650_v17 = vpack.c.bf16 %v3640_v0, %v3639_v59  ;;  %5665 = vmatprep.subr.bf16.mxu0 %v6316_v2  ;;  %v3849_v45 = vpop.permute.xlu1 %3848 }
 0x317   : > { %vm3875_vm6 = vcmp.eq.s32.totalorder %v3849_v45, %v6407_v30 }
 0x318   : > { %5568 = vmatmul.mubr.bf16.gmra.mrb[24].mxu1 %v3650_v17 }
 0x319   : > { %5571 = vmatprep.mubr.msk.bf16.mxu1 %vm8570_vm15, %v6316_v2  ;;  %5666 = vmatpush3.bf16.msra.mxu0 %v6083_v44  ;;  %v6093_v44 = vld [vmem:[%s8406_s3 + $0xf0] sm:$0xff]  }
 0x31a   : > { %5667 = vmatprep.subr.bf16.mxu0 %v6316_v2  ;;  %v3855_v35 = vpop.permute.xlu1 %3854 }
 0x31b   : > { %v6214_v3 = vpop.eup %6213  ;;  %vm3877_vm14 = vcmp.eq.s32.totalorder %v3855_v35, %v6407_v30 }
 0x31c   : > { %v3645_v27 = vmul.f32 %v6214_v3, %v3543_v8  ;;  %v8121_v8 = vadd.f32 %v5293_v22, %v5246_v5  ;;  %v6091_v3 = vld [vmem:[%s8406_s3 + $0xe0] sm:$0xff]  }
 0x31d   : > { %5668 = vmatpush3.bf16.msra.mxu0 %v6084_v33 }
 0x31e   : > { %5669 = vmatprep.subr.bf16.mxu0 %v6316_v2  ;;  %v3861_v53 = vpop.permute.xlu1 %3860 }
 0x31f   : > { %v6216_v55 = vpop.eup %6215  ;;  %vm3879_vm0 = vcmp.eq.s32.totalorder %v3861_v53, %v6407_v30 }
 0x320   : > { %v3646_v29 = vmul.f32 %v6216_v55, %v3546_v47  ;;  %5572 = vmatmul.mubr.bf16.gmra.mrb[28].mxu1 %v3651_v36  ;;  %v3834_v36 = vpop.permute.xlu0 %3833 }
 0x321   : > { %5575 = vmatprep.mubr.msk.bf16.mxu1 %vm8570_vm15, %v6316_v2  ;;  %5670 = vmatpush3.bf16.msra.mxu0 %v6085_v1  ;;  %vm3870_vm2 = vcmp.eq.s32.totalorder %v3834_v36, %v6407_v30 }
 0x322   : > { %v3653_v15 = vpack.c.bf16 %v3646_v29, %v3645_v27  ;;  %5671 = vmatprep.subr.bf16.mxu0 %v6316_v2  ;;  %vm5281_vm7 = vmpackc.low %vm3871_vm4, %vm3870_vm2  ;;  %v3867_v25 = vpop.permute.xlu1 %3866  ;;  %v6092_v29 = vld [vmem:[%s8406_s3 + $0xe8] sm:$0xff]  }
 0x323   : > { %vm3881_vm4 = vcmp.eq.s32.totalorder %v3867_v25, %v6407_v30 }
 0x324   : > { %v3840_v24 = vpop.permute.xlu0 %3839 }
 0x325   : > { %vm3872_vm9 = vcmp.eq.s32.totalorder %v3840_v24, %v6407_v30  ;;  %5672 = vmatpush3.bf16.msra.mxu0 %v6086_v38 }
 0x326   : > { %vm5283_vm5 = vmpackc.low %vm3873_vm11, %vm3872_vm9  ;;  %vm4132_vm11 = vcmask 130048   ;;  %5701 = vmatprep.subr.bf16.mxu0 %v6316_v2 }
 0x328   : > { %5576 = vmatmul.mubr.bf16.gmra.mrb[32].mxu1 %v3652_v40  ;;  %v3846_v43 = vpop.permute.xlu0 %3845 }
 0x329   : > { %5579 = vmatprep.mubr.msk.bf16.mxu1 %vm8570_vm15, %v6316_v2  ;;  %vm3874_vm12 = vcmp.eq.s32.totalorder %v3846_v43, %v6407_v30 }
 0x32a   : > { %vm5285_vm13 = vmpackc.low %vm3875_vm6, %vm3874_vm12 }
 0x32c   : > { %v3852_v20 = vpop.permute.xlu0 %3851 }
 0x32d   : > { %vm3876_vm1 = vcmp.eq.s32.totalorder %v3852_v20, %v6407_v30 }
 0x32e   : > { %vm5287_vm10 = vmpackc.low %vm3877_vm14, %vm3876_vm1 }
 0x330   : > { %5580 = vmatmul.mubr.bf16.gmra.mrb[36].mxu1 %v3653_v15  ;;  %v3858_v60 = vpop.permute.xlu0 %3857 }
 0x331   : > { %5599 = vmatprep.mubr.msk.bf16.mxu1 %vm8570_vm15, %v6316_v2  ;;  %vm3878_vm8 = vcmp.eq.s32.totalorder %v3858_v60, %v6407_v30 }
 0x334   : > { %v3864_v7 = vpop.permute.xlu0 %3863 }
 0x335   : > { %vm3880_vm2 = vcmp.eq.s32.totalorder %v3864_v7, %v6407_v30  ;;  %v6074_v30 = vld [vmem:[%s6400_s15 + $0x10] sm:$0xff]  }
 0x338   : > { %5600 = vmatmul.mubr.msk.bf16.vlgmr.msra.gmra.mrb[12].mxu1 %vm5279_vm3, %v6318_v62  ;;  %vm5289_vm3 = vmpackc.low %vm3879_vm0, %vm3878_vm8 }
 0x339   : > { %5628 = vmatpush3.bf16.msra.mxu1 %v6071_v21  ;;  %5603 = vmatprep.mubr.msk.bf16.mxu1 %vm8570_vm15, %v6316_v2 }
 0x340   : > { %5604 = vmatmul.mubr.msk.bf16.gmra.mrb[16].mxu1 %vm5281_vm7, %v6318_v62  ;;  %vm5291_vm7 = vmpackc.low %vm3881_vm4, %vm3880_vm2 }
 0x341   : > { %5607 = vmatprep.mubr.msk.bf16.mxu1 %vm8570_vm15, %v6316_v2 }
 0x348   : > { %5608 = vmatmul.mubr.msk.bf16.gmra.mrb[20].mxu1 %vm5283_vm5, %v6318_v62 }
 0x349   : > { %5611 = vmatprep.mubr.msk.bf16.mxu1 %vm8570_vm15, %v6316_v2 }
 0x350   : > { %5612 = vmatmul.mubr.msk.bf16.gmra.mrb[24].mxu1 %vm5285_vm13, %v6318_v62 }
 0x351   : > { %5615 = vmatprep.mubr.msk.bf16.mxu1 %vm8570_vm15, %v6316_v2 }
 0x358   : > { %5616 = vmatmul.mubr.msk.bf16.gmra.mrb[28].mxu1 %vm5287_vm10, %v6318_v62 }
 0x359   : > { %5619 = vmatprep.mubr.msk.bf16.mxu1 %vm8570_vm15, %v6316_v2 }
 0x360   : > { %5620 = vmatmul.mubr.msk.bf16.gmra.mrb[32].mxu1 %vm5289_vm3, %v6318_v62 }
 0x361   : > { %5623 = vmatprep.mubr.msk.bf16.mxu1 %vm8570_vm15, %v6316_v2 }
 0x368   : > { %5624 = vmatmul.mubr.msk.bf16.gmra.mrb[36].mxu1 %vm5291_vm7, %v6318_v62 }
 0x369   : > { %5629 = vmatprep.mubr.msk.bf16.mxu1 %vm8570_vm15, %v6316_v2 }
 0x370   : > { %5630 = vmatmul.mubr.msk.bf16.vlgmr.msra.gmra.mrb[12].mxu1 %vm4132_vm11, %v6072_v13 }
 0x371   : > { %5633 = vmatprep.mubr.msk.bf16.mxu1 %vm8570_vm15, %v6316_v2 }
 0x378   : > { %5634 = vmatmul.mubr.msk.bf16.gmra.mrb[16].mxu1 %vm4132_vm11, %v6073_v31 }
 0x379   : > { %5637 = vmatprep.mubr.msk.bf16.mxu1 %vm8570_vm15, %v6316_v2 }
 0x380   : > { %5638 = vmatmul.mubr.msk.bf16.gmra.mrb[20].mxu1 %vm4132_vm11, %v6074_v30 }
 0x381   : > { %5641 = vmatprep.mubr.msk.bf16.mxu1 %vm8570_vm15, %v6316_v2 }
 0x388   : > { %5642 = vmatmul.mubr.msk.bf16.gmra.mrb[24].mxu1 %vm4132_vm11, %v6075_v10 }
 0x389   : > { %5645 = vmatprep.mubr.msk.bf16.mxu1 %vm8570_vm15, %v6316_v2 }
 0x390   : > { %5646 = vmatmul.mubr.msk.bf16.gmra.mrb[28].mxu1 %vm4132_vm11, %v6076_v28  ;;  %v6094_v28 = vld [vmem:[%s8406_s3 + $0xf8] sm:$0xff]  }
 0x391   : > { %5649 = vmatprep.mubr.msk.bf16.mxu1 %vm8570_vm15, %v6316_v2 }
 0x398   : > { %5650 = vmatmul.mubr.msk.bf16.gmra.mrb[32].mxu1 %vm4132_vm11, %v6077_v57  ;;  %v8186_v57 = vld [vmem:[%s8408_s5 + $0x3] ss:$0 sm:$0xff] }
 0x399   : > { %5653 = vmatprep.mubr.msk.bf16.mxu1 %vm8570_vm15, %v6316_v2 }
 0x3a0   : > { %5654 = vmatmul.mubr.msk.bf16.gmra.mrb[36].mxu1 %vm4132_vm11, %v6078_v41 }
 0x443   : > { %v4188_v16 = vpop.f32.mrb[12].mxu1 }
 0x444   : > { %v5631_v26 = vpop.f32.mrb[13].mxu1  ;;  %v5806_v47 = vadd.f32 %v8121_v8, %v4188_v16 }
 0x445   : > { %v4191_v32 = vpop.f32.mrb[14].mxu1 }
 0x446   : > { %v5808_v49 = vadd.f32 %v8121_v8, %v4191_v32  ;;  %v5632_v9 = vpop.f32.mrb[15].mxu1 }
 0x448   : > { %v4257_v12 = vpack.c.bf16 %v5808_v49, %v5806_v47  ;;  %v6095_v47 = vld [vmem:[%s8406_s3 + $0x100] sm:$0xff]  }
 0x44a   : > { %5674 = vmatmul.mubr.bf16.vlgmr.msra.gmra.mrb[16].mxu0 %v4257_v12 }
 0x44b   : > { %v4196_v39 = vpop.f32.mrb[16].mxu1  ;;  %5677 = vmatprep.mubr.msk.bf16.mxu0 %vm8570_vm15, %v6316_v2  ;;  %5702 = vmatpush3.bf16.msra.mxu0 %v6087_v37 }
 0x44c   : > { %v5635_v4 = vpop.f32.mrb[17].mxu1  ;;  %5703 = vmatprep.subr.bf16.mxu0 %v6316_v2  ;;  %v5810_v11 = vadd.f32 %v8121_v8, %v4196_v39 }
 0x44d   : > { %v4199_v48 = vpop.f32.mrb[18].mxu1 }
 0x44e   : > { %v5812_v51 = vadd.f32 %v8121_v8, %v4199_v48  ;;  %v5636_v40 = vpop.f32.mrb[19].mxu1 }
 0x44f   : > { %5704 = vmatpush3.bf16.msra.mxu0 %v6088_v61  ;;  %v6096_v61 = vld [vmem:[%s8406_s3 + $0x108] sm:$0xff]   ;;  %v6097_v40 = vld [vmem:[%s8406_s3 + $0x110] sm:$0xff]  }
 0x450   : > { %v4258_v54 = vpack.c.bf16 %v5812_v51, %v5810_v11  ;;  %5705 = vmatprep.subr.bf16.mxu0 %v6316_v2 }
 0x452   : > { %5678 = vmatmul.mubr.bf16.gmra.mrb[20].mxu0 %v4258_v54 }
 0x453   : > { %v4204_v18 = vpop.f32.mrb[20].mxu1  ;;  %5681 = vmatprep.mubr.msk.bf16.mxu0 %vm8570_vm15, %v6316_v2  ;;  %5706 = vmatpush3.bf16.msra.mxu0 %v6089_v50 }
 0x454   : > { %v5639_v19 = vpop.f32.mrb[21].mxu1  ;;  %5707 = vmatprep.subr.bf16.mxu0 %v6316_v2  ;;  %v5814_v59 = vadd.f32 %v8121_v8, %v4204_v18 }
 0x455   : > { %v4207_v14 = vpop.f32.mrb[22].mxu1 }
 0x456   : > { %v5816_v0 = vadd.f32 %v8121_v8, %v4207_v14  ;;  %v5640_v17 = vpop.f32.mrb[23].mxu1  ;;  %v6098_v14 = vld [vmem:[%s8406_s3 + $0x118] sm:$0xff]  }
 0x457   : > { %5708 = vmatpush3.bf16.msra.mxu0 %v6090_v58 }
 0x458   : > { %v4259_v55 = vpack.c.bf16 %v5816_v0, %v5814_v59  ;;  %5709 = vmatprep.subr.bf16.mxu0 %v6316_v2 }
 0x45a   : > { %5682 = vmatmul.mubr.bf16.gmra.mrb[24].mxu0 %v4259_v55  ;;  %v6099_v55 = vld [vmem:[%s8406_s3 + $0x120] sm:$0xff]  }
 0x45b   : > { %v4212_v27 = vpop.f32.mrb[24].mxu1  ;;  %5685 = vmatprep.mubr.msk.bf16.mxu0 %vm8570_vm15, %v6316_v2  ;;  %5710 = vmatpush3.bf16.msra.mxu0 %v6091_v3 }
 0x45c   : > { %v5643_v52 = vpop.f32.mrb[25].mxu1  ;;  %5711 = vmatprep.subr.bf16.mxu0 %v6316_v2  ;;  %v5818_v46 = vadd.f32 %v8121_v8, %v4212_v27 }
 0x45d   : > { %v4215_v15 = vpop.f32.mrb[26].mxu1 }
 0x45e   : > { %v5820_v6 = vadd.f32 %v8121_v8, %v4215_v15  ;;  %v5644_v56 = vpop.f32.mrb[27].mxu1 }
 0x45f   : > { %5712 = vmatpush3.bf16.msra.mxu0 %v6092_v29 }
 0x460   : > { %v4260_v23 = vpack.c.bf16 %v5820_v6, %v5818_v46  ;;  %5713 = vmatprep.subr.bf16.mxu0 %v6316_v2  ;;  %v6100_v6 = vld [vmem:[%s8406_s3 + $0x128] sm:$0xff]  }
 0x462   : > { %5686 = vmatmul.mubr.bf16.gmra.mrb[28].mxu0 %v4260_v23 }
 0x463   : > { %v4220_v34 = vpop.f32.mrb[28].mxu1  ;;  %5689 = vmatprep.mubr.msk.bf16.mxu0 %vm8570_vm15, %v6316_v2  ;;  %5714 = vmatpush3.bf16.msra.mxu0 %v6093_v44 }
 0x464   : > { %v5647_v33 = vpop.f32.mrb[29].mxu1  ;;  %5715 = vmatprep.subr.bf16.mxu0 %v6316_v2  ;;  %v5822_v1 = vadd.f32 %v8121_v8, %v4220_v34 }
 0x465   : > { %v4223_v21 = vpop.f32.mrb[30].mxu1  ;;  %v6101_v33 = vld [vmem:[%s8406_s3 + $0x130] sm:$0xff]  }
 0x466   : > { %v5824_v62 = vadd.f32 %v8121_v8, %v4223_v21  ;;  %v5648_v63 = vpop.f32.mrb[31].mxu1 }
 0x467   : > { %5716 = vmatpush3.bf16.msra.mxu0 %v6094_v28 }
 0x468   : > { %v4261_v36 = vpack.c.bf16 %v5824_v62, %v5822_v1  ;;  %5745 = vmatprep.subr.bf16.mxu0 %v6316_v2 }
 0x46a   : > { %5690 = vmatmul.mubr.bf16.gmra.mrb[32].mxu0 %v4261_v36 }
 0x46b   : > { %v4228_v42 = vpop.f32.mrb[32].mxu1  ;;  %5693 = vmatprep.mubr.msk.bf16.mxu0 %vm8570_vm15, %v6316_v2 }
 0x46c   : > { %v5651_v24 = vpop.f32.mrb[33].mxu1  ;;  %v5826_v43 = vadd.f32 %v8121_v8, %v4228_v42 }
 0x46d   : > { %v4231_v45 = vpop.f32.mrb[34].mxu1 }
 0x46e   : > { %v5828_v35 = vadd.f32 %v8121_v8, %v4231_v45  ;;  %v5652_v20 = vpop.f32.mrb[35].mxu1 }
 0x470   : > { %v4262_v53 = vpack.c.bf16 %v5828_v35, %v5826_v43 }
 0x472   : > { %5694 = vmatmul.mubr.bf16.gmra.mrb[36].mxu0 %v4262_v53 }
 0x473   : > { %v4236_v60 = vpop.f32.mrb[36].mxu1  ;;  %5697 = vmatprep.mubr.msk.bf16.mxu0 %vm8570_vm15, %v6316_v2 }
 0x474   : > { %v5655_v25 = vpop.f32.mrb[37].mxu1  ;;  %v5830_v13 = vadd.f32 %v8121_v8, %v4236_v60 }
 0x475   : > { %v4239_v7 = vpop.f32.mrb[38].mxu1 }
 0x476   : > { %v5832_v31 = vadd.f32 %v8121_v8, %v4239_v7  ;;  %v5656_v30 = vpop.f32.mrb[39].mxu1 }
 0x478   : > { %v4263_v10 = vpack.c.bf16 %v5832_v31, %v5830_v13 }
 0x47a   : > { %5698 = vmatmul.mubr.bf16.gmra.mrb[40].mxu0 %v4263_v10 }
 0x47b   : > { %5717 = vmatprep.mubr.msk.bf16.mxu0 %vm8570_vm15, %v6316_v2 }
 0x51d   : > { %v4367_v41 = vpop.f32.mrb[16].mxu0 }
 0x51e   : > { %v4368_v38 = vadd.f32 %v8186_v57, %v4367_v41  ;;  %v5675_v5 = vpop.f32.mrb[17].mxu0 }
 0x51f   : > { %v4370_v22 = vpop.f32.mrb[18].mxu0 }
 0x520   : > { %v4371_v8 = vadd.f32 %v8186_v57, %v4370_v22  ;;  %v5676_v16 = vpop.f32.mrb[19].mxu0  ;;  %v4422_v26 = vmax.f32 %v4368_v38, 0.0 }
 0x522   : > { %v4423_v32 = vmax.f32 %v4371_v8, 0.0 }
 0x524   : > { %v4436_v49 = vpack.c.bf16 %v4423_v32, %v4422_v26 }
 0x525   : > { %v4375_v9 = vpop.f32.mrb[20].mxu0 }
 0x526   : > { %v4376_v37 = vadd.f32 %v8186_v57, %v4375_v9  ;;  %v5679_v12 = vpop.f32.mrb[21].mxu0  ;;  %5718 = vmatmul.mubr.bf16.vlgmr.msra.gmra.mrb[44].mxu0 %v4436_v49  ;;  %v8250_v49 = vld [vmem:[%s8408_s5 + $0x4] ss:$0 sm:$0xff] }
 0x527   : > { %v4378_v39 = vpop.f32.mrb[22].mxu0  ;;  %5721 = vmatprep.mubr.msk.bf16.mxu0 %vm8570_vm15, %v6316_v2  ;;  %5746 = vmatpush3.bf16.msra.mxu0 %v6095_v47  ;;  %v6102_v47 = vld [vmem:[%s8406_s3 + $0x138] sm:$0xff]  }
 0x528   : > { %v4379_v4 = vadd.f32 %v8186_v57, %v4378_v39  ;;  %v5680_v48 = vpop.f32.mrb[23].mxu0  ;;  %5747 = vmatprep.subr.bf16.mxu0 %v6316_v2  ;;  %v4424_v11 = vmax.f32 %v4376_v37, 0.0 }
 0x52a   : > { %v4425_v51 = vmax.f32 %v4379_v4, 0.0 }
 0x52b   : > { %5748 = vmatpush3.bf16.msra.mxu0 %v6096_v61 }
 0x52c   : > { %v4437_v50 = vpack.c.bf16 %v4425_v51, %v4424_v11  ;;  %5749 = vmatprep.subr.bf16.mxu0 %v6316_v2 }
 0x52d   : > { %v4383_v54 = vpop.f32.mrb[24].mxu0 }
 0x52e   : > { %v4384_v18 = vadd.f32 %v8186_v57, %v4383_v54  ;;  %v5683_v58 = vpop.f32.mrb[25].mxu0  ;;  %5722 = vmatmul.mubr.bf16.gmra.mrb[48].mxu0 %v4437_v50 }
 0x52f   : > { %v4386_v19 = vpop.f32.mrb[26].mxu0  ;;  %5725 = vmatprep.mubr.msk.bf16.mxu0 %vm8570_vm15, %v6316_v2  ;;  %5750 = vmatpush3.bf16.msra.mxu0 %v6097_v40 }
 0x530   : > { %v4387_v59 = vadd.f32 %v8186_v57, %v4386_v19  ;;  %v5684_v0 = vpop.f32.mrb[27].mxu0  ;;  %5751 = vmatprep.subr.bf16.mxu0 %v6316_v2  ;;  %v4426_v17 = vmax.f32 %v4384_v18, 0.0 }
 0x532   : > { %v4427_v3 = vmax.f32 %v4387_v59, 0.0 }
 0x533   : > { %5752 = vmatpush3.bf16.msra.mxu0 %v6098_v14 }
 0x534   : > { %v4438_v27 = vpack.c.bf16 %v4427_v3, %v4426_v17  ;;  %5753 = vmatprep.subr.bf16.mxu0 %v6316_v2 }
 0x535   : > { %v4391_v29 = vpop.f32.mrb[28].mxu0 }
 0x536   : > { %v4392_v52 = vadd.f32 %v8186_v57, %v4391_v29  ;;  %v5687_v15 = vpop.f32.mrb[29].mxu0  ;;  %5726 = vmatmul.mubr.bf16.gmra.mrb[52].mxu0 %v4438_v27 }
 0x537   : > { %v4394_v46 = vpop.f32.mrb[30].mxu0  ;;  %5729 = vmatprep.mubr.msk.bf16.mxu0 %vm8570_vm15, %v6316_v2  ;;  %5754 = vmatpush3.bf16.msra.mxu0 %v6099_v55 }
 0x538   : > { %v4395_v56 = vadd.f32 %v8186_v57, %v4394_v46  ;;  %v5688_v44 = vpop.f32.mrb[31].mxu0  ;;  %5755 = vmatprep.subr.bf16.mxu0 %v6316_v2  ;;  %v4428_v23 = vmax.f32 %v4392_v52, 0.0 }
 0x53a   : > { %v4429_v34 = vmax.f32 %v4395_v56, 0.0 }
 0x53b   : > { %5756 = vmatpush3.bf16.msra.mxu0 %v6100_v6 }
 0x53c   : > { %v4439_v21 = vpack.c.bf16 %v4429_v34, %v4428_v23  ;;  %5757 = vmatprep.subr.bf16.mxu0 %v6316_v2 }
 0x53d   : > { %v4399_v1 = vpop.f32.mrb[32].mxu0 }
 0x53e   : > { %v4400_v62 = vadd.f32 %v8186_v57, %v4399_v1  ;;  %v5691_v63 = vpop.f32.mrb[33].mxu0  ;;  %5730 = vmatmul.mubr.bf16.gmra.mrb[56].mxu0 %v4439_v21 }
 0x53f   : > { %v4402_v36 = vpop.f32.mrb[34].mxu0  ;;  %5733 = vmatprep.mubr.msk.bf16.mxu0 %vm8570_vm15, %v6316_v2  ;;  %5758 = vmatpush3.bf16.msra.mxu0 %v6101_v33 }
 0x540   : > { %v4403_v42 = vadd.f32 %v8186_v57, %v4402_v36  ;;  %v5692_v24 = vpop.f32.mrb[35].mxu0  ;;  %5759 = vmatprep.subr.bf16.mxu0 %v6316_v2  ;;  %v4430_v45 = vmax.f32 %v4400_v62, 0.0 }
 0x542   : > { %v4431_v43 = vmax.f32 %v4403_v42, 0.0 }
 0x543   : > { %5760 = vmatpush3.bf16.msra.mxu0 %v6102_v47 }
 0x544   : > { %v4440_v35 = vpack.c.bf16 %v4431_v43, %v4430_v45 }
 0x545   : > { %v4407_v20 = vpop.f32.mrb[36].mxu0 }
 0x546   : > { %v4408_v53 = vadd.f32 %v8186_v57, %v4407_v20  ;;  %v5695_v60 = vpop.f32.mrb[37].mxu0  ;;  %5734 = vmatmul.mubr.bf16.gmra.mrb[60].mxu0 %v4440_v35 }
 0x547   : > { %v4410_v25 = vpop.f32.mrb[38].mxu0  ;;  %5737 = vmatprep.mubr.msk.bf16.mxu0 %vm8570_vm15, %v6316_v2 }
 0x548   : > { %v4411_v7 = vadd.f32 %v8186_v57, %v4410_v25  ;;  %v5696_v13 = vpop.f32.mrb[39].mxu0  ;;  %v4432_v31 = vmax.f32 %v4408_v53, 0.0 }
 0x54a   : > { %v4433_v30 = vmax.f32 %v4411_v7, 0.0 }
 0x54c   : > { %v4441_v10 = vpack.c.bf16 %v4433_v30, %v4432_v31 }
 0x54d   : > { %v4415_v28 = vpop.f32.mrb[40].mxu0 }
 0x54e   : > { %v4416_v41 = vadd.f32 %v8186_v57, %v4415_v28  ;;  %v5699_v38 = vpop.f32.mrb[41].mxu0  ;;  %5738 = vmatmul.mubr.bf16.gmra.mrb[64].mxu0 %v4441_v10 }
 0x54f   : > { %v4418_v5 = vpop.f32.mrb[42].mxu0  ;;  %5741 = vmatprep.mubr.msk.bf16.mxu0 %vm8570_vm15, %v6316_v2 }
 0x550   : > { %v4419_v22 = vadd.f32 %v8186_v57, %v4418_v5  ;;  %v5700_v8 = vpop.f32.mrb[43].mxu0  ;;  %v4434_v16 = vmax.f32 %v4416_v41, 0.0 }
 0x552   : > { %v4435_v26 = vmax.f32 %v4419_v22, 0.0 }
 0x554   : > { %v4442_v32 = vpack.c.bf16 %v4435_v26, %v4434_v16 }
 0x556   : > { %5742 = vmatmul.mubr.bf16.gmra.mrb[68].mxu0 %v4442_v32 }
 0x557   : > { %5761 = vmatprep.mubr.msk.bf16.mxu0 %vm8570_vm15, %v6316_v2 }
 0x5f9   : > { %v4546_v9 = vpop.f32.mrb[44].mxu0 }
 0x5fa   : > { %v4547_v57 = vadd.f32 %v8250_v49, %v4546_v9  ;;  %v5719_v37 = vpop.f32.mrb[45].mxu0 }
 0x5fb   : > { %v4549_v12 = vpop.f32.mrb[46].mxu0 }
 0x5fc   : > { %v4550_v39 = vadd.f32 %v8250_v49, %v4549_v12  ;;  %v5720_v61 = vpop.f32.mrb[47].mxu0  ;;  %v4601_v4 = vmax.f32 %v4547_v57, 0.0  ;;  %v5375_v57 = vld [vmem:[%s8408_s5 + $0x5] ss:$0 sm:$0xff] }
 0x5fe   : > { %v4602_v48 = vmax.f32 %v4550_v39, 0.0 }
 0x600   : > { %v4615_v11 = vpack.c.bf16 %v4602_v48, %v4601_v4 }
 0x601   : > { %v4554_v51 = vpop.f32.mrb[48].mxu0 }
 0x602   : > { %v4555_v40 = vadd.f32 %v8250_v49, %v4554_v51  ;;  %v5723_v50 = vpop.f32.mrb[49].mxu0  ;;  %5762 = vmatmul.mubr.bf16.vlgmr.msra.gmra.mrb[72].mxu0 %v4615_v11 }
 0x603   : > { %v4557_v54 = vpop.f32.mrb[50].mxu0  ;;  %5765 = vmatprep.mubr.msk.bf16.mxu0 %vm8570_vm15, %v6316_v2 }
 0x604   : > { %v4558_v18 = vadd.f32 %v8250_v49, %v4557_v54  ;;  %v5724_v58 = vpop.f32.mrb[51].mxu0  ;;  %v4603_v19 = vmax.f32 %v4555_v40, 0.0 }
 0x606   : > { %v4604_v14 = vmax.f32 %v4558_v18, 0.0 }
 0x608   : > { %v4616_v59 = vpack.c.bf16 %v4604_v14, %v4603_v19 }
 0x609   : > { %v4562_v0 = vpop.f32.mrb[52].mxu0 }
 0x60a   : > { %v4563_v17 = vadd.f32 %v8250_v49, %v4562_v0  ;;  %v5727_v3 = vpop.f32.mrb[53].mxu0  ;;  %5766 = vmatmul.mubr.bf16.gmra.mrb[76].mxu0 %v4616_v59 }
 0x60b   : > { %v4565_v55 = vpop.f32.mrb[54].mxu0  ;;  %5769 = vmatprep.mubr.msk.bf16.mxu0 %vm8570_vm15, %v6316_v2 }
 0x60c   : > { %v4566_v27 = vadd.f32 %v8250_v49, %v4565_v55  ;;  %v5728_v29 = vpop.f32.mrb[55].mxu0  ;;  %v4605_v52 = vmax.f32 %v4563_v17, 0.0 }
 0x60e   : > { %v4606_v15 = vmax.f32 %v4566_v27, 0.0 }
 0x610   : > { %v4617_v46 = vpack.c.bf16 %v4606_v15, %v4605_v52 }
 0x611   : > { %v4570_v6 = vpop.f32.mrb[56].mxu0 }
 0x612   : > { %v4571_v56 = vadd.f32 %v8250_v49, %v4570_v6  ;;  %v5731_v44 = vpop.f32.mrb[57].mxu0  ;;  %5770 = vmatmul.mubr.bf16.gmra.mrb[80].mxu0 %v4617_v46 }
 0x613   : > { %v4573_v23 = vpop.f32.mrb[58].mxu0  ;;  %5773 = vmatprep.mubr.msk.bf16.mxu0 %vm8570_vm15, %v6316_v2 }
 0x614   : > { %v4574_v34 = vadd.f32 %v8250_v49, %v4573_v23  ;;  %v5732_v33 = vpop.f32.mrb[59].mxu0  ;;  %v4607_v21 = vmax.f32 %v4571_v56, 0.0 }
 0x616   : > { %v4608_v1 = vmax.f32 %v4574_v34, 0.0 }
 0x618   : > { %v4618_v62 = vpack.c.bf16 %v4608_v1, %v4607_v21 }
 0x619   : > { %v4578_v63 = vpop.f32.mrb[60].mxu0 }
 0x61a   : > { %v4579_v36 = vadd.f32 %v8250_v49, %v4578_v63  ;;  %v5735_v42 = vpop.f32.mrb[61].mxu0  ;;  %5774 = vmatmul.mubr.bf16.gmra.mrb[84].mxu0 %v4618_v62 }
 0x61b   : > { %v4581_v24 = vpop.f32.mrb[62].mxu0  ;;  %5777 = vmatprep.mubr.msk.bf16.mxu0 %vm8570_vm15, %v6316_v2 }
 0x61c   : > { %v4582_v45 = vadd.f32 %v8250_v49, %v4581_v24  ;;  %v5736_v43 = vpop.f32.mrb[63].mxu0  ;;  %v4609_v35 = vmax.f32 %v4579_v36, 0.0 }
 0x61e   : > { %v4610_v20 = vmax.f32 %v4582_v45, 0.0 }
 0x620   : > { %v4619_v53 = vpack.c.bf16 %v4610_v20, %v4609_v35 }
 0x621   : > { %v4586_v60 = vpop.f32.mrb[64].mxu0 }
 0x622   : > { %v4587_v25 = vadd.f32 %v8250_v49, %v4586_v60  ;;  %v5739_v7 = vpop.f32.mrb[65].mxu0  ;;  %5778 = vmatmul.mubr.bf16.gmra.mrb[88].mxu0 %v4619_v53 }
 0x623   : > { %v4589_v13 = vpop.f32.mrb[66].mxu0  ;;  %5781 = vmatprep.mubr.msk.bf16.mxu0 %vm8570_vm15, %v6316_v2 }
 0x624   : > { %v4590_v31 = vadd.f32 %v8250_v49, %v4589_v13  ;;  %v5740_v30 = vpop.f32.mrb[67].mxu0  ;;  %v4611_v10 = vmax.f32 %v4587_v25, 0.0 }
 0x626   : > { %v4612_v28 = vmax.f32 %v4590_v31, 0.0 }
 0x628   : > { %v4620_v41 = vpack.c.bf16 %v4612_v28, %v4611_v10 }
 0x629   : > { %v4594_v38 = vpop.f32.mrb[68].mxu0 }
 0x62a   : > { %v4595_v5 = vadd.f32 %v8250_v49, %v4594_v38  ;;  %v5743_v22 = vpop.f32.mrb[69].mxu0  ;;  %5782 = vmatmul.mubr.bf16.gmra.mrb[92].mxu0 %v4620_v41 }
 0x62b   : > { %v4597_v8 = vpop.f32.mrb[70].mxu0  ;;  %5785 = vmatprep.mubr.msk.bf16.mxu0 %vm8570_vm15, %v6316_v2 }
 0x62c   : > { %v4598_v16 = vadd.f32 %v8250_v49, %v4597_v8  ;;  %v5744_v26 = vpop.f32.mrb[71].mxu0  ;;  %v4613_v32 = vmax.f32 %v4595_v5, 0.0 }
 0x62e   : > { %v4614_v47 = vmax.f32 %v4598_v16, 0.0 }
 0x630   : > { %v4621_v9 = vpack.c.bf16 %v4614_v47, %v4613_v32 }
 0x632   : > { %5786 = vmatmul.mubr.bf16.gmra.mrb[96].mxu0 %v4621_v9 }
 0x6d5   : > { %v4725_v37 = vpop.f32.mrb[72].mxu0 }
 0x6d6   : > { %v4726_v12 = vadd.f32 %v5375_v57, %v4725_v37  ;;  %v5763_v39 = vpop.f32.mrb[73].mxu0 }
 0x6d7   : > { %v4728_v61 = vpop.f32.mrb[74].mxu0 }
 0x6d8   : > { %4780 = vst.msk [vmem:[%s8282_s16] sm:$0xff] %vm4132_vm11, %v4726_v12  ;;  %v4729_v2 = vadd.f32 %v5375_v57, %v4728_v61  ;;  %v5764_v49 = vpop.f32.mrb[75].mxu0 }
 0x6da   : > { %4781 = vst.msk [vmem:[%s8282_s16 + $0x8] sm:$0xff] %vm4132_vm11, %v4729_v2 }
 0x6dd   : > { %v4733_v4 = vpop.f32.mrb[76].mxu0 }
 0x6de   : > { %v4734_v48 = vadd.f32 %v5375_v57, %v4733_v4  ;;  %v5767_v11 = vpop.f32.mrb[77].mxu0 }
 0x6df   : > { %v4736_v51 = vpop.f32.mrb[78].mxu0 }
 0x6e0   : > { %4782 = vst.msk [vmem:[%s8282_s16 + $0x10] sm:$0xff] %vm4132_vm11, %v4734_v48  ;;  %v4737_v40 = vadd.f32 %v5375_v57, %v4736_v51  ;;  %v5768_v50 = vpop.f32.mrb[79].mxu0 }
 0x6e2   : > { %4783 = vst.msk [vmem:[%s8282_s16 + $0x18] sm:$0xff] %vm4132_vm11, %v4737_v40 }
 0x6e5   : > { %v4741_v54 = vpop.f32.mrb[80].mxu0 }
 0x6e6   : > { %v4742_v18 = vadd.f32 %v5375_v57, %v4741_v54  ;;  %v5771_v58 = vpop.f32.mrb[81].mxu0 }
 0x6e7   : > { %v4744_v19 = vpop.f32.mrb[82].mxu0 }
 0x6e8   : > { %4784 = vst.msk [vmem:[%s8282_s16 + $0x20] sm:$0xff] %vm4132_vm11, %v4742_v18  ;;  %v4745_v14 = vadd.f32 %v5375_v57, %v4744_v19  ;;  %v5772_v59 = vpop.f32.mrb[83].mxu0 }
 0x6ea   : > { %4785 = vst.msk [vmem:[%s8282_s16 + $0x28] sm:$0xff] %vm4132_vm11, %v4745_v14 }
 0x6ed   : > { %v4749_v0 = vpop.f32.mrb[84].mxu0 }
 0x6ee   : > { %v4750_v17 = vadd.f32 %v5375_v57, %v4749_v0  ;;  %v5775_v3 = vpop.f32.mrb[85].mxu0 }
 0x6ef   : > { %v4752_v55 = vpop.f32.mrb[86].mxu0 }
 0x6f0   : > { %4786 = vst.msk [vmem:[%s8282_s16 + $0x30] sm:$0xff] %vm4132_vm11, %v4750_v17  ;;  %v4753_v27 = vadd.f32 %v5375_v57, %v4752_v55  ;;  %v5776_v29 = vpop.f32.mrb[87].mxu0 }
 0x6f2   : > { %4787 = vst.msk [vmem:[%s8282_s16 + $0x38] sm:$0xff] %vm4132_vm11, %v4753_v27 }
 0x6f5   : > { %v4757_v52 = vpop.f32.mrb[88].mxu0 }
 0x6f6   : > { %v4758_v15 = vadd.f32 %v5375_v57, %v4757_v52  ;;  %v5779_v46 = vpop.f32.mrb[89].mxu0 }
 0x6f7   : > { %v4760_v6 = vpop.f32.mrb[90].mxu0 }
 0x6f8   : > { %4788 = vst.msk [vmem:[%s8282_s16 + $0x40] sm:$0xff] %vm4132_vm11, %v4758_v15  ;;  %v4761_v56 = vadd.f32 %v5375_v57, %v4760_v6  ;;  %v5780_v44 = vpop.f32.mrb[91].mxu0 }
 0x6fa   : > { %4789 = vst.msk [vmem:[%s8282_s16 + $0x48] sm:$0xff] %vm4132_vm11, %v4761_v56 }
 0x6fd   : > { %v4765_v23 = vpop.f32.mrb[92].mxu0 }
 0x6fe   : > { %v4766_v34 = vadd.f32 %v5375_v57, %v4765_v23  ;;  %v5783_v33 = vpop.f32.mrb[93].mxu0 }
 0x6ff   : > { %v4768_v21 = vpop.f32.mrb[94].mxu0 }
 0x700   : > { %4790 = vst.msk [vmem:[%s8282_s16 + $0x50] sm:$0xff] %vm4132_vm11, %v4766_v34  ;;  %v4769_v1 = vadd.f32 %v5375_v57, %v4768_v21  ;;  %v5784_v62 = vpop.f32.mrb[95].mxu0 }
 0x702   : > { %4791 = vst.msk [vmem:[%s8282_s16 + $0x58] sm:$0xff] %vm4132_vm11, %v4769_v1 }
 0x704   : > { %4800 = sbr.rel (!%p6379_p4) target bundleno = 1864 (0x748), region = 48 }
 0x705   : > { %v4773_v63 = vpop.f32.mrb[96].mxu0 }
 0x706   : > { %v4774_v36 = vadd.f32 %v5375_v57, %v4773_v63  ;;  %v5787_v42 = vpop.f32.mrb[97].mxu0 }
 0x707   : > { %v4776_v24 = vpop.f32.mrb[98].mxu0 }
 0x708   : > { %4792 = vst.msk [vmem:[%s8282_s16 + $0x60] sm:$0xff] %vm4132_vm11, %v4774_v36  ;;  %v4777_v45 = vadd.f32 %v5375_v57, %v4776_v24  ;;  %v5788_v43 = vpop.f32.mrb[99].mxu0 }
 0x70a   : > { %4793 = vst.msk [vmem:[%s8282_s16 + $0x68] sm:$0xff] %vm4132_vm11, %v4777_v45 }
 0x70b   : > { %s8612_s21 = smov (!%p4803_p8, %s4802_s21), 14 }
 0x70c   : > { %s5384_s23 = sshll.u32 %s8612_s21, 7 }
 0x70d   : > { %p5387_p9 = scmp.eq.s32.totalorder %s5384_s23, 0 }
 0x70e   : > { %6217 = sdivrem.u32 (!%p5387_p9), %s8612_s21, 14 }
 0x70f   : > { %4811 = sbr.rel (%p5387_p9) target bundleno = 1864 (0x748), region = 52 }
 0x717   : > { %s8325_s29 = spop.drf %6217 }
 0x718   : > { %p5388_p10 = scmp.le.s32.totalorder %s8325_s29, 0 }
 0x719   : > { %s8605_s24 = smov (!%p5388_p10), %s8319_s20  ;;  %s8606_s30 = smov (!%p5388_p10), %s8282_s16 }
 0x71a   : > { %5031 = sbr.rel (%p5388_p10) target bundleno = 1835 (0x72b), region = 139  ;;  %s8334_s26 = smov (!%p5388_p10), 0  }
 0x71b   : > { %s8336_s27 = smov (!%p5388_p10), 0  }
 0x721 LB: >> { %v4901_v35 = vld [vmem:[%s6283_s30] sm:$0xff]  ;;  %v4903_v20 = vld [vmem:[%s6283_s30 + $0x8] sm:$0xff]  ;;  %v4905_v53 = vld [vmem:[%s6283_s30 + $0x10] sm:$0xff]  ;;  %s4929_s7 = sadd.s32 1, %s6287_s26  ;;  %s4895_s27 = sadd.s32 1, %s6291_s27   ;;  %s6291_s27 = sphi %s8336_s27, %s4895_s27   ;;  %s6287_s26 = sphi %s8334_s26, %s8607_s26   ;;  %s6283_s30 = sphi %s8606_s30, %s4934_s30   ;;  %s6279_s24 = sphi %s8605_s24, %s4935_s24  }
 0x722   : >> { %4902 = vst [vmem:[%s6279_s24] sm:$0xff] %v4901_v35  ;;  %4904 = vst [vmem:[%s6279_s24 + $0x8] sm:$0xff] %v4903_v20  ;;  %v4907_v60 = vld [vmem:[%s6283_s30 + $0x18] sm:$0xff]  ;;  %v4909_v25 = vld [vmem:[%s6283_s30 + $0x20] sm:$0xff]  ;;  %p4930_p11 = scmp.ge.s32.totalorder %s4929_s7, %s8325_s29  ;;  %p4894_p12 = scmp.ge.s32.totalorder %s4895_s27, %s8325_s29 }
 0x723   : >> { %4906 = vst [vmem:[%s6279_s24 + $0x10] sm:$0xff] %v4905_v53  ;;  %v4911_v7 = vld [vmem:[%s6283_s30 + $0x28] sm:$0xff]  ;;  %4908 = vst [vmem:[%s6279_s24 + $0x18] sm:$0xff] %v4907_v60  ;;  %v4913_v13 = vld [vmem:[%s6283_s30 + $0x30] sm:$0xff] }
 0x724   : >> { %4910 = vst [vmem:[%s6279_s24 + $0x20] sm:$0xff] %v4909_v25  ;;  %4912 = vst [vmem:[%s6279_s24 + $0x28] sm:$0xff] %v4911_v7  ;;  %v4915_v31 = vld [vmem:[%s6283_s30 + $0x38] sm:$0xff]  ;;  %v4917_v30 = vld [vmem:[%s6283_s30 + $0x40] sm:$0xff]  ;;  %s8614_s7 = smov (%p4930_p11, %s4929_s7), 0  ;;  %4897 = sbr.rel (!%p4894_p12) target bundleno = 1825 (0x721), region = 145 }
 0x725   : >> { %4914 = vst [vmem:[%s6279_s24 + $0x30] sm:$0xff] %v4913_v13  ;;  %4916 = vst [vmem:[%s6279_s24 + $0x38] sm:$0xff] %v4915_v31  ;;  %v4919_v10 = vld [vmem:[%s6283_s30 + $0x48] sm:$0xff]  ;;  %v4921_v28 = vld [vmem:[%s6283_s30 + $0x50] sm:$0xff]  ;;  %s4932_s8 = smul.u32 112, %s8614_s7  ;;  %s8607_s26 = smov %s8614_s7 }
 0x726   : >> { %4918 = vst [vmem:[%s6279_s24 + $0x40] sm:$0xff] %v4917_v30  ;;  %v4923_v41 = vld [vmem:[%s6283_s30 + $0x58] sm:$0xff]  ;;  %4920 = vst [vmem:[%s6279_s24 + $0x48] sm:$0xff] %v4919_v10  ;;  %v4925_v38 = vld [vmem:[%s6283_s30 + $0x60] sm:$0xff] }
 0x727   : >> { %4922 = vst [vmem:[%s6279_s24 + $0x50] sm:$0xff] %v4921_v28  ;;  %4924 = vst [vmem:[%s6279_s24 + $0x58] sm:$0xff] %v4923_v41  ;;  %v4927_v5 = vld [vmem:[%s6283_s30 + $0x68] sm:$0xff]  ;;  %s4934_s30 = scalar_lea.vmem %s8282_s16, %s4932_s8 [#allocation2]  }
 0x728   : >> { %4926 = vst [vmem:[%s6279_s24 + $0x60] sm:$0xff] %v4925_v38  ;;  %4928 = vst [vmem:[%s6279_s24 + $0x68] sm:$0xff] %v4927_v5  ;;  %s4935_s24 = scalar_lea.vmem %s8319_s20, %s4932_s8  }
 0x72b PF: > { %6219 = sdivrem.u32 %s8612_s21, 14 }
 0x72c   : > { %s5389_s9 = smul.u32 112, %s8325_s29 }
 0x72e   : > { %s4940_s15 = scalar_lea.vmem %s8282_s16, %s5389_s9 [#allocation2]   ;;  %s4942_s10 = scalar_lea.vmem %s8319_s20, %s5389_s9  }
 0x734   : > { %s6220_s11 = spop.drf %6219 }
 0x735   : > { %p5391_p13 = scmp.le.s32.totalorder %s6220_s11, 0 }
 0x736   : > { %s6293_s12 = smov (!%p5391_p13), %s4942_s10   ;;  %s6297_s13 = smov (!%p5391_p13), %s4940_s15  }
 0x737   : > { %5045 = sbr.rel (%p5391_p13) target bundleno = 1864 (0x748), region = 150  ;;  %s6301_s14 = smov (!%p5391_p13), 0  }
 0x738   : > { %s6305_s17 = smov (!%p5391_p13), 0  }
 0x73e LB: >> { %v4952_v22 = vld [vmem:[%s6299_s13] sm:$0xff]  ;;  %s4954_s18 = sadd.s32 1, %s6303_s14  ;;  %s4946_s17 = sadd.s32 1, %s6307_s17   ;;  %s6307_s17 = sphi %s6305_s17, %s4946_s17   ;;  %s6303_s14 = sphi %s6301_s14, %s6302_s14   ;;  %s6299_s13 = sphi %s6297_s13, %s4959_s13   ;;  %s6295_s12 = sphi %s6293_s12, %s4960_s12  }
 0x73f   : >> { %4953 = vst [vmem:[%s6295_s12] sm:$0xff] %v4952_v22  ;;  %p4955_p0 = scmp.ge.s32.totalorder %s4954_s18, %s6220_s11  ;;  %p4945_p1 = scmp.ge.s32.totalorder %s4946_s17, %s6220_s11 }
 0x741   : >> { %s8616_s18 = smov (%p4955_p0, %s4954_s18), 0  ;;  %4948 = sbr.rel (!%p4945_p1) target bundleno = 1854 (0x73e), region = 156 }
 0x742   : >> { %s5392_s16 = sshll.u32 %s8616_s18, 3  ;;  %s6302_s14 = smov %s8616_s18  }
 0x743   : >> { %s4959_s13 = scalar_lea.vmem %s4940_s15, %s5392_s16 [#allocation2]   ;;  %s4960_s12 = scalar_lea.vmem %s4942_s10, %s5392_s16  }
 0x748 PF: > { %p13_p2 = scmp.ge.s32.totalorder %s6369_s25, 4   ;;  %s8608_s21 = smov %s6271_s22 }
 0x749   : > { %s8609_s22 = smov %s6377_s28  ;;  %s8610_s23 = smov %s6369_s25 }
 0x74a   :  { %15 = sbr.rel (!%p13_p2) target bundleno = 2 (0x2), region = 167 }

// kernel: mlp_diffusion_forward.1
= control target key start
LH: loop header
LB: loop body
LE: loop exit
PB: predicated region body
PF: predicated region fallthrough
CT: control target
= control target key end

     0   :  { %s3159_s21 = smov 0   ;;  %s3161_s22 = smov 0   ;;  %s3825_s0 = inlined_call_operand.vmem [shape: bf16[200,128], index: 0, kind: input, shape index: {}]   ;;  %s3826_s1 = inlined_call_operand.vmem [shape: s32[200,1], index: 1, kind: input, shape index: {}]   ;;  %s3827_s2 = inlined_call_operand.vmem [shape: bf16[200,16], index: 2, kind: input, shape index: {}]   ;;  %s3828_s3 = inlined_call_operand.vmem [shape: bf16[6,128,128], index: 3, kind: input, shape index: {}]   ;;  %s3829_s4 = inlined_call_operand.vmem [shape: bf16[16,128], index: 4, kind: input, shape index: {}]   ;;  %s3830_s5 = inlined_call_operand.vmem [shape: f32[8,128], index: 5, kind: input, shape index: {}]   ;;  %s3831_s6 = inlined_call_operand.vmem [shape: f32[200,16], index: 6, kind: output, shape index: {}]  }
   0x1   :  { %s3163_s23 = smov 0  }
   0x2 LB: > { %s3172_s24 = sadd.s32 4294967295, %s3086_s23   ;;  %s3174_s25 = sadd.s32 1, %s3086_s23   ;;  %s3086_s23 = sphi %s3163_s23, %s3838_s23   ;;  %s3082_s22 = sphi %s3161_s22, %s3837_s22   ;;  %s3078_s21 = sphi %s3159_s21, %s3836_s21  }
   0x3   : > { %s161_s26 = ssub.s32 %s3086_s23, %s3174_s25  ;;  %s164_s27 = sadd.s32 1, %s3082_s22 }
   0x4   : > { %p162_p0 = scmp.eq.s32.totalorder %s161_s26, 0  ;;  %p174_p1 = scmp.ne.s32.totalorder %s3082_s22, %s3078_s21 }
   0x5   : > { %p175_p2 = scmp.eq.s32.totalorder %s3172_s24, 1  ;;  %p2120_p3 = scmp.ge.s32.totalorder %s3086_s23, 1 }
   0x6   : > { %s3182_s28 = scalar_select %p162_p0, %s3082_s22, %s164_s27  }
   0x7   : > { %p3184_p4 = por %p175_p2, %p174_p1  ;;  %p259_p5 = scmp.lt.s32.totalorder %s3086_s23, 3 }
   0x9   : > { %p260_p6 = pnand %p2120_p3, %p259_p5 }
   0xa   : > { %v2909_v0 = vld [vmem:[%s3828_s3] sm:$0xff] (!%p260_p6)   ;;  %v3120_v1 = vmov (!%p260_p6), 0.0   ;;  %v2910_v2 = vld [vmem:[%s3828_s3 + $0x8] sm:$0xff] (!%p260_p6)   ;;  %s3197_s10 = smul.u32 (!%p260_p6), 14, %s3172_s24  ;;  %vm3121_vm0 = vmmov (!%p260_p6), 0   ;;  %v3122_v3 = vmov (!%p260_p6), 0  }
   0xb   : > { %263 = sbr.rel (%p260_p6) target bundleno = 1386 (0x56a), region = 44  ;;  %2419 = vmatprep.subr.bf16.mxu0 (!%p260_p6), %v3120_v1  ;;  %2713 = vmatprep.subr.bf16.mxu1 (!%p260_p6), %v3120_v1  ;;  %v2911_v4 = vld [vmem:[%s3828_s3 + $0x10] sm:$0xff] (!%p260_p6)   ;;  %v2912_v5 = vld [vmem:[%s3828_s3 + $0x18] sm:$0xff] (!%p260_p6)   ;;  %v2913_v6 = vld [vmem:[%s3828_s3 + $0x20] sm:$0xff] (!%p260_p6)   ;;  %s307_s9 = sand.u32 (!%p260_p6), 1, %s3078_s21  }
   0xc   : > { %2420 = vmatpush3.bf16.msra.mxu0 (!%p260_p6), %v2909_v0  ;;  %2721 = vmatpush3.bf16.msra.mxu1 (!%p260_p6), %v2909_v0  ;;  %p315_p7 = scmp.lt.s32.totalorder (!%p260_p6), %s3197_s10, 24  ;;  %v2914_v9 = vld [vmem:[%s3828_s3 + $0x28] sm:$0xff] (!%p260_p6)   ;;  %v2915_v10 = vld [vmem:[%s3828_s3 + $0x30] sm:$0xff] (!%p260_p6)   ;;  %v2916_v15 = vld [vmem:[%s3828_s3 + $0x38] sm:$0xff] (!%p260_p6)   ;;  %s2813_s11 = smul.u32 (!%p260_p6), 112, %s307_s9 }
   0xd   : > { %2421 = vmatprep.subr.bf16.mxu0 (!%p260_p6), %v3120_v1  ;;  %2714 = vmatprep.subr.bf16.mxu1 (!%p260_p6), %v3120_v1  ;;  %v2924_v31 = vld [vmem:[%s3828_s3 + $0x40] sm:$0xff] (!%p260_p6)   ;;  %v2925_v32 = vld [vmem:[%s3828_s3 + $0x48] sm:$0xff] (!%p260_p6)   ;;  %v2926_v33 = vld [vmem:[%s3828_s3 + $0x50] sm:$0xff] (!%p260_p6)  }
   0xe   : > { %2435 = vmatprep.mubr.msk.bf16.mxu0 (!%p260_p6), %vm3121_vm0, %v3120_v1  ;;  %2451 = vmatprep.mubr.msk.bf16.mxu1 (!%p260_p6), %vm3121_vm0, %v3120_v1  ;;  %v2927_v34 = vld [vmem:[%s3828_s3 + $0x58] sm:$0xff] (!%p260_p6)   ;;  %v2928_v35 = vld [vmem:[%s3828_s3 + $0x60] sm:$0xff] (!%p260_p6)   ;;  %v2929_v36 = vld [vmem:[%s3828_s3 + $0x68] sm:$0xff] (!%p260_p6)   ;;  %s3704_s16 = scalar_lea.vmem (!%p260_p6), [#allocation2], %s2813_s11  }
   0xf   : > { %2908 = vset.pattern.permute.xlu1 (!%p260_p6), %v3122_v3  ;;  %2907 = vset.pattern.permute.xlu0 (!%p260_p6), %v3122_v3  ;;  %v2930_v37 = vld [vmem:[%s3828_s3 + $0x70] sm:$0xff] (!%p260_p6)   ;;  %v2931_v38 = vld [vmem:[%s3828_s3 + $0x78] sm:$0xff] (!%p260_p6)   ;;  %v3332_v39 = vld [vmem:[%s3830_s5] ss:$0 sm:$0xff] (!%p260_p6) }
  0x10   : > { %2422 = vmatpush3.bf16.msra.mxu0 (!%p260_p6), %v2910_v2  ;;  %2722 = vmatpush3.bf16.msra.mxu1 (!%p260_p6), %v2910_v2 }
  0x11   : > { %2423 = vmatprep.subr.bf16.mxu0 (!%p260_p6), %v3120_v1  ;;  %2715 = vmatprep.subr.bf16.mxu1 (!%p260_p6), %v3120_v1 }
  0x12   : > { %s3210_s13 = scalar_select %p315_p7, %s3197_s10, 24 }
  0x13   : > { %s1832_s21 = ssub.s32 (%p3184_p4), 25, %s3197_s10  ;;  %s2320_s18 = smul.u32 (%p3184_p4), 112, %s3172_s24 }
  0x14   : > { %s2121_s14 = sshll.u32 %s3210_s13, 2  ;;  %2424 = vmatpush3.bf16.msra.mxu0 %v2911_v4  ;;  %2723 = vmatpush3.bf16.msra.mxu1 %v2911_v4  ;;  %s2122_s20 = sshll.u32 %s3210_s13, 3 }
  0x15   : > { %s3220_s17 = scalar_lea.vmem %s3825_s0, %s2121_s14  ;;  %2425 = vmatprep.subr.bf16.mxu0 %v3120_v1  ;;  %2716 = vmatprep.subr.bf16.mxu1 %v3120_v1  ;;  %s3234_s7 = scalar_lea.vmem %s3826_s1, %s2122_s20 }
  0x16   : > { %v844_v7 = vld [vmem:[%s3234_s7 + $0x10] sm:$0xff]  ;;  %v842_v8 = vld [vmem:[%s3234_s7] sm:$0xff]  ;;  %v845_v11 = vld [vmem:[%s3234_s7 + $0x18] sm:$0xff]  ;;  %s3268_s20 = scalar_lea.vmem %s3827_s2, %s2121_s14  ;;  %p1833_p8 = scmp.lt.s32.totalorder (%p3184_p4), %s1832_s21, 14 }
  0x17   : > { %863 = vperm.xlu1 %2908, %v844_v7   ;;  %857 = vperm.xlu0 %2907, %v842_v8   ;;  %v843_v12 = vld [vmem:[%s3234_s7 + $0x8] sm:$0xff]  ;;  %v846_v14 = vld [vmem:[%s3234_s7 + $0x20] sm:$0xff]  ;;  %v849_v18 = vld [vmem:[%s3234_s7 + $0x38] sm:$0xff]  ;;  %s3741_s14 = scalar_lea.vmem (%p3184_p4), %s3831_s6, %s2320_s18  }
  0x18   : > { %2426 = vmatpush3.bf16.msra.mxu0 %v2912_v5  ;;  %2724 = vmatpush3.bf16.msra.mxu1 %v2912_v5  ;;  %v847_v13 = vld [vmem:[%s3234_s7 + $0x28] sm:$0xff]  ;;  %v2917_v16 = vld [vmem:[%s3220_s17] sm:$0xff]   ;;  %v848_v19 = vld [vmem:[%s3234_s7 + $0x30] sm:$0xff] }
  0x19   : > { %2427 = vmatprep.subr.bf16.mxu0 %v3120_v1  ;;  %2717 = vmatprep.subr.bf16.mxu1 %v3120_v1  ;;  %v2918_v17 = vld [vmem:[%s3220_s17 + $0x20] sm:$0xff]   ;;  %v851_v20 = vld [vmem:[%s3234_s7 + $0x48] sm:$0xff]  ;;  %v853_v24 = vld [vmem:[%s3234_s7 + $0x58] sm:$0xff] }
  0x1a   : > { %v850_v21 = vld [vmem:[%s3234_s7 + $0x40] sm:$0xff]  ;;  %v2919_v22 = vld [vmem:[%s3220_s17 + $0x8] sm:$0xff]   ;;  %v852_v25 = vld [vmem:[%s3234_s7 + $0x50] sm:$0xff] }
  0x1b   : > { %866 = vperm.xlu1 %2908, %v845_v11   ;;  %860 = vperm.xlu0 %2907, %v843_v12   ;;  %v2920_v23 = vld [vmem:[%s3220_s17 + $0x28] sm:$0xff]   ;;  %v854_v27 = vld [vmem:[%s3234_s7 + $0x60] sm:$0xff]  ;;  %v2921_v28 = vld [vmem:[%s3220_s17 + $0x10] sm:$0xff]  }
  0x1c   : > { %2428 = vmatpush3.bf16.msra.mxu0 %v2913_v6  ;;  %2725 = vmatpush3.bf16.msra.mxu1 %v2913_v6  ;;  %v855_v26 = vld [vmem:[%s3234_s7 + $0x68] sm:$0xff]  ;;  %v2922_v29 = vld [vmem:[%s3220_s17 + $0x30] sm:$0xff]   ;;  %v2923_v30 = vld [vmem:[%s3220_s17 + $0x18] sm:$0xff]  }
  0x1d   : > { %2429 = vmatprep.subr.bf16.mxu0 %v3120_v1  ;;  %2718 = vmatprep.subr.bf16.mxu1 %v3120_v1 }
  0x1f   : > { %872 = vperm.xlu1 %2908, %v847_v13   ;;  %869 = vperm.xlu0 %2907, %v846_v14  }
  0x20   : > { %2430 = vmatpush3.bf16.msra.mxu0 %v2914_v9  ;;  %2726 = vmatpush3.bf16.msra.mxu1 %v2914_v9 }
  0x21   : > { %2431 = vmatprep.subr.bf16.mxu0 %v3120_v1  ;;  %2719 = vmatprep.subr.bf16.mxu1 %v3120_v1 }
  0x23   : > { %878 = vperm.xlu1 %2908, %v849_v18   ;;  %875 = vperm.xlu0 %2907, %v848_v19  }
  0x24   : > { %2432 = vmatpush3.bf16.msra.mxu0 %v2915_v10  ;;  %2727 = vmatpush3.bf16.msra.mxu1 %v2915_v10 }
  0x25   : > { %2433 = vmatprep.subr.bf16.mxu0 %v3120_v1  ;;  %2720 = vmatprep.subr.bf16.mxu1 %v3120_v1 }
  0x27   : > { %884 = vperm.xlu1 %2908, %v851_v20   ;;  %881 = vperm.xlu0 %2907, %v850_v21  }
  0x28   : > { %2434 = vmatpush3.bf16.msra.mxu0 %v2916_v15  ;;  %2728 = vmatpush3.bf16.msra.mxu1 %v2916_v15 }
  0x29   : > { %2463 = vmatprep.subr.bf16.mxu1 %v3120_v1  ;;  %2581 = vmatprep.subr.bf16.mxu0 %v3120_v1 }
  0x2b   : > { %2436 = vmatmul.mubr.bf16.vlgmr.msra.gmra.mrb[0].mxu0 %v2917_v16  ;;  %2452 = vmatmul.mubr.bf16.vlgmr.msra.gmra.mrb[0].mxu1 %v2918_v17 }
  0x2c   : > { %2439 = vmatprep.mubr.msk.bf16.mxu0 %vm3121_vm0, %v3120_v1  ;;  %2455 = vmatprep.mubr.msk.bf16.mxu1 %vm3121_vm0, %v3120_v1 }
  0x2d   : > { %890 = vperm.xlu1 %2908, %v853_v24   ;;  %887 = vperm.xlu0 %2907, %v852_v25  }
  0x2e   : > { %2464 = vmatpush3.bf16.msra.mxu1 %v2924_v31 }
  0x2f   : > { %2465 = vmatprep.subr.bf16.mxu1 %v3120_v1 }
  0x31   : > { %896 = vperm.xlu1 %2908, %v855_v26   ;;  %893 = vperm.xlu0 %2907, %v854_v27  }
  0x32   : > { %2466 = vmatpush3.bf16.msra.mxu1 %v2925_v32 }
  0x33   : > { %2440 = vmatmul.mubr.bf16.gmra.mrb[4].mxu0 %v2919_v22  ;;  %2456 = vmatmul.mubr.bf16.gmra.mrb[4].mxu1 %v2920_v23 }
  0x34   : > { %2443 = vmatprep.mubr.msk.bf16.mxu0 %vm3121_vm0, %v3120_v1  ;;  %2459 = vmatprep.mubr.msk.bf16.mxu1 %vm3121_vm0, %v3120_v1 }
  0x35   : > { %2467 = vmatprep.subr.bf16.mxu1 %v3120_v1 }
  0x36   : > { %2468 = vmatpush3.bf16.msra.mxu1 %v2926_v33 }
  0x37   : > { %2469 = vmatprep.subr.bf16.mxu1 %v3120_v1 }
  0x3a   : > { %2470 = vmatpush3.bf16.msra.mxu1 %v2927_v34 }
  0x3b   : > { %2444 = vmatmul.mubr.bf16.gmra.mrb[8].mxu0 %v2921_v28  ;;  %2460 = vmatmul.mubr.bf16.gmra.mrb[8].mxu1 %v2922_v29 }
  0x3c   : > { %2447 = vmatprep.mubr.msk.bf16.mxu0 %vm3121_vm0, %v3120_v1  ;;  %2479 = vmatprep.mubr.msk.bf16.mxu1 %vm3121_vm0, %v3120_v1 }
  0x3d   : > { %2471 = vmatprep.subr.bf16.mxu1 %v3120_v1 }
  0x3e   : > { %2472 = vmatpush3.bf16.msra.mxu1 %v2928_v35 }
  0x3f   : > { %2473 = vmatprep.subr.bf16.mxu1 %v3120_v1 }
  0x42   : > { %2474 = vmatpush3.bf16.msra.mxu1 %v2929_v36 }
  0x43   : > { %2448 = vmatmul.mubr.bf16.gmra.mrb[12].mxu0 %v2923_v30  ;;  %2475 = vmatprep.subr.bf16.mxu1 %v3120_v1 }
  0x44   : > { %2597 = vmatprep.mubr.msk.bf16.mxu0 %vm3121_vm0, %v3120_v1 }
  0x46   : > { %2476 = vmatpush3.bf16.msra.mxu1 %v2930_v37 }
  0x47   : > { %2477 = vmatprep.subr.bf16.mxu1 %v3120_v1 }
  0x4a   : > { %2478 = vmatpush3.bf16.msra.mxu1 %v2931_v38 }
  0x4b   : > { %2507 = vmatprep.subr.bf16.mxu1 %v3120_v1 }
  0xfe   : > { %v524_v40 = vpop.f32.mrb[0].mxu0  ;;  %v556_v41 = vpop.f32.mrb[0].mxu1 }
  0xff   : > { %v3335_v42 = vadd.f32 %v3332_v39, %v524_v40  ;;  %v2437_v43 = vpop.f32.mrb[1].mxu0  ;;  %v3338_v44 = vadd.f32 %v3332_v39, %v556_v41  ;;  %v2453_v45 = vpop.f32.mrb[1].mxu1 }
 0x100   : > { %v527_v46 = vpop.f32.mrb[2].mxu0  ;;  %v559_v47 = vpop.f32.mrb[2].mxu1 }
 0x101   : > { %v2140_v48 = vmul.f32 -1.442695, %v3335_v42  ;;  %v3342_v49 = vadd.f32 %v3332_v39, %v527_v46  ;;  %v2438_v50 = vpop.f32.mrb[3].mxu0  ;;  %v2148_v51 = vmul.f32 -1.442695, %v3338_v44  ;;  %v3346_v52 = vadd.f32 %v3332_v39, %v559_v47  ;;  %v2454_v53 = vpop.f32.mrb[3].mxu1 }
 0x103   : > { %2972 = vpow2.f32 %v2140_v48  ;;  %v2141_v54 = vmul.f32 -1.442695, %v3342_v49  ;;  %v2149_v55 = vmul.f32 -1.442695, %v3346_v52 }
 0x104   : > { %2974 = vpow2.f32 %v2148_v51 }
 0x105   : > { %2976 = vpow2.f32 %v2141_v54 }
 0x106   : > { %2978 = vpow2.f32 %v2149_v55  ;;  %v532_v56 = vpop.f32.mrb[4].mxu0  ;;  %v564_v57 = vpop.f32.mrb[4].mxu1 }
 0x107   : > { %v3351_v58 = vadd.f32 %v3332_v39, %v532_v56  ;;  %v2441_v59 = vpop.f32.mrb[5].mxu0  ;;  %v3354_v60 = vadd.f32 %v3332_v39, %v564_v57  ;;  %v2457_v61 = vpop.f32.mrb[5].mxu1 }
 0x108   : > { %v535_v62 = vpop.f32.mrb[6].mxu0  ;;  %v567_v63 = vpop.f32.mrb[6].mxu1 }
 0x109   : > { %v2142_v0 = vmul.f32 -1.442695, %v3351_v58  ;;  %v3358_v2 = vadd.f32 %v3332_v39, %v535_v62  ;;  %v2442_v3 = vpop.f32.mrb[7].mxu0  ;;  %v2150_v4 = vmul.f32 -1.442695, %v3354_v60  ;;  %v3362_v5 = vadd.f32 %v3332_v39, %v567_v63  ;;  %v2458_v6 = vpop.f32.mrb[7].mxu1 }
 0x10b   : > { %2980 = vpow2.f32 %v2142_v0  ;;  %v2143_v7 = vmul.f32 -1.442695, %v3358_v2  ;;  %v2151_v8 = vmul.f32 -1.442695, %v3362_v5  ;;  %v2932_v0 = vld [vmem:[%s3828_s3 + $0x140] sm:$0xff]  }
 0x10c   : > { %2982 = vpow2.f32 %v2150_v4 }
 0x10d   : > { %v2973_v9 = vpop.eup %2972  ;;  %2984 = vpow2.f32 %v2143_v7 }
 0x10e   : > { %v2975_v10 = vpop.eup %2974  ;;  %v621_v11 = vadd.f32 1.0, %v2973_v9  ;;  %2986 = vpow2.f32 %v2151_v8  ;;  %v540_v12 = vpop.f32.mrb[8].mxu0 }
 0x10f   : > { %v572_v13 = vpop.f32.mrb[8].mxu1  ;;  %v2977_v14 = vpop.eup %2976  ;;  %v629_v15 = vadd.f32 1.0, %v2975_v10  ;;  %v3367_v16 = vadd.f32 %v3332_v39, %v540_v12  ;;  %v2933_v10 = vld [vmem:[%s3828_s3 + $0x148] sm:$0xff]  }
 0x110   : > { %v2445_v17 = vpop.f32.mrb[9].mxu0  ;;  %v3370_v18 = vadd.f32 %v3332_v39, %v572_v13  ;;  %v2461_v19 = vpop.f32.mrb[9].mxu1  ;;  %2988 = vrcp.f32 %v621_v11  ;;  %v622_v21 = vadd.f32 1.0, %v2977_v14 }
 0x111   : > { %v2979_v20 = vpop.eup %2978  ;;  %v543_v22 = vpop.f32.mrb[10].mxu0  ;;  %2990 = vrcp.f32 %v629_v15  ;;  %v2144_v25 = vmul.f32 -1.442695, %v3367_v16 }
 0x112   : > { %v575_v23 = vpop.f32.mrb[10].mxu1  ;;  %v630_v24 = vadd.f32 1.0, %v2979_v20  ;;  %v3374_v26 = vadd.f32 %v3332_v39, %v543_v22  ;;  %v2446_v27 = vpop.f32.mrb[11].mxu0  ;;  %2992 = vrcp.f32 %v622_v21  ;;  %v2152_v29 = vmul.f32 -1.442695, %v3370_v18  ;;  %v2934_v21 = vld [vmem:[%s3828_s3 + $0x150] sm:$0xff]  }
 0x113   : > { %v2462_v28 = vpop.f32.mrb[11].mxu1  ;;  %v3378_v30 = vadd.f32 %v3332_v39, %v575_v23 }
 0x114   : > { %2994 = vrcp.f32 %v630_v24  ;;  %v2145_v31 = vmul.f32 -1.442695, %v3374_v26 }
 0x115   : > { %2996 = vpow2.f32 %v2144_v25  ;;  %v2153_v32 = vmul.f32 -1.442695, %v3378_v30  ;;  %v2981_v33 = vpop.eup %2980 }
 0x116   : > { %2998 = vpow2.f32 %v2145_v31  ;;  %v2983_v34 = vpop.eup %2982  ;;  %v623_v35 = vadd.f32 1.0, %v2981_v33  ;;  %v548_v36 = vpop.f32.mrb[12].mxu0  ;;  %v2936_v33 = vld [vmem:[%s3828_s3 + $0x160] sm:$0xff]  }
 0x117   : > { %3000 = vpow2.f32 %v2152_v29  ;;  %v2985_v37 = vpop.eup %2984  ;;  %v631_v38 = vadd.f32 1.0, %v2983_v34  ;;  %v3383_v40 = vadd.f32 %v3332_v39, %v548_v36  ;;  %v2449_v41 = vpop.f32.mrb[13].mxu0 }
 0x118   : > { %3002 = vpow2.f32 %v2153_v32  ;;  %v2987_v43 = vpop.eup %2986  ;;  %v624_v45 = vadd.f32 1.0, %v2985_v37  ;;  %v551_v46 = vpop.f32.mrb[14].mxu0 }
 0x119   : > { %3004 = vrcp.f32 %v623_v35  ;;  %v632_v47 = vadd.f32 1.0, %v2987_v43  ;;  %v2146_v48 = vmul.f32 -1.442695, %v3383_v40  ;;  %v3387_v50 = vadd.f32 %v3332_v39, %v551_v46  ;;  %v2450_v51 = vpop.f32.mrb[15].mxu0  ;;  %v2939_v43 = vld [vmem:[%s3828_s3 + $0x178] sm:$0xff]   ;;  %v2950_v46 = vld [vmem:[%s3828_s3 + $0x90] sm:$0xff]  }
 0x11a   : > { %3006 = vrcp.f32 %v631_v38  ;;  %v2989_v53 = vpop.eup %2988  ;;  %v2938_v38 = vld [vmem:[%s3828_s3 + $0x170] sm:$0xff]   ;;  %v2952_v51 = vld [vmem:[%s3828_s3 + $0xa0] sm:$0xff]  }
 0x11b   : > { %3008 = vrcp.f32 %v624_v45  ;;  %v2991_v54 = vpop.eup %2990  ;;  %v2147_v55 = vmul.f32 -1.442695, %v3387_v50  ;;  %v663_v61 = vmul.f32 %v2989_v53, %v3335_v42  ;;  %v2949_v45 = vld [vmem:[%s3828_s3 + $0x88] sm:$0xff]  }
 0x11c   : > { %3010 = vrcp.f32 %v632_v47  ;;  %v2993_v56 = vpop.eup %2992  ;;  %v3391_v57 = vmul.f32 %v2991_v54, %v3338_v44  ;;  %v2951_v47 = vld [vmem:[%s3828_s3 + $0x98] sm:$0xff]   ;;  %v2953_v54 = vld [vmem:[%s3828_s3 + $0xa8] sm:$0xff]  }
 0x11d   : > { %3012 = vpow2.f32 %v2146_v48  ;;  %v664_v62 = vmul.f32 %v2993_v56, %v3342_v49  ;;  %v364_v48 = vlaneseq  ;;  %v864_v56 = vpop.permute.xlu1 %863 }
 0x11e   : > { %v2995_v59 = vpop.eup %2994  ;;  %3014 = vpow2.f32 %v2147_v55 }
 0x11f   : > { %v2997_v39 = vpop.eup %2996  ;;  %v3396_v63 = vmul.f32 %v2995_v59, %v3346_v52  ;;  %v677_v4 = vpack.c.bf16 %v664_v62, %v663_v61  ;;  %v365_v53 = vand.u32 127, %v364_v48  ;;  %v2954_v59 = vld [vmem:[%s3828_s3 + $0xb0] sm:$0xff]   ;;  %v3123_v61 = vmov 1.0|1.0  }
 0x120   : > { %v2999_v3 = vpop.eup %2998  ;;  %v625_v6 = vadd.f32 1.0, %v2997_v39 }
 0x121   : > { %v3001_v44 = vpop.eup %3000  ;;  %v626_v7 = vadd.f32 1.0, %v2999_v3  ;;  %v681_v8 = vpack.c.bf16 %v3396_v63, %v3391_v57  ;;  %2480 = vmatmul.mubr.bf16.vlgmr.msra.gmra.mrb[12].mxu1 %v677_v4  ;;  %v2940_v57 = vld [vmem:[%s3829_s4] sm:$0xff]   ;;  %v867_v62 = vpop.permute.xlu1 %866  ;;  %vm900_vm4 = vcmp.eq.s32.totalorder %v864_v56, %v365_v53 }
 0x122   : > { %v3003_v42 = vpop.eup %3002  ;;  %3016 = vrcp.f32 %v625_v6  ;;  %v633_v49 = vadd.f32 1.0, %v3001_v44  ;;  %2508 = vmatpush3.bf16.msra.mxu1 %v2932_v0  ;;  %2483 = vmatprep.mubr.msk.bf16.mxu1 %vm3121_vm0, %v3120_v1  ;;  %vm901_vm5 = vcmp.eq.s32.totalorder %v867_v62, %v365_v53 }
 0x123   : > { %v3005_v9 = vpop.eup %3004  ;;  %3018 = vrcp.f32 %v626_v7  ;;  %v634_v52 = vadd.f32 1.0, %v3003_v42  ;;  %2509 = vmatprep.subr.bf16.mxu1 %v3120_v1  ;;  %vm2205_vm6 = vmpackc.low %vm901_vm5, %vm900_vm4 }
 0x124   : > { %v3007_v11 = vpop.eup %3006  ;;  %3020 = vrcp.f32 %v633_v49  ;;  %v665_v15 = vmul.f32 %v3005_v9, %v3351_v58  ;;  %v2935_v58 = vld [vmem:[%s3828_s3 + $0x158] sm:$0xff]   ;;  %v2941_v49 = vld [vmem:[%s3268_s20] sm:$0xff]   ;;  %v2942_v9 = vld [vmem:[%s3268_s20 + $0x8] sm:$0xff]  }
 0x125   : > { %v3009_v12 = vpop.eup %3008  ;;  %v3410_v13 = vmul.f32 %v3007_v11, %v3354_v60  ;;  %3022 = vrcp.f32 %v634_v52  ;;  %v873_v39 = vpop.permute.xlu1 %872  ;;  %v2943_v52 = vld [vmem:[%s3268_s20 + $0x10] sm:$0xff]   ;;  %v2945_v11 = vld [vmem:[%s3268_s20 + $0x20] sm:$0xff]  }
 0x126   : > { %v3011_v14 = vpop.eup %3010  ;;  %v666_v17 = vmul.f32 %v3009_v12, %v3358_v2  ;;  %2510 = vmatpush3.bf16.msra.mxu1 %v2933_v10  ;;  %vm903_vm7 = vcmp.eq.s32.totalorder %v873_v39, %v365_v53  ;;  %v2944_v10 = vld [vmem:[%s3268_s20 + $0x18] sm:$0xff]   ;;  %v2946_v12 = vld [vmem:[%s3268_s20 + $0x28] sm:$0xff]  }
 0x127   : > { %v3013_v19 = vpop.eup %3012  ;;  %v674_v20 = vmul.f32 %v3011_v14, %v3362_v5  ;;  %2511 = vmatprep.subr.bf16.mxu1 %v3120_v1  ;;  %v2955_v14 = vld [vmem:[%s3828_s3 + $0xb8] sm:$0xff]  }
 0x128   : > { %v3015_v22 = vpop.eup %3014  ;;  %v627_v23 = vadd.f32 1.0, %v3013_v19  ;;  %v678_v24 = vpack.c.bf16 %v666_v17, %v665_v15  ;;  %v2170_v15 = vld [vmem:[%s3830_s5 + $0x1] ss:$0 sm:$0xff]  ;;  %v2217_v17 = vld [vmem:[%s3830_s5 + $0x2] ss:$0 sm:$0xff] }
 0x129   : > { %v628_v60 = vadd.f32 1.0, %v3015_v22  ;;  %v682_v25 = vpack.c.bf16 %v674_v20, %v3410_v13  ;;  %v879_v0 = vpop.permute.xlu1 %878  ;;  %v2947_v13 = vld [vmem:[%s3268_s20 + $0x30] sm:$0xff]   ;;  %v3543_v19 = vadd.f32 %v2217_v17, %v2170_v15 }
 0x12a   : > { %3024 = vrcp.f32 %v627_v23  ;;  %2484 = vmatmul.mubr.bf16.gmra.mrb[16].mxu1 %v678_v24  ;;  %vm905_vm10 = vcmp.eq.s32.totalorder %v879_v0, %v365_v53 }
 0x12b   : > { %3026 = vrcp.f32 %v628_v60  ;;  %2512 = vmatpush3.bf16.msra.mxu1 %v2934_v21  ;;  %2487 = vmatprep.mubr.msk.bf16.mxu1 %vm3121_vm0, %v3120_v1 }
 0x12c   : > { %v3017_v2 = vpop.eup %3016  ;;  %2513 = vmatprep.subr.bf16.mxu1 %v3120_v1 }
 0x12d   : > { %v3019_v5 = vpop.eup %3018  ;;  %v667_v28 = vmul.f32 %v3017_v2, %v3367_v16  ;;  %v2937_v16 = vld [vmem:[%s3828_s3 + $0x168] sm:$0xff]   ;;  %v885_v4 = vpop.permute.xlu1 %884 }
 0x12e   : > { %v3021_v27 = vpop.eup %3020  ;;  %v668_v29 = vmul.f32 %v3019_v5, %v3374_v26  ;;  %vm907_vm13 = vcmp.eq.s32.totalorder %v885_v4, %v365_v53  ;;  %v2957_v5 = vld [vmem:[%s3828_s3 + $0xc8] sm:$0xff]  }
 0x12f   : > { %v3023_v31 = vpop.eup %3022  ;;  %v675_v32 = vmul.f32 %v3021_v27, %v3370_v18  ;;  %2514 = vmatpush3.bf16.msra.mxu1 %v2935_v58 }
 0x130   : > { %v676_v34 = vmul.f32 %v3023_v31, %v3378_v30  ;;  %v679_v35 = vpack.c.bf16 %v668_v29, %v667_v28  ;;  %2515 = vmatprep.subr.bf16.mxu1 %v3120_v1 }
 0x131   : > { %v891_v44 = vpop.permute.xlu1 %890 }
 0x132   : > { %2488 = vmatmul.mubr.bf16.gmra.mrb[20].mxu1 %v679_v35  ;;  %v683_v36 = vpack.c.bf16 %v676_v34, %v675_v32 }
 0x133   : > { %2491 = vmatprep.mubr.msk.bf16.mxu1 %vm3121_vm0, %v3120_v1  ;;  %2516 = vmatpush3.bf16.msra.mxu1 %v2936_v33  ;;  %v2958_v33 = vld [vmem:[%s3828_s3 + $0xd0] sm:$0xff]  }
 0x134   : > { %v3025_v18 = vpop.eup %3024  ;;  %2517 = vmatprep.subr.bf16.mxu1 %v3120_v1 }
 0x135   : > { %v3027_v26 = vpop.eup %3026  ;;  %v669_v37 = vmul.f32 %v3025_v18, %v3383_v40  ;;  %v2948_v40 = vld [vmem:[%s3828_s3 + $0x80] sm:$0xff]  }
 0x136   : > { %v670_v30 = vmul.f32 %v3027_v26, %v3387_v50  ;;  %2582 = vmatpush3.bf16.msra.mxu0 %v2948_v40  ;;  %v858_v50 = vpop.permute.xlu0 %857  ;;  %v2961_v40 = vld [vmem:[%s3828_s3 + $0xe8] sm:$0xff]  }
 0x137   : > { %2518 = vmatpush3.bf16.msra.mxu1 %v2937_v16  ;;  %2583 = vmatprep.subr.bf16.mxu0 %v3120_v1  ;;  %vm898_vm1 = vcmp.eq.s32.totalorder %v858_v50, %v365_v53 }
 0x138   : > { %v680_v41 = vpack.c.bf16 %v670_v30, %v669_v37  ;;  %2519 = vmatprep.subr.bf16.mxu1 %v3120_v1 }
 0x13a   : > { %2492 = vmatmul.mubr.bf16.gmra.mrb[24].mxu1 %v680_v41  ;;  %2584 = vmatpush3.bf16.msra.mxu0 %v2949_v45  ;;  %v861_v55 = vpop.permute.xlu0 %860 }
 0x13b   : > { %2495 = vmatprep.mubr.msk.bf16.mxu1 %vm3121_vm0, %v3120_v1  ;;  %2520 = vmatpush3.bf16.msra.mxu1 %v2938_v38  ;;  %vm899_vm2 = vcmp.eq.s32.totalorder %v861_v55, %v365_v53  ;;  %v2960_v38 = vld [vmem:[%s3828_s3 + $0xe0] sm:$0xff]  }
 0x13c   : > { %2521 = vmatprep.subr.bf16.mxu1 %v3120_v1  ;;  %2585 = vmatprep.subr.bf16.mxu0 %v3120_v1  ;;  %vm2203_vm3 = vmpackc.low %vm899_vm2, %vm898_vm1  ;;  %vm909_vm1 = vcmp.eq.s32.totalorder %v891_v44, %v365_v53 }
 0x13e   : > { %2586 = vmatpush3.bf16.msra.mxu0 %v2950_v46  ;;  %v870_v63 = vpop.permute.xlu0 %869 }
 0x13f   : > { %2522 = vmatpush3.bf16.msra.mxu1 %v2939_v43  ;;  %2587 = vmatprep.subr.bf16.mxu0 %v3120_v1  ;;  %vm902_vm8 = vcmp.eq.s32.totalorder %v870_v63, %v365_v53 }
 0x140   : > { %2551 = vmatprep.subr.bf16.mxu1 %v3120_v1  ;;  %vm2207_vm9 = vmpackc.low %vm903_vm7, %vm902_vm8  ;;  %vm1162_vm7 = vcmask 130048  }
 0x142   : > { %2496 = vmatmul.mubr.bf16.gmra.mrb[28].mxu1 %v681_v8  ;;  %2588 = vmatpush3.bf16.msra.mxu0 %v2951_v47  ;;  %v876_v3 = vpop.permute.xlu0 %875  ;;  %v897_v8 = vpop.permute.xlu1 %896 }
 0x143   : > { %2499 = vmatprep.mubr.msk.bf16.mxu1 %vm3121_vm0, %v3120_v1  ;;  %2589 = vmatprep.subr.bf16.mxu0 %v3120_v1  ;;  %vm904_vm11 = vcmp.eq.s32.totalorder %v876_v3, %v365_v53  ;;  %vm911_vm4 = vcmp.eq.s32.totalorder %v897_v8, %v365_v53 }
 0x144   : > { %vm2209_vm12 = vmpackc.low %vm905_vm10, %vm904_vm11 }
 0x146   : > { %2590 = vmatpush3.bf16.msra.mxu0 %v2952_v51  ;;  %v882_v6 = vpop.permute.xlu0 %881  ;;  %v2962_v51 = vld [vmem:[%s3828_s3 + $0xf0] sm:$0xff]  }
 0x147   : > { %2591 = vmatprep.subr.bf16.mxu0 %v3120_v1  ;;  %vm906_vm14 = vcmp.eq.s32.totalorder %v882_v6, %v365_v53 }
 0x148   : > { %vm2211_vm15 = vmpackc.low %vm907_vm13, %vm906_vm14 }
 0x14a   : > { %2500 = vmatmul.mubr.bf16.gmra.mrb[32].mxu1 %v682_v25  ;;  %2592 = vmatpush3.bf16.msra.mxu0 %v2953_v54  ;;  %v888_v7 = vpop.permute.xlu0 %887  ;;  %v2956_v25 = vld [vmem:[%s3828_s3 + $0xc0] sm:$0xff]  }
 0x14b   : > { %2503 = vmatprep.mubr.msk.bf16.mxu1 %vm3121_vm0, %v3120_v1  ;;  %2593 = vmatprep.subr.bf16.mxu0 %v3120_v1  ;;  %vm908_vm2 = vcmp.eq.s32.totalorder %v888_v7, %v365_v53 }
 0x14e   : > { %2594 = vmatpush3.bf16.msra.mxu0 %v2954_v59  ;;  %v894_v42 = vpop.permute.xlu0 %893 }
 0x14f   : > { %2595 = vmatprep.subr.bf16.mxu0 %v3120_v1  ;;  %vm910_vm5 = vcmp.eq.s32.totalorder %v894_v42, %v365_v53 }
 0x152   : > { %2504 = vmatmul.mubr.bf16.gmra.mrb[36].mxu1 %v683_v36  ;;  %2596 = vmatpush3.bf16.msra.mxu0 %v2955_v14  ;;  %v2959_v36 = vld [vmem:[%s3828_s3 + $0xd8] sm:$0xff]  }
 0x153   : > { %2523 = vmatprep.mubr.msk.bf16.mxu1 %vm3121_vm0, %v3120_v1  ;;  %2625 = vmatprep.subr.bf16.mxu0 %v3120_v1 }
 0x15a   : > { %2524 = vmatmul.mubr.msk.bf16.vlgmr.msra.gmra.mrb[12].mxu1 %vm2203_vm3, %v3123_v61  ;;  %vm2213_vm3 = vmpackc.low %vm909_vm1, %vm908_vm2 }
 0x15b   : > { %2552 = vmatpush3.bf16.msra.mxu1 %v2940_v57  ;;  %2527 = vmatprep.mubr.msk.bf16.mxu1 %vm3121_vm0, %v3120_v1 }
 0x162   : > { %2528 = vmatmul.mubr.msk.bf16.gmra.mrb[16].mxu1 %vm2205_vm6, %v3123_v61  ;;  %vm2215_vm6 = vmpackc.low %vm911_vm4, %vm910_vm5 }
 0x163   : > { %2531 = vmatprep.mubr.msk.bf16.mxu1 %vm3121_vm0, %v3120_v1 }
 0x16a   : > { %2532 = vmatmul.mubr.msk.bf16.gmra.mrb[20].mxu1 %vm2207_vm9, %v3123_v61 }
 0x16b   : > { %2535 = vmatprep.mubr.msk.bf16.mxu1 %vm3121_vm0, %v3120_v1 }
 0x172   : > { %2536 = vmatmul.mubr.msk.bf16.gmra.mrb[24].mxu1 %vm2209_vm12, %v3123_v61 }
 0x173   : > { %2539 = vmatprep.mubr.msk.bf16.mxu1 %vm3121_vm0, %v3120_v1 }
 0x17a   : > { %2540 = vmatmul.mubr.msk.bf16.gmra.mrb[28].mxu1 %vm2211_vm15, %v3123_v61 }
 0x17b   : > { %2543 = vmatprep.mubr.msk.bf16.mxu1 %vm3121_vm0, %v3120_v1 }
 0x182   : > { %2544 = vmatmul.mubr.msk.bf16.gmra.mrb[32].mxu1 %vm2213_vm3, %v3123_v61 }
 0x183   : > { %2547 = vmatprep.mubr.msk.bf16.mxu1 %vm3121_vm0, %v3120_v1 }
 0x18a   : > { %2548 = vmatmul.mubr.msk.bf16.gmra.mrb[36].mxu1 %vm2215_vm6, %v3123_v61 }
 0x18b   : > { %2553 = vmatprep.mubr.msk.bf16.mxu1 %vm3121_vm0, %v3120_v1 }
 0x192   : > { %2554 = vmatmul.mubr.msk.bf16.vlgmr.msra.gmra.mrb[12].mxu1 %vm1162_vm7, %v2941_v49 }
 0x193   : > { %2557 = vmatprep.mubr.msk.bf16.mxu1 %vm3121_vm0, %v3120_v1 }
 0x19a   : > { %2558 = vmatmul.mubr.msk.bf16.gmra.mrb[16].mxu1 %vm1162_vm7, %v2942_v9 }
 0x19b   : > { %2561 = vmatprep.mubr.msk.bf16.mxu1 %vm3121_vm0, %v3120_v1 }
 0x1a2   : > { %2562 = vmatmul.mubr.msk.bf16.gmra.mrb[20].mxu1 %vm1162_vm7, %v2943_v52 }
 0x1a3   : > { %2565 = vmatprep.mubr.msk.bf16.mxu1 %vm3121_vm0, %v3120_v1 }
 0x1aa   : > { %2566 = vmatmul.mubr.msk.bf16.gmra.mrb[24].mxu1 %vm1162_vm7, %v2944_v10 }
 0x1ab   : > { %2569 = vmatprep.mubr.msk.bf16.mxu1 %vm3121_vm0, %v3120_v1 }
 0x1b2   : > { %2570 = vmatmul.mubr.msk.bf16.gmra.mrb[28].mxu1 %vm1162_vm7, %v2945_v11  ;;  %v2963_v11 = vld [vmem:[%s3828_s3 + $0xf8] sm:$0xff]  }
 0x1b3   : > { %2573 = vmatprep.mubr.msk.bf16.mxu1 %vm3121_vm0, %v3120_v1 }
 0x1ba   : > { %2574 = vmatmul.mubr.msk.bf16.gmra.mrb[32].mxu1 %vm1162_vm7, %v2946_v12  ;;  %v3608_v12 = vld [vmem:[%s3830_s5 + $0x3] ss:$0 sm:$0xff] }
 0x1bb   : > { %2577 = vmatprep.mubr.msk.bf16.mxu1 %vm3121_vm0, %v3120_v1 }
 0x1c2   : > { %2578 = vmatmul.mubr.msk.bf16.gmra.mrb[36].mxu1 %vm1162_vm7, %v2947_v13 }
 0x265   : > { %v1218_v20 = vpop.f32.mrb[12].mxu1 }
 0x266   : > { %v2555_v21 = vpop.f32.mrb[13].mxu1  ;;  %v2730_v23 = vadd.f32 %v3543_v19, %v1218_v20 }
 0x267   : > { %v1221_v22 = vpop.f32.mrb[14].mxu1 }
 0x268   : > { %v2732_v24 = vadd.f32 %v3543_v19, %v1221_v22  ;;  %v2556_v60 = vpop.f32.mrb[15].mxu1 }
 0x26a   : > { %v1287_v58 = vpack.c.bf16 %v2732_v24, %v2730_v23  ;;  %v2964_v23 = vld [vmem:[%s3828_s3 + $0x100] sm:$0xff]  }
 0x26c   : > { %2598 = vmatmul.mubr.bf16.vlgmr.msra.gmra.mrb[16].mxu0 %v1287_v58 }
 0x26d   : > { %v1226_v2 = vpop.f32.mrb[16].mxu1  ;;  %2601 = vmatprep.mubr.msk.bf16.mxu0 %vm3121_vm0, %v3120_v1  ;;  %2626 = vmatpush3.bf16.msra.mxu0 %v2956_v25 }
 0x26e   : > { %v2559_v27 = vpop.f32.mrb[17].mxu1  ;;  %2627 = vmatprep.subr.bf16.mxu0 %v3120_v1  ;;  %v2734_v29 = vadd.f32 %v3543_v19, %v1226_v2 }
 0x26f   : > { %v1229_v28 = vpop.f32.mrb[18].mxu1 }
 0x270   : > { %v2736_v31 = vadd.f32 %v3543_v19, %v1229_v28  ;;  %v2560_v32 = vpop.f32.mrb[19].mxu1 }
 0x271   : > { %2628 = vmatpush3.bf16.msra.mxu0 %v2957_v5  ;;  %v2965_v5 = vld [vmem:[%s3828_s3 + $0x108] sm:$0xff]   ;;  %v2966_v32 = vld [vmem:[%s3828_s3 + $0x110] sm:$0xff]  }
 0x272   : > { %v1288_v34 = vpack.c.bf16 %v2736_v31, %v2734_v29  ;;  %2629 = vmatprep.subr.bf16.mxu0 %v3120_v1 }
 0x274   : > { %2602 = vmatmul.mubr.bf16.gmra.mrb[20].mxu0 %v1288_v34 }
 0x275   : > { %v1234_v35 = vpop.f32.mrb[20].mxu1  ;;  %2605 = vmatprep.mubr.msk.bf16.mxu0 %vm3121_vm0, %v3120_v1  ;;  %2630 = vmatpush3.bf16.msra.mxu0 %v2958_v33 }
 0x276   : > { %v2563_v16 = vpop.f32.mrb[21].mxu1  ;;  %2631 = vmatprep.subr.bf16.mxu0 %v3120_v1  ;;  %v2738_v26 = vadd.f32 %v3543_v19, %v1234_v35 }
 0x277   : > { %v1237_v18 = vpop.f32.mrb[22].mxu1 }
 0x278   : > { %v2740_v37 = vadd.f32 %v3543_v19, %v1237_v18  ;;  %v2564_v30 = vpop.f32.mrb[23].mxu1  ;;  %v2967_v18 = vld [vmem:[%s3828_s3 + $0x118] sm:$0xff]  }
 0x279   : > { %2632 = vmatpush3.bf16.msra.mxu0 %v2959_v36 }
 0x27a   : > { %v1289_v41 = vpack.c.bf16 %v2740_v37, %v2738_v26  ;;  %2633 = vmatprep.subr.bf16.mxu0 %v3120_v1 }
 0x27c   : > { %2606 = vmatmul.mubr.bf16.gmra.mrb[24].mxu0 %v1289_v41  ;;  %v2968_v41 = vld [vmem:[%s3828_s3 + $0x120] sm:$0xff]  }
 0x27d   : > { %v1242_v43 = vpop.f32.mrb[24].mxu1  ;;  %2609 = vmatprep.mubr.msk.bf16.mxu0 %vm3121_vm0, %v3120_v1  ;;  %2634 = vmatpush3.bf16.msra.mxu0 %v2960_v38 }
 0x27e   : > { %v2567_v45 = vpop.f32.mrb[25].mxu1  ;;  %2635 = vmatprep.subr.bf16.mxu0 %v3120_v1  ;;  %v2742_v47 = vadd.f32 %v3543_v19, %v1242_v43 }
 0x27f   : > { %v1245_v46 = vpop.f32.mrb[26].mxu1 }
 0x280   : > { %v2744_v48 = vadd.f32 %v3543_v19, %v1245_v46  ;;  %v2568_v50 = vpop.f32.mrb[27].mxu1 }
 0x281   : > { %2636 = vmatpush3.bf16.msra.mxu0 %v2961_v40 }
 0x282   : > { %v1290_v53 = vpack.c.bf16 %v2744_v48, %v2742_v47  ;;  %2637 = vmatprep.subr.bf16.mxu0 %v3120_v1  ;;  %v2969_v48 = vld [vmem:[%s3828_s3 + $0x128] sm:$0xff]  }
 0x284   : > { %2610 = vmatmul.mubr.bf16.gmra.mrb[28].mxu0 %v1290_v53 }
 0x285   : > { %v1250_v54 = vpop.f32.mrb[28].mxu1  ;;  %2613 = vmatprep.mubr.msk.bf16.mxu0 %vm3121_vm0, %v3120_v1  ;;  %2638 = vmatpush3.bf16.msra.mxu0 %v2962_v51 }
 0x286   : > { %v2571_v55 = vpop.f32.mrb[29].mxu1  ;;  %2639 = vmatprep.subr.bf16.mxu0 %v3120_v1  ;;  %v2746_v57 = vadd.f32 %v3543_v19, %v1250_v54 }
 0x287   : > { %v1253_v56 = vpop.f32.mrb[30].mxu1  ;;  %v2970_v55 = vld [vmem:[%s3828_s3 + $0x130] sm:$0xff]  }
 0x288   : > { %v2748_v59 = vadd.f32 %v3543_v19, %v1253_v56  ;;  %v2572_v61 = vpop.f32.mrb[31].mxu1 }
 0x289   : > { %2640 = vmatpush3.bf16.msra.mxu0 %v2963_v11 }
 0x28a   : > { %v1291_v62 = vpack.c.bf16 %v2748_v59, %v2746_v57  ;;  %2669 = vmatprep.subr.bf16.mxu0 %v3120_v1 }
 0x28c   : > { %2614 = vmatmul.mubr.bf16.gmra.mrb[32].mxu0 %v1291_v62 }
 0x28d   : > { %v1258_v39 = vpop.f32.mrb[32].mxu1  ;;  %2617 = vmatprep.mubr.msk.bf16.mxu0 %vm3121_vm0, %v3120_v1 }
 0x28e   : > { %v2575_v63 = vpop.f32.mrb[33].mxu1  ;;  %v2750_v3 = vadd.f32 %v3543_v19, %v1258_v39 }
 0x28f   : > { %v1261_v0 = vpop.f32.mrb[34].mxu1 }
 0x290   : > { %v2752_v4 = vadd.f32 %v3543_v19, %v1261_v0  ;;  %v2576_v6 = vpop.f32.mrb[35].mxu1 }
 0x292   : > { %v1292_v44 = vpack.c.bf16 %v2752_v4, %v2750_v3 }
 0x294   : > { %2618 = vmatmul.mubr.bf16.gmra.mrb[36].mxu0 %v1292_v44 }
 0x295   : > { %v1266_v7 = vpop.f32.mrb[36].mxu1  ;;  %2621 = vmatprep.mubr.msk.bf16.mxu0 %vm3121_vm0, %v3120_v1 }
 0x296   : > { %v2579_v8 = vpop.f32.mrb[37].mxu1  ;;  %v2754_v49 = vadd.f32 %v3543_v19, %v1266_v7 }
 0x297   : > { %v1269_v42 = vpop.f32.mrb[38].mxu1 }
 0x298   : > { %v2756_v9 = vadd.f32 %v3543_v19, %v1269_v42  ;;  %v2580_v52 = vpop.f32.mrb[39].mxu1 }
 0x29a   : > { %v1293_v10 = vpack.c.bf16 %v2756_v9, %v2754_v49 }
 0x29c   : > { %2622 = vmatmul.mubr.bf16.gmra.mrb[40].mxu0 %v1293_v10 }
 0x29d   : > { %2641 = vmatprep.mubr.msk.bf16.mxu0 %vm3121_vm0, %v3120_v1 }
 0x33f   : > { %v1397_v13 = vpop.f32.mrb[16].mxu0 }
 0x340   : > { %v1398_v14 = vadd.f32 %v3608_v12, %v1397_v13  ;;  %v2599_v15 = vpop.f32.mrb[17].mxu0 }
 0x341   : > { %v1400_v17 = vpop.f32.mrb[18].mxu0 }
 0x342   : > { %v1401_v19 = vadd.f32 %v3608_v12, %v1400_v17  ;;  %v2600_v20 = vpop.f32.mrb[19].mxu0  ;;  %v1452_v21 = vmax.f32 %v1398_v14, 0.0 }
 0x344   : > { %v1453_v22 = vmax.f32 %v1401_v19, 0.0 }
 0x346   : > { %v1466_v24 = vpack.c.bf16 %v1453_v22, %v1452_v21 }
 0x347   : > { %v1405_v60 = vpop.f32.mrb[20].mxu0 }
 0x348   : > { %v1406_v25 = vadd.f32 %v3608_v12, %v1405_v60  ;;  %v2603_v58 = vpop.f32.mrb[21].mxu0  ;;  %2642 = vmatmul.mubr.bf16.vlgmr.msra.gmra.mrb[44].mxu0 %v1466_v24  ;;  %v3672_v24 = vld [vmem:[%s3830_s5 + $0x4] ss:$0 sm:$0xff] }
 0x349   : > { %v1408_v2 = vpop.f32.mrb[22].mxu0  ;;  %2645 = vmatprep.mubr.msk.bf16.mxu0 %vm3121_vm0, %v3120_v1  ;;  %2670 = vmatpush3.bf16.msra.mxu0 %v2964_v23  ;;  %v2971_v23 = vld [vmem:[%s3828_s3 + $0x138] sm:$0xff]  }
 0x34a   : > { %v1409_v27 = vadd.f32 %v3608_v12, %v1408_v2  ;;  %v2604_v28 = vpop.f32.mrb[23].mxu0  ;;  %2671 = vmatprep.subr.bf16.mxu0 %v3120_v1  ;;  %v1454_v29 = vmax.f32 %v1406_v25, 0.0 }
 0x34c   : > { %v1455_v31 = vmax.f32 %v1409_v27, 0.0 }
 0x34d   : > { %2672 = vmatpush3.bf16.msra.mxu0 %v2965_v5 }
 0x34e   : > { %v1467_v33 = vpack.c.bf16 %v1455_v31, %v1454_v29  ;;  %2673 = vmatprep.subr.bf16.mxu0 %v3120_v1 }
 0x34f   : > { %v1413_v34 = vpop.f32.mrb[24].mxu0 }
 0x350   : > { %v1414_v35 = vadd.f32 %v3608_v12, %v1413_v34  ;;  %v2607_v36 = vpop.f32.mrb[25].mxu0  ;;  %2646 = vmatmul.mubr.bf16.gmra.mrb[48].mxu0 %v1467_v33 }
 0x351   : > { %v1416_v16 = vpop.f32.mrb[26].mxu0  ;;  %2649 = vmatprep.mubr.msk.bf16.mxu0 %vm3121_vm0, %v3120_v1  ;;  %2674 = vmatpush3.bf16.msra.mxu0 %v2966_v32 }
 0x352   : > { %v1417_v26 = vadd.f32 %v3608_v12, %v1416_v16  ;;  %v2608_v37 = vpop.f32.mrb[27].mxu0  ;;  %2675 = vmatprep.subr.bf16.mxu0 %v3120_v1  ;;  %v1456_v30 = vmax.f32 %v1414_v35, 0.0 }
 0x354   : > { %v1457_v38 = vmax.f32 %v1417_v26, 0.0 }
 0x355   : > { %2676 = vmatpush3.bf16.msra.mxu0 %v2967_v18 }
 0x356   : > { %v1468_v43 = vpack.c.bf16 %v1457_v38, %v1456_v30  ;;  %2677 = vmatprep.subr.bf16.mxu0 %v3120_v1 }
 0x357   : > { %v1421_v40 = vpop.f32.mrb[28].mxu0 }
 0x358   : > { %v1422_v45 = vadd.f32 %v3608_v12, %v1421_v40  ;;  %v2611_v46 = vpop.f32.mrb[29].mxu0  ;;  %2650 = vmatmul.mubr.bf16.gmra.mrb[52].mxu0 %v1468_v43 }
 0x359   : > { %v1424_v47 = vpop.f32.mrb[30].mxu0  ;;  %2653 = vmatprep.mubr.msk.bf16.mxu0 %vm3121_vm0, %v3120_v1  ;;  %2678 = vmatpush3.bf16.msra.mxu0 %v2968_v41 }
 0x35a   : > { %v1425_v50 = vadd.f32 %v3608_v12, %v1424_v47  ;;  %v2612_v51 = vpop.f32.mrb[31].mxu0  ;;  %2679 = vmatprep.subr.bf16.mxu0 %v3120_v1  ;;  %v1458_v53 = vmax.f32 %v1422_v45, 0.0 }
 0x35c   : > { %v1459_v54 = vmax.f32 %v1425_v50, 0.0 }
 0x35d   : > { %2680 = vmatpush3.bf16.msra.mxu0 %v2969_v48 }
 0x35e   : > { %v1469_v56 = vpack.c.bf16 %v1459_v54, %v1458_v53  ;;  %2681 = vmatprep.subr.bf16.mxu0 %v3120_v1 }
 0x35f   : > { %v1429_v57 = vpop.f32.mrb[32].mxu0 }
 0x360   : > { %v1430_v59 = vadd.f32 %v3608_v12, %v1429_v57  ;;  %v2615_v61 = vpop.f32.mrb[33].mxu0  ;;  %2654 = vmatmul.mubr.bf16.gmra.mrb[56].mxu0 %v1469_v56 }
 0x361   : > { %v1432_v62 = vpop.f32.mrb[34].mxu0  ;;  %2657 = vmatprep.mubr.msk.bf16.mxu0 %vm3121_vm0, %v3120_v1  ;;  %2682 = vmatpush3.bf16.msra.mxu0 %v2970_v55 }
 0x362   : > { %v1433_v39 = vadd.f32 %v3608_v12, %v1432_v62  ;;  %v2616_v63 = vpop.f32.mrb[35].mxu0  ;;  %2683 = vmatprep.subr.bf16.mxu0 %v3120_v1  ;;  %v1460_v0 = vmax.f32 %v1430_v59, 0.0 }
 0x364   : > { %v1461_v3 = vmax.f32 %v1433_v39, 0.0 }
 0x365   : > { %2684 = vmatpush3.bf16.msra.mxu0 %v2971_v23 }
 0x366   : > { %v1470_v4 = vpack.c.bf16 %v1461_v3, %v1460_v0 }
 0x367   : > { %v1437_v6 = vpop.f32.mrb[36].mxu0 }
 0x368   : > { %v1438_v44 = vadd.f32 %v3608_v12, %v1437_v6  ;;  %v2619_v7 = vpop.f32.mrb[37].mxu0  ;;  %2658 = vmatmul.mubr.bf16.gmra.mrb[60].mxu0 %v1470_v4 }
 0x369   : > { %v1440_v8 = vpop.f32.mrb[38].mxu0  ;;  %2661 = vmatprep.mubr.msk.bf16.mxu0 %vm3121_vm0, %v3120_v1 }
 0x36a   : > { %v1441_v42 = vadd.f32 %v3608_v12, %v1440_v8  ;;  %v2620_v49 = vpop.f32.mrb[39].mxu0  ;;  %v1462_v9 = vmax.f32 %v1438_v44, 0.0 }
 0x36c   : > { %v1463_v52 = vmax.f32 %v1441_v42, 0.0 }
 0x36e   : > { %v1471_v10 = vpack.c.bf16 %v1463_v52, %v1462_v9 }
 0x36f   : > { %v1445_v11 = vpop.f32.mrb[40].mxu0 }
 0x370   : > { %v1446_v13 = vadd.f32 %v3608_v12, %v1445_v11  ;;  %v2623_v14 = vpop.f32.mrb[41].mxu0  ;;  %2662 = vmatmul.mubr.bf16.gmra.mrb[64].mxu0 %v1471_v10 }
 0x371   : > { %v1448_v15 = vpop.f32.mrb[42].mxu0  ;;  %2665 = vmatprep.mubr.msk.bf16.mxu0 %vm3121_vm0, %v3120_v1 }
 0x372   : > { %v1449_v17 = vadd.f32 %v3608_v12, %v1448_v15  ;;  %v2624_v19 = vpop.f32.mrb[43].mxu0  ;;  %v1464_v20 = vmax.f32 %v1446_v13, 0.0 }
 0x374   : > { %v1465_v21 = vmax.f32 %v1449_v17, 0.0 }
 0x376   : > { %v1472_v22 = vpack.c.bf16 %v1465_v21, %v1464_v20 }
 0x378   : > { %2666 = vmatmul.mubr.bf16.gmra.mrb[68].mxu0 %v1472_v22 }
 0x379   : > { %2685 = vmatprep.mubr.msk.bf16.mxu0 %vm3121_vm0, %v3120_v1 }
 0x41b   : > { %v1576_v60 = vpop.f32.mrb[44].mxu0 }
 0x41c   : > { %v1577_v12 = vadd.f32 %v3672_v24, %v1576_v60  ;;  %v2643_v25 = vpop.f32.mrb[45].mxu0 }
 0x41d   : > { %v1579_v58 = vpop.f32.mrb[46].mxu0 }
 0x41e   : > { %v1580_v2 = vadd.f32 %v3672_v24, %v1579_v58  ;;  %v2644_v5 = vpop.f32.mrb[47].mxu0  ;;  %v1631_v27 = vmax.f32 %v1577_v12, 0.0  ;;  %v2299_v12 = vld [vmem:[%s3830_s5 + $0x5] ss:$0 sm:$0xff] }
 0x420   : > { %v1632_v28 = vmax.f32 %v1580_v2, 0.0 }
 0x422   : > { %v1645_v29 = vpack.c.bf16 %v1632_v28, %v1631_v27 }
 0x423   : > { %v1584_v31 = vpop.f32.mrb[48].mxu0 }
 0x424   : > { %v1585_v32 = vadd.f32 %v3672_v24, %v1584_v31  ;;  %v2647_v33 = vpop.f32.mrb[49].mxu0  ;;  %2686 = vmatmul.mubr.bf16.vlgmr.msra.gmra.mrb[72].mxu0 %v1645_v29 }
 0x425   : > { %v1587_v34 = vpop.f32.mrb[50].mxu0  ;;  %2689 = vmatprep.mubr.msk.bf16.mxu0 %vm3121_vm0, %v3120_v1 }
 0x426   : > { %v1588_v35 = vadd.f32 %v3672_v24, %v1587_v34  ;;  %v2648_v36 = vpop.f32.mrb[51].mxu0  ;;  %v1633_v16 = vmax.f32 %v1585_v32, 0.0 }
 0x428   : > { %v1634_v18 = vmax.f32 %v1588_v35, 0.0 }
 0x42a   : > { %v1646_v26 = vpack.c.bf16 %v1634_v18, %v1633_v16 }
 0x42b   : > { %v1592_v37 = vpop.f32.mrb[52].mxu0 }
 0x42c   : > { %v1593_v30 = vadd.f32 %v3672_v24, %v1592_v37  ;;  %v2651_v38 = vpop.f32.mrb[53].mxu0  ;;  %2690 = vmatmul.mubr.bf16.gmra.mrb[76].mxu0 %v1646_v26 }
 0x42d   : > { %v1595_v41 = vpop.f32.mrb[54].mxu0  ;;  %2693 = vmatprep.mubr.msk.bf16.mxu0 %vm3121_vm0, %v3120_v1 }
 0x42e   : > { %v1596_v43 = vadd.f32 %v3672_v24, %v1595_v41  ;;  %v2652_v40 = vpop.f32.mrb[55].mxu0  ;;  %v1635_v45 = vmax.f32 %v1593_v30, 0.0 }
 0x430   : > { %v1636_v46 = vmax.f32 %v1596_v43, 0.0 }
 0x432   : > { %v1647_v47 = vpack.c.bf16 %v1636_v46, %v1635_v45 }
 0x433   : > { %v1600_v48 = vpop.f32.mrb[56].mxu0 }
 0x434   : > { %v1601_v50 = vadd.f32 %v3672_v24, %v1600_v48  ;;  %v2655_v51 = vpop.f32.mrb[57].mxu0  ;;  %2694 = vmatmul.mubr.bf16.gmra.mrb[80].mxu0 %v1647_v47 }
 0x435   : > { %v1603_v53 = vpop.f32.mrb[58].mxu0  ;;  %2697 = vmatprep.mubr.msk.bf16.mxu0 %vm3121_vm0, %v3120_v1 }
 0x436   : > { %v1604_v54 = vadd.f32 %v3672_v24, %v1603_v53  ;;  %v2656_v55 = vpop.f32.mrb[59].mxu0  ;;  %v1637_v56 = vmax.f32 %v1601_v50, 0.0 }
 0x438   : > { %v1638_v57 = vmax.f32 %v1604_v54, 0.0 }
 0x43a   : > { %v1648_v59 = vpack.c.bf16 %v1638_v57, %v1637_v56 }
 0x43b   : > { %v1608_v61 = vpop.f32.mrb[60].mxu0 }
 0x43c   : > { %v1609_v62 = vadd.f32 %v3672_v24, %v1608_v61  ;;  %v2659_v39 = vpop.f32.mrb[61].mxu0  ;;  %2698 = vmatmul.mubr.bf16.gmra.mrb[84].mxu0 %v1648_v59 }
 0x43d   : > { %v1611_v63 = vpop.f32.mrb[62].mxu0  ;;  %2701 = vmatprep.mubr.msk.bf16.mxu0 %vm3121_vm0, %v3120_v1 }
 0x43e   : > { %v1612_v0 = vadd.f32 %v3672_v24, %v1611_v63  ;;  %v2660_v3 = vpop.f32.mrb[63].mxu0  ;;  %v1639_v4 = vmax.f32 %v1609_v62, 0.0 }
 0x440   : > { %v1640_v6 = vmax.f32 %v1612_v0, 0.0 }
 0x442   : > { %v1649_v44 = vpack.c.bf16 %v1640_v6, %v1639_v4 }
 0x443   : > { %v1616_v7 = vpop.f32.mrb[64].mxu0 }
 0x444   : > { %v1617_v8 = vadd.f32 %v3672_v24, %v1616_v7  ;;  %v2663_v42 = vpop.f32.mrb[65].mxu0  ;;  %2702 = vmatmul.mubr.bf16.gmra.mrb[88].mxu0 %v1649_v44 }
 0x445   : > { %v1619_v49 = vpop.f32.mrb[66].mxu0  ;;  %2705 = vmatprep.mubr.msk.bf16.mxu0 %vm3121_vm0, %v3120_v1 }
 0x446   : > { %v1620_v9 = vadd.f32 %v3672_v24, %v1619_v49  ;;  %v2664_v52 = vpop.f32.mrb[67].mxu0  ;;  %v1641_v10 = vmax.f32 %v1617_v8, 0.0 }
 0x448   : > { %v1642_v11 = vmax.f32 %v1620_v9, 0.0 }
 0x44a   : > { %v1650_v13 = vpack.c.bf16 %v1642_v11, %v1641_v10 }
 0x44b   : > { %v1624_v14 = vpop.f32.mrb[68].mxu0 }
 0x44c   : > { %v1625_v15 = vadd.f32 %v3672_v24, %v1624_v14  ;;  %v2667_v17 = vpop.f32.mrb[69].mxu0  ;;  %2706 = vmatmul.mubr.bf16.gmra.mrb[92].mxu0 %v1650_v13 }
 0x44d   : > { %v1627_v19 = vpop.f32.mrb[70].mxu0  ;;  %2709 = vmatprep.mubr.msk.bf16.mxu0 %vm3121_vm0, %v3120_v1 }
 0x44e   : > { %v1628_v20 = vadd.f32 %v3672_v24, %v1627_v19  ;;  %v2668_v21 = vpop.f32.mrb[71].mxu0  ;;  %v1643_v22 = vmax.f32 %v1625_v15, 0.0 }
 0x450   : > { %v1644_v23 = vmax.f32 %v1628_v20, 0.0 }
 0x452   : > { %v1651_v60 = vpack.c.bf16 %v1644_v23, %v1643_v22 }
 0x454   : > { %2710 = vmatmul.mubr.bf16.gmra.mrb[96].mxu0 %v1651_v60 }
 0x4f7   : > { %v1755_v25 = vpop.f32.mrb[72].mxu0 }
 0x4f8   : > { %v1756_v58 = vadd.f32 %v2299_v12, %v1755_v25  ;;  %v2687_v2 = vpop.f32.mrb[73].mxu0 }
 0x4f9   : > { %v1758_v5 = vpop.f32.mrb[74].mxu0 }
 0x4fa   : > { %1810 = vst.msk [vmem:[%s3704_s16] sm:$0xff] %vm1162_vm7, %v1756_v58  ;;  %v1759_v1 = vadd.f32 %v2299_v12, %v1758_v5  ;;  %v2688_v24 = vpop.f32.mrb[75].mxu0 }
 0x4fc   : > { %1811 = vst.msk [vmem:[%s3704_s16 + $0x8] sm:$0xff] %vm1162_vm7, %v1759_v1 }
 0x4ff   : > { %v1763_v27 = vpop.f32.mrb[76].mxu0 }
 0x500   : > { %v1764_v28 = vadd.f32 %v2299_v12, %v1763_v27  ;;  %v2691_v29 = vpop.f32.mrb[77].mxu0 }
 0x501   : > { %v1766_v31 = vpop.f32.mrb[78].mxu0 }
 0x502   : > { %1812 = vst.msk [vmem:[%s3704_s16 + $0x10] sm:$0xff] %vm1162_vm7, %v1764_v28  ;;  %v1767_v32 = vadd.f32 %v2299_v12, %v1766_v31  ;;  %v2692_v33 = vpop.f32.mrb[79].mxu0 }
 0x504   : > { %1813 = vst.msk [vmem:[%s3704_s16 + $0x18] sm:$0xff] %vm1162_vm7, %v1767_v32 }
 0x507   : > { %v1771_v34 = vpop.f32.mrb[80].mxu0 }
 0x508   : > { %v1772_v35 = vadd.f32 %v2299_v12, %v1771_v34  ;;  %v2695_v36 = vpop.f32.mrb[81].mxu0 }
 0x509   : > { %v1774_v16 = vpop.f32.mrb[82].mxu0 }
 0x50a   : > { %1814 = vst.msk [vmem:[%s3704_s16 + $0x20] sm:$0xff] %vm1162_vm7, %v1772_v35  ;;  %v1775_v18 = vadd.f32 %v2299_v12, %v1774_v16  ;;  %v2696_v26 = vpop.f32.mrb[83].mxu0 }
 0x50c   : > { %1815 = vst.msk [vmem:[%s3704_s16 + $0x28] sm:$0xff] %vm1162_vm7, %v1775_v18 }
 0x50f   : > { %v1779_v37 = vpop.f32.mrb[84].mxu0 }
 0x510   : > { %v1780_v30 = vadd.f32 %v2299_v12, %v1779_v37  ;;  %v2699_v38 = vpop.f32.mrb[85].mxu0 }
 0x511   : > { %v1782_v41 = vpop.f32.mrb[86].mxu0 }
 0x512   : > { %1816 = vst.msk [vmem:[%s3704_s16 + $0x30] sm:$0xff] %vm1162_vm7, %v1780_v30  ;;  %v1783_v43 = vadd.f32 %v2299_v12, %v1782_v41  ;;  %v2700_v40 = vpop.f32.mrb[87].mxu0 }
 0x514   : > { %1817 = vst.msk [vmem:[%s3704_s16 + $0x38] sm:$0xff] %vm1162_vm7, %v1783_v43 }
 0x517   : > { %v1787_v45 = vpop.f32.mrb[88].mxu0 }
 0x518   : > { %v1788_v46 = vadd.f32 %v2299_v12, %v1787_v45  ;;  %v2703_v47 = vpop.f32.mrb[89].mxu0 }
 0x519   : > { %v1790_v48 = vpop.f32.mrb[90].mxu0 }
 0x51a   : > { %1818 = vst.msk [vmem:[%s3704_s16 + $0x40] sm:$0xff] %vm1162_vm7, %v1788_v46  ;;  %v1791_v50 = vadd.f32 %v2299_v12, %v1790_v48  ;;  %v2704_v51 = vpop.f32.mrb[91].mxu0 }
 0x51c   : > { %1819 = vst.msk [vmem:[%s3704_s16 + $0x48] sm:$0xff] %vm1162_vm7, %v1791_v50 }
 0x51f   : > { %v1795_v53 = vpop.f32.mrb[92].mxu0 }
 0x520   : > { %v1796_v54 = vadd.f32 %v2299_v12, %v1795_v53  ;;  %v2707_v55 = vpop.f32.mrb[93].mxu0 }
 0x521   : > { %v1798_v56 = vpop.f32.mrb[94].mxu0 }
 0x522   : > { %1820 = vst.msk [vmem:[%s3704_s16 + $0x50] sm:$0xff] %vm1162_vm7, %v1796_v54  ;;  %v1799_v57 = vadd.f32 %v2299_v12, %v1798_v56  ;;  %v2708_v59 = vpop.f32.mrb[95].mxu0 }
 0x524   : > { %1821 = vst.msk [vmem:[%s3704_s16 + $0x58] sm:$0xff] %vm1162_vm7, %v1799_v57 }
 0x526   : > { %1830 = sbr.rel (!%p3184_p4) target bundleno = 1386 (0x56a), region = 48 }
 0x527   : > { %v1803_v61 = vpop.f32.mrb[96].mxu0 }
 0x528   : > { %v1804_v62 = vadd.f32 %v2299_v12, %v1803_v61  ;;  %v2711_v39 = vpop.f32.mrb[97].mxu0 }
 0x529   : > { %v1806_v63 = vpop.f32.mrb[98].mxu0 }
 0x52a   : > { %1822 = vst.msk [vmem:[%s3704_s16 + $0x60] sm:$0xff] %vm1162_vm7, %v1804_v62  ;;  %v1807_v0 = vadd.f32 %v2299_v12, %v1806_v63  ;;  %v2712_v3 = vpop.f32.mrb[99].mxu0 }
 0x52c   : > { %1823 = vst.msk [vmem:[%s3704_s16 + $0x68] sm:$0xff] %vm1162_vm7, %v1807_v0 }
 0x52d   : > { %s3840_s21 = smov (!%p1833_p8, %s1832_s21), 14 }
 0x52e   : > { %s2308_s23 = sshll.u32 %s3840_s21, 7 }
 0x52f   : > { %p2311_p9 = scmp.eq.s32.totalorder %s2308_s23, 0 }
 0x530   : > { %3028 = sdivrem.u32 (!%p2311_p9), %s3840_s21, 14 }
 0x531   : > { %1841 = sbr.rel (%p2311_p9) target bundleno = 1386 (0x56a), region = 52 }
 0x539   : > { %s3747_s29 = spop.drf %3028 }
 0x53a   : > { %p2312_p10 = scmp.le.s32.totalorder %s3747_s29, 0 }
 0x53b   : > { %s3833_s24 = smov (!%p2312_p10), %s3741_s14  ;;  %s3834_s10 = smov (!%p2312_p10), %s3704_s16 }
 0x53c   : > { %2061 = sbr.rel (%p2312_p10) target bundleno = 1357 (0x54d), region = 139  ;;  %s3756_s26 = smov (!%p2312_p10), 0  }
 0x53d   : > { %s3758_s27 = smov (!%p2312_p10), 0  }
 0x543 LB: >> { %v1931_v4 = vld [vmem:[%s3094_s10] sm:$0xff]  ;;  %v1933_v6 = vld [vmem:[%s3094_s10 + $0x8] sm:$0xff]  ;;  %v1935_v44 = vld [vmem:[%s3094_s10 + $0x10] sm:$0xff]  ;;  %s1959_s17 = sadd.s32 1, %s3098_s26  ;;  %s1925_s27 = sadd.s32 1, %s3102_s27   ;;  %s3102_s27 = sphi %s3758_s27, %s1925_s27   ;;  %s3098_s26 = sphi %s3756_s26, %s3835_s26   ;;  %s3094_s10 = sphi %s3834_s10, %s1964_s10   ;;  %s3090_s24 = sphi %s3833_s24, %s1965_s24  }
 0x544   : >> { %1932 = vst [vmem:[%s3090_s24] sm:$0xff] %v1931_v4  ;;  %1934 = vst [vmem:[%s3090_s24 + $0x8] sm:$0xff] %v1933_v6  ;;  %v1937_v7 = vld [vmem:[%s3094_s10 + $0x18] sm:$0xff]  ;;  %v1939_v8 = vld [vmem:[%s3094_s10 + $0x20] sm:$0xff]  ;;  %p1960_p11 = scmp.ge.s32.totalorder %s1959_s17, %s3747_s29  ;;  %p1924_p12 = scmp.ge.s32.totalorder %s1925_s27, %s3747_s29 }
 0x545   : >> { %1936 = vst [vmem:[%s3090_s24 + $0x10] sm:$0xff] %v1935_v44  ;;  %v1941_v42 = vld [vmem:[%s3094_s10 + $0x28] sm:$0xff]  ;;  %1938 = vst [vmem:[%s3090_s24 + $0x18] sm:$0xff] %v1937_v7  ;;  %v1943_v49 = vld [vmem:[%s3094_s10 + $0x30] sm:$0xff] }
 0x546   : >> { %1940 = vst [vmem:[%s3090_s24 + $0x20] sm:$0xff] %v1939_v8  ;;  %1942 = vst [vmem:[%s3090_s24 + $0x28] sm:$0xff] %v1941_v42  ;;  %v1945_v9 = vld [vmem:[%s3094_s10 + $0x38] sm:$0xff]  ;;  %v1947_v52 = vld [vmem:[%s3094_s10 + $0x40] sm:$0xff]  ;;  %s3842_s17 = smov (%p1960_p11, %s1959_s17), 0  ;;  %1927 = sbr.rel (!%p1924_p12) target bundleno = 1347 (0x543), region = 145 }
 0x547   : >> { %1944 = vst [vmem:[%s3090_s24 + $0x30] sm:$0xff] %v1943_v49  ;;  %1946 = vst [vmem:[%s3090_s24 + $0x38] sm:$0xff] %v1945_v9  ;;  %v1949_v10 = vld [vmem:[%s3094_s10 + $0x48] sm:$0xff]  ;;  %v1951_v11 = vld [vmem:[%s3094_s10 + $0x50] sm:$0xff]  ;;  %s1962_s30 = smul.u32 112, %s3842_s17  ;;  %s3835_s26 = smov %s3842_s17 }
 0x548   : >> { %1948 = vst [vmem:[%s3090_s24 + $0x40] sm:$0xff] %v1947_v52  ;;  %v1953_v13 = vld [vmem:[%s3094_s10 + $0x58] sm:$0xff]  ;;  %1950 = vst [vmem:[%s3090_s24 + $0x48] sm:$0xff] %v1949_v10  ;;  %v1955_v14 = vld [vmem:[%s3094_s10 + $0x60] sm:$0xff] }
 0x549   : >> { %1952 = vst [vmem:[%s3090_s24 + $0x50] sm:$0xff] %v1951_v11  ;;  %1954 = vst [vmem:[%s3090_s24 + $0x58] sm:$0xff] %v1953_v13  ;;  %v1957_v15 = vld [vmem:[%s3094_s10 + $0x68] sm:$0xff]  ;;  %s1964_s10 = scalar_lea.vmem %s3704_s16, %s1962_s30 [#allocation2]  }
 0x54a   : >> { %1956 = vst [vmem:[%s3090_s24 + $0x60] sm:$0xff] %v1955_v14  ;;  %1958 = vst [vmem:[%s3090_s24 + $0x68] sm:$0xff] %v1957_v15  ;;  %s1965_s24 = scalar_lea.vmem %s3741_s14, %s1962_s30  }
 0x54d PF: > { %3030 = sdivrem.u32 %s3840_s21, 14 }
 0x54e   : > { %s2313_s7 = smul.u32 112, %s3747_s29 }
 0x550   : > { %s1970_s20 = scalar_lea.vmem %s3704_s16, %s2313_s7 [#allocation2]   ;;  %s1972_s8 = scalar_lea.vmem %s3741_s14, %s2313_s7  }
 0x556   : > { %s3031_s9 = spop.drf %3030 }
 0x557   : > { %p2315_p13 = scmp.le.s32.totalorder %s3031_s9, 0 }
 0x558   : > { %s3104_s11 = smov (!%p2315_p13), %s1972_s8   ;;  %s3108_s12 = smov (!%p2315_p13), %s1970_s20  }
 0x559   : > { %2075 = sbr.rel (%p2315_p13) target bundleno = 1386 (0x56a), region = 150  ;;  %s3112_s15 = smov (!%p2315_p13), 0  }
 0x55a   : > { %s3116_s18 = smov (!%p2315_p13), 0  }
 0x560 LB: >> { %v1982_v17 = vld [vmem:[%s3110_s12] sm:$0xff]  ;;  %s1984_s19 = sadd.s32 1, %s3114_s15  ;;  %s1976_s18 = sadd.s32 1, %s3118_s18   ;;  %s3118_s18 = sphi %s3116_s18, %s1976_s18   ;;  %s3114_s15 = sphi %s3112_s15, %s3113_s15   ;;  %s3110_s12 = sphi %s3108_s12, %s1989_s12   ;;  %s3106_s11 = sphi %s3104_s11, %s1990_s11  }
 0x561   : >> { %1983 = vst [vmem:[%s3106_s11] sm:$0xff] %v1982_v17  ;;  %p1985_p0 = scmp.ge.s32.totalorder %s1984_s19, %s3031_s9  ;;  %p1975_p1 = scmp.ge.s32.totalorder %s1976_s18, %s3031_s9 }
 0x563   : >> { %s3844_s19 = smov (%p1985_p0, %s1984_s19), 0  ;;  %1978 = sbr.rel (!%p1975_p1) target bundleno = 1376 (0x560), region = 156 }
 0x564   : >> { %s2316_s16 = sshll.u32 %s3844_s19, 3  ;;  %s3113_s15 = smov %s3844_s19  }
 0x565   : >> { %s1989_s12 = scalar_lea.vmem %s1970_s20, %s2316_s16 [#allocation2]   ;;  %s1990_s11 = scalar_lea.vmem %s1972_s8, %s2316_s16  }
 0x56a PF: > { %p13_p2 = scmp.ge.s32.totalorder %s3174_s25, 4   ;;  %s3836_s21 = smov %s3082_s22 }
 0x56b   : > { %s3837_s22 = smov %s3182_s28  ;;  %s3838_s23 = smov %s3174_s25 }
 0x56c   :  { %15 = sbr.rel (!%p13_p2) target bundleno = 2 (0x2), region = 167 }

</bundles_post_ra>
